<compile_context>
chip_gen: v7x
topology: tpu7x:2x2x1
jax: 0.10.0
libtpu: 0.0.40
codegen_flags: <defaults>
</compile_context>

<pallas_src>
import functools

import jax
import jax.numpy as jnp
from jax.experimental import pallas as pl
from jax.experimental.pallas import tpu as pltpu

BN_EPS = 1e-5
_W_OFF = 8  # sublane-aligned column offset of the interior inside the scratch


@functools.lru_cache(maxsize=None)
def _vmem_limit_bytes():
    # ~25% headroom below physical VMEM: ~96 MiB on v5e/v6e (128 MiB), ~48 MiB
    # on v7x (64 MiB per TensorCore). Falls back to a safe 48 MiB.
    try:
        cap = int(pltpu.get_tpu_info().vmem_capacity_bytes)
    except Exception:
        cap = 64 * 1024 * 1024
    return max(32 * 1024 * 1024, min(cap * 3 // 4, 96 * 1024 * 1024))


# ----------------------------- Pallas kernels ------------------------------ #
def _conv3x3_bn_stats_kernel(fuse_preact, *refs):
    """One batch image per grid step.

    refs (fuse_preact=True):  x, affine(2,Cin), alpha(SMEM), w(9,Cin,Cout),
                              conv_out, sum_out, m2_out, pad_scratch
    refs (fuse_preact=False): x, w, conv_out, sum_out, m2_out, pad_scratch
    """
    if fuse_preact:
        x_ref, aff_ref, alpha_ref, w_ref, conv_ref, sum_ref, m2_ref, pad_ref = refs
    else:
        x_ref, w_ref, conv_ref, sum_ref, m2_ref, pad_ref = refs
        aff_ref = alpha_ref = None

    h, w, cin = x_ref.shape[1], x_ref.shape[2], x_ref.shape[3]
    cout = w_ref.shape[2]

    xt = x_ref[0]                                               # (h, w, cin)
    if fuse_preact:
        # Producer layer's folded BatchNorm (scale/shift) + PReLU applied
        # in-register, so only the raw conv output ever sits in HBM.
        scale = aff_ref[0:1, :].reshape(1, 1, cin)
        shift = aff_ref[1:2, :].reshape(1, 1, cin)
        a = alpha_ref[0, 0]
        y = xt.astype(jnp.float32) * scale + shift
        xt = jnp.where(y >= 0.0, y, a * y)
    xt = xt.astype(pad_ref.dtype)

    # Zero-padded tile lives only in VMEM (fused im2col). Interior starts at
    # row 1 / column _W_OFF so the windowed store is sublane-aligned; the zero
    # ring (row 0, row h+1, col _W_OFF-1, col _W_OFF+w) is never overwritten.
    pad_ref[...] = jnp.zeros_like(pad_ref)
    pad_ref[1:1 + h, _W_OFF:_W_OFF + w, :] = xt

    # 3x3 conv = 9 shifted (h*w, cin) @ (cin, cout) matmuls, f32 accumulation.
    acc = None
    for t in range(9):
        dy, dx = divmod(t, 3)
        c0 = _W_OFF - 1 + dx
        xs = pad_ref[dy:dy + h, c0:c0 + w, :].reshape(h * w, cin)
        p = jnp.dot(xs, w_ref[t], preferred_element_type=jnp.float32)
        acc = p if acc is None else acc + p

    conv_ref[0] = acc.reshape(h, w, cout).astype(conv_ref.dtype)

    # BatchNorm partials from the f32 accumulator: per-channel sum and
    # tile-centered M2 (merged with Chan's formula outside the kernel).
    rows = h * w
    s = jnp.sum(acc, axis=0, keepdims=True)                     # (1, cout)
    mu = s * (1.0 / rows)
    d = acc - mu
    m2 = jnp.sum(d * d, axis=0, keepdims=True)                  # (1, cout)
    sum_ref[0] = s
    m2_ref[0] = m2


def _bn_prelu_kernel(x_ref, aff_ref, alpha_ref, o_ref):
    # Final layer only: y = conv*scale + shift ; PReLU.
    c = x_ref.shape[3]
    scale = aff_ref[0:1, :].reshape(1, 1, c)
    shift = aff_ref[1:2, :].reshape(1, 1, c)
    a = alpha_ref[0, 0]
    y = x_ref[0].astype(jnp.float32) * scale + shift
    o_ref[0] = jnp.where(y >= 0.0, y, a * y).astype(o_ref.dtype)


# ------------------------- pallas_call wrappers ----------------------------- #
def _conv_pass(x, w9, affine=None, alpha=None, *, fuse_preact, store_dtype):
    """conv3x3 (pad=1, no bias) [optionally preceded by folded BN+PReLU of the
    producer layer], plus per-tile BatchNorm partials. Grid over batch."""
    n, h, w, cin = x.shape
    cout = w9.shape[-1]

    in_specs = [pl.BlockSpec((1, h, w, cin), lambda i: (i, 0, 0, 0))]
    args = [x]
    if fuse_preact:
        in_specs += [pl.BlockSpec((2, cin), lambda i: (0, 0)),
                     pl.BlockSpec(memory_space=pltpu.MemorySpace.SMEM)]
        args += [affine, alpha]
    # Resident conv weights (constant index_map -> fetched once).
    # TODO(synk): pipeline_mode=pl.Buffered(1) would drop this block's unused
    # second VMEM buffer (matters most on v7x's 64 MiB VMEM).
    in_specs += [pl.BlockSpec((9, cin, cout), lambda i: (0, 0, 0))]
    args += [w9]

    out_bytes = n * h * w * cout * jnp.dtype(store_dtype).itemsize
    flops = 2 * n * h * w * 9 * cin * cout
    bytes_accessed = (x.size * x.dtype.itemsize + w9.size * w9.dtype.itemsize
                      + out_bytes + 2 * n * cout * 4)

    return pl.pallas_call(
        functools.partial(_conv3x3_bn_stats_kernel, fuse_preact),
        out_shape=(jax.ShapeDtypeStruct((n, h, w, cout), store_dtype),
                   jax.ShapeDtypeStruct((n, 1, cout), jnp.float32),
                   jax.ShapeDtypeStruct((n, 1, cout), jnp.float32)),
        grid=(n,),
        in_specs=in_specs,
        out_specs=(pl.BlockSpec((1, h, w, cout), lambda i: (i, 0, 0, 0)),
                   pl.BlockSpec((1, 1, cout), lambda i: (i, 0, 0)),
                   pl.BlockSpec((1, 1, cout), lambda i: (i, 0, 0))),
        scratch_shapes=[pltpu.VMEM((h + 2, w + 9, cin), store_dtype)],
        compiler_params=pltpu.CompilerParams(
            dimension_semantics=("parallel",),   # even batch -> both v7x TCs busy
            vmem_limit_bytes=_vmem_limit_bytes()),
        cost_estimate=pl.CostEstimate(flops=flops, transcendentals=0,
                                      bytes_accessed=bytes_accessed),
    )(*args)


def _bn_prelu_pass(conv_out, affine, alpha):
    n, h, w, c = conv_out.shape
    bytes_accessed = (conv_out.size * conv_out.dtype.itemsize
                      + n * h * w * c * 4 + 2 * c * 4 + 4)
    return pl.pallas_call(
        _bn_prelu_kernel,
        out_shape=jax.ShapeDtypeStruct((n, h, w, c), jnp.float32),
        grid=(n,),
        in_specs=[pl.BlockSpec((1, h, w, c), lambda i: (i, 0, 0, 0)),
                  pl.BlockSpec((2, c), lambda i: (0, 0)),
                  pl.BlockSpec(memory_space=pltpu.MemorySpace.SMEM)],
        out_specs=pl.BlockSpec((1, h, w, c), lambda i: (i, 0, 0, 0)),
        compiler_params=pltpu.CompilerParams(
            dimension_semantics=("parallel",),
            vmem_limit_bytes=_vmem_limit_bytes()),
        cost_estimate=pl.CostEstimate(flops=3 * n * h * w * c, transcendentals=0,
                                      bytes_accessed=bytes_accessed),
    )(conv_out, affine, alpha)


# ------------------------------ stats merge ---------------------------------- #
def _bn_affine(sums, m2s, gamma, beta, rows_per_tile):
    """Chan-merge per-tile (sum, centered M2) into batch mean/var, then fold
    BatchNorm into a single per-channel scale/shift (2, C)."""
    sum_i = sums[:, 0, :]                                   # (tiles, C)
    m2_i = m2s[:, 0, :]
    n_tiles = sum_i.shape[0]
    total = n_tiles * rows_per_tile
    mean_i = sum_i / rows_per_tile
    mean = jnp.sum(sum_i, axis=0) / total
    m2 = jnp.sum(m2_i, axis=0) + rows_per_tile * jnp.sum((mean_i - mean) ** 2, axis=0)
    var = m2 / total                                        # biased var (train-mode BN)
    scale = gamma * jax.lax.rsqrt(var + BN_EPS)
    shift = beta - mean * scale
    return jnp.stack([scale, shift], axis=0).astype(jnp.float32)   # (2, C)


# ------------------------------ forward -------------------------------------- #
@functools.partial(jax.jit, static_argnames=("domain_label", "dim", "dropout_p",
                                             "use_bf16"))
def conv_block_nd_forward(params, x_nchw, domain_label=None, dim=2,
                          dropout_p=0.5, use_bf16=True):
    """ConvBlockND.forward (dim == 2). Input/output are NCHW like PyTorch.

    domain_label must be a static Python value (it drives a Python `if` in the
    original module); traced/array domain labels are not supported here.
    """
    assert dim == 2  # TODO(synk): dim==3 (Conv3d) path — same 27-tap scheme over (D,H,W).
    sel = 0 if domain_label == 0 else 1
    dt = jnp.bfloat16 if use_bf16 else jnp.float32

    # Single NCHW->NHWC transpose at model entry (and one back at exit); drop
    # both if the surrounding model stays NHWC.
    x = jnp.transpose(x_nchw, (0, 2, 3, 1)).astype(jnp.float32)
    n, h, w, cin = x.shape
    cout = params["w1_hwio"].shape[-1]
    rows = h * w

    w1 = params["w1_hwio"].reshape(9, cin, cout).astype(dt)
    w2 = params["w2_hwio"].reshape(9, cout, cout).astype(dt)

    # conv2d_1 (raw; bias dropped — it cancels exactly under train-mode BN).
    conv1, s1, q1 = _conv_pass(x, w1, fuse_preact=False, store_dtype=dt)
    aff1 = _bn_affine(s1, q1, params["bn1_gamma"][sel], params["bn1_beta"][sel], rows)

    # TODO(synk): dropout(x, dropout_p) in the reference is stochastic training
    # dropout; implemented as identity (eval semantics) for determinism.

    # conv2d_2 with bn2d1_{1,2} + PReLU(relu_1) folded into the tile load.
    conv2, s2, q2 = _conv_pass(conv1, w2, aff1, params["alpha1"],
                               fuse_preact=True, store_dtype=dt)
    aff2 = _bn_affine(s2, q2, params["bn2_gamma"][sel], params["bn2_beta"][sel], rows)

    # bn2d2_{1,2} + PReLU(relu_2) -> final f32 output.
    y = _bn_prelu_pass(conv2, aff2, params["alpha2"])
    return jnp.transpose(y, (0, 3, 1, 2))                    # NHWC -> NCHW


# ------------------------------ parameters ----------------------------------- #
def init_params(key, cin, cout):
    """Conv: kaiming-uniform-like; BN affine slightly randomized (instead of the
    torch ones/zeros default) so the domain-selected scale/shift path is actually
    exercised numerically; PReLU slope = torch default 0.25."""
    k1, k2, k3, k4 = jax.random.split(key, 4)

    def conv_init(k, c_in, c_out):
        fan_in = c_in * 9
        bound = 1.0 / (fan_in ** 0.5)
        kw, kb = jax.random.split(k)
        wgt = jax.random.uniform(kw, (3, 3, c_in, c_out), jnp.float32, -bound, bound)
        b = jax.random.uniform(kb, (c_out,), jnp.float32, -bound, bound)
        return wgt, b

    w1, b1 = conv_init(k1, cin, cout)
    w2, b2 = conv_init(k2, cout, cout)
    return dict(
        w1_hwio=w1, b1=b1,   # bias kept for PyTorch parity / reference; it
        w2_hwio=w2, b2=b2,   # cancels exactly under training-mode BatchNorm.
        bn1_gamma=jax.random.uniform(k3, (2, cout), jnp.float32, 0.9, 1.1),
        bn1_beta=jax.random.uniform(k3, (2, cout), jnp.float32, -0.1, 0.1),
        bn2_gamma=jax.random.uniform(k4, (2, cout), jnp.float32, 0.9, 1.1),
        bn2_beta=jax.random.uniform(k4, (2, cout), jnp.float32, -0.1, 0.1),
        alpha1=jnp.full((1, 1), 0.25, jnp.float32),
        alpha2=jnp.full((1, 1), 0.25, jnp.float32),
    )


# --------------------------- pure-JAX reference ------------------------------- #
def reference_forward(params, x_nchw, domain_label=None):
    sel = 0 if domain_label == 0 else 1
    x = jnp.transpose(x_nchw, (0, 2, 3, 1))
    dn = ("NHWC", "HWIO", "NHWC")

    def block(x, w_hwio, b, g, bt, a):
        y = jax.lax.conv_general_dilated(x, w_hwio, (1, 1), "SAME", dimension_numbers=dn)
        y = y + b.reshape(1, 1, 1, -1)
        m = jnp.mean(y, axis=(0, 1, 2), keepdims=True)
        v = jnp.mean((y - m) ** 2, axis=(0, 1, 2), keepdims=True)
        y = (y - m) * jax.lax.rsqrt(v + BN_EPS)
        y = y * g.reshape(1, 1, 1, -1) + bt.reshape(1, 1, 1, -1)
        return jnp.where(y >= 0, y, a.reshape(()) * y)

    y = block(x, params["w1_hwio"], params["b1"],
              params["bn1_gamma"][sel], params["bn1_beta"][sel], params["alpha1"])
    y = block(y, params["w2_hwio"], params["b2"],
              params["bn2_gamma"][sel], params["bn2_beta"][sel], params["alpha2"])
    return jnp.transpose(y, (0, 3, 1, 2))


if __name__ == "__main__":
    key = jax.random.PRNGKey(0)
    kx, kp_ = jax.random.split(key)

    N, Cin, H, W = 2, 4, 16, 16
    Cout = 8
    x = jax.random.normal(kx, (N, Cin, H, W), jnp.float32)
    params = init_params(kp_, Cin, Cout)

    ref = reference_forward(params, x, domain_label=1)

    # f32 path: tight check against the pure-JAX reference.
    out_f32 = conv_block_nd_forward(params, x, domain_label=1, dim=2, use_bf16=False)
    out_f32 = jax.block_until_ready(out_f32)
    assert out_f32.shape == (N, Cout, H, W)
    assert jnp.allclose(out_f32, ref, atol=2e-3, rtol=2e-3), "f32 path mismatch vs reference"

    # bf16-storage / f32-accumulate fast path: looser tolerance.
    out_bf16 = conv_block_nd_forward(params, x, domain_label=1, dim=2, use_bf16=True)
    out_bf16 = jax.block_until_ready(out_bf16)
    assert out_bf16.shape == (N, Cout, H, W)
    assert jnp.allclose(out_bf16, ref, atol=5e-2, rtol=5e-2), "bf16 path mismatch vs reference"

    print("KERNEL_OK")
</pallas_src>

<mosaic_0001>
module attributes {stable_mosaic.version = 11 : i64} {
  func.func @_conv3x3_bn_stats_kernel(%arg0: i32, %arg1: memref<1x16x16x4xf32, #tpu.memory_space<vmem>>, %arg2: memref<9x4x8xf32, #tpu.memory_space<vmem>>, %arg3: memref<1x16x16x8xf32, #tpu.memory_space<vmem>>, %arg4: memref<1x1x8xf32, #tpu.memory_space<vmem>>, %arg5: memref<1x1x8xf32, #tpu.memory_space<vmem>>, %arg6: memref<18x25x4xf32, #tpu.memory_space<vmem>>) attributes {dimension_semantics = [#tpu.dimension_semantics<parallel>], iteration_bounds = array<i64: 2>, scalar_prefetch = 0 : i64, scratch_operands = 1 : i64, tpu.core_type = #tpu.core_type<tc>, window_params = [{transform_indices = @transform_0, window_bounds = array<i64: 1, 16, 16, 4>}, {pipeline_mode = #tpu.pipeline_mode<synchronous>, transform_indices = @transform_1, window_bounds = array<i64: 9, 4, 8>}, {transform_indices = @transform_2, window_bounds = array<i64: 1, 16, 16, 8>}, {transform_indices = @transform_3, window_bounds = array<i64: 1, 1, 8>}, {transform_indices = @transform_4, window_bounds = array<i64: 1, 1, 8>}]} {
    %c0 = arith.constant 0 : index
    %c0_0 = arith.constant 0 : index
    %c0_1 = arith.constant 0 : index
    %c0_2 = arith.constant 0 : index
    %0 = vector.load %arg1[%c0, %c0_0, %c0_1, %c0_2] : memref<1x16x16x4xf32, #tpu.memory_space<vmem>>, vector<1x16x16x4xf32>
    %1 = vector.shape_cast %0 : vector<1x16x16x4xf32> to vector<16x16x4xf32>
    %cst = arith.constant 0.000000e+00 : f32
    %2 = vector.broadcast %cst : f32 to vector<18x25x4xf32>
    %c0_3 = arith.constant 0 : index
    %c0_4 = arith.constant 0 : index
    %c0_5 = arith.constant 0 : index
    %3 = vector.load %arg6[%c0_3, %c0_4, %c0_5] : memref<18x25x4xf32, #tpu.memory_space<vmem>>, vector<18x25x4xf32>
    tpu.vector_store %arg6[%c0_3, %c0_4, %c0_5], %2 {strides = array<i32>} : memref<18x25x4xf32, #tpu.memory_space<vmem>>, vector<18x25x4xf32>,
    %c1 = arith.constant 1 : index
    %c8 = arith.constant 8 : index
    %c0_6 = arith.constant 0 : index
    %4 = vector.load %arg6[%c1, %c8, %c0_6] : memref<18x25x4xf32, #tpu.memory_space<vmem>>, vector<16x16x4xf32>
    tpu.vector_store %arg6[%c1, %c8, %c0_6], %1 {strides = array<i32>} : memref<18x25x4xf32, #tpu.memory_space<vmem>>, vector<16x16x4xf32>,
    %c0_7 = arith.constant 0 : index
    %c7 = arith.constant 7 : index
    %c0_8 = arith.constant 0 : index
    %5 = vector.load %arg6[%c0_7, %c7, %c0_8] : memref<18x25x4xf32, #tpu.memory_space<vmem>>, vector<16x16x4xf32>
    %6 = vector.shape_cast %5 : vector<16x16x4xf32> to vector<256x4xf32>
    %c0_9 = arith.constant 0 : index
    %c0_10 = arith.constant 0 : index
    %c0_11 = arith.constant 0 : index
    %7 = vector.load %arg2[%c0_9, %c0_10, %c0_11] : memref<9x4x8xf32, #tpu.memory_space<vmem>>, vector<1x4x8xf32>
    %8 = vector.shape_cast %7 : vector<1x4x8xf32> to vector<4x8xf32>
    %cst_12 = arith.constant dense<0.000000e+00> : vector<256x8xf32>
    %9 = tpu.matmul %6, %8, %cst_12 {dimension_numbers = #tpu.dot_dimension_numbers<[1], [0], [0], [1], [0, 0, 1, 1], [], []>} : vector<256x4xf32>, vector<4x8xf32>, vector<256x8xf32> -> vector<256x8xf32>
    %c0_13 = arith.constant 0 : index
    %c8_14 = arith.constant 8 : index
    %c0_15 = arith.constant 0 : index
    %10 = vector.load %arg6[%c0_13, %c8_14, %c0_15] : memref<18x25x4xf32, #tpu.memory_space<vmem>>, vector<16x16x4xf32>
    %11 = vector.shape_cast %10 : vector<16x16x4xf32> to vector<256x4xf32>
    %c1_16 = arith.constant 1 : index
    %c0_17 = arith.constant 0 : index
    %c0_18 = arith.constant 0 : index
    %12 = vector.load %arg2[%c1_16, %c0_17, %c0_18] : memref<9x4x8xf32, #tpu.memory_space<vmem>>, vector<1x4x8xf32>
    %13 = vector.shape_cast %12 : vector<1x4x8xf32> to vector<4x8xf32>
    %cst_19 = arith.constant dense<0.000000e+00> : vector<256x8xf32>
    %14 = tpu.matmul %11, %13, %cst_19 {dimension_numbers = #tpu.dot_dimension_numbers<[1], [0], [0], [1], [0, 0, 1, 1], [], []>} : vector<256x4xf32>, vector<4x8xf32>, vector<256x8xf32> -> vector<256x8xf32>
    %15 = arith.addf %9, %14 : vector<256x8xf32>
    %c0_20 = arith.constant 0 : index
    %c9 = arith.constant 9 : index
    %c0_21 = arith.constant 0 : index
    %16 = vector.load %arg6[%c0_20, %c9, %c0_21] : memref<18x25x4xf32, #tpu.memory_space<vmem>>, vector<16x16x4xf32>
    %17 = vector.shape_cast %16 : vector<16x16x4xf32> to vector<256x4xf32>
    %c2 = arith.constant 2 : index
    %c0_22 = arith.constant 0 : index
    %c0_23 = arith.constant 0 : index
    %18 = vector.load %arg2[%c2, %c0_22, %c0_23] : memref<9x4x8xf32, #tpu.memory_space<vmem>>, vector<1x4x8xf32>
    %19 = vector.shape_cast %18 : vector<1x4x8xf32> to vector<4x8xf32>
    %cst_24 = arith.constant dense<0.000000e+00> : vector<256x8xf32>
    %20 = tpu.matmul %17, %19, %cst_24 {dimension_numbers = #tpu.dot_dimension_numbers<[1], [0], [0], [1], [0, 0, 1, 1], [], []>} : vector<256x4xf32>, vector<4x8xf32>, vector<256x8xf32> -> vector<256x8xf32>
    %21 = arith.addf %15, %20 : vector<256x8xf32>
    %c1_25 = arith.constant 1 : index
    %c7_26 = arith.constant 7 : index
    %c0_27 = arith.constant 0 : index
    %22 = vector.load %arg6[%c1_25, %c7_26, %c0_27] : memref<18x25x4xf32, #tpu.memory_space<vmem>>, vector<16x16x4xf32>
    %23 = vector.shape_cast %22 : vector<16x16x4xf32> to vector<256x4xf32>
    %c3 = arith.constant 3 : index
    %c0_28 = arith.constant 0 : index
    %c0_29 = arith.constant 0 : index
    %24 = vector.load %arg2[%c3, %c0_28, %c0_29] : memref<9x4x8xf32, #tpu.memory_space<vmem>>, vector<1x4x8xf32>
    %25 = vector.shape_cast %24 : vector<1x4x8xf32> to vector<4x8xf32>
    %cst_30 = arith.constant dense<0.000000e+00> : vector<256x8xf32>
    %26 = tpu.matmul %23, %25, %cst_30 {dimension_numbers = #tpu.dot_dimension_numbers<[1], [0], [0], [1], [0, 0, 1, 1], [], []>} : vector<256x4xf32>, vector<4x8xf32>, vector<256x8xf32> -> vector<256x8xf32>
    %27 = arith.addf %21, %26 : vector<256x8xf32>
    %c1_31 = arith.constant 1 : index
    %c8_32 = arith.constant 8 : index
    %c0_33 = arith.constant 0 : index
    %28 = vector.load %arg6[%c1_31, %c8_32, %c0_33] : memref<18x25x4xf32, #tpu.memory_space<vmem>>, vector<16x16x4xf32>
    %29 = vector.shape_cast %28 : vector<16x16x4xf32> to vector<256x4xf32>
    %c4 = arith.constant 4 : index
    %c0_34 = arith.constant 0 : index
    %c0_35 = arith.constant 0 : index
    %30 = vector.load %arg2[%c4, %c0_34, %c0_35] : memref<9x4x8xf32, #tpu.memory_space<vmem>>, vector<1x4x8xf32>
    %31 = vector.shape_cast %30 : vector<1x4x8xf32> to vector<4x8xf32>
    %cst_36 = arith.constant dense<0.000000e+00> : vector<256x8xf32>
    %32 = tpu.matmul %29, %31, %cst_36 {dimension_numbers = #tpu.dot_dimension_numbers<[1], [0], [0], [1], [0, 0, 1, 1], [], []>} : vector<256x4xf32>, vector<4x8xf32>, vector<256x8xf32> -> vector<256x8xf32>
    %33 = arith.addf %27, %32 : vector<256x8xf32>
    %c1_37 = arith.constant 1 : index
    %c9_38 = arith.constant 9 : index
    %c0_39 = arith.constant 0 : index
    %34 = vector.load %arg6[%c1_37, %c9_38, %c0_39] : memref<18x25x4xf32, #tpu.memory_space<vmem>>, vector<16x16x4xf32>
    %35 = vector.shape_cast %34 : vector<16x16x4xf32> to vector<256x4xf32>
    %c5 = arith.constant 5 : index
    %c0_40 = arith.constant 0 : index
    %c0_41 = arith.constant 0 : index
    %36 = vector.load %arg2[%c5, %c0_40, %c0_41] : memref<9x4x8xf32, #tpu.memory_space<vmem>>, vector<1x4x8xf32>
    %37 = vector.shape_cast %36 : vector<1x4x8xf32> to vector<4x8xf32>
    %cst_42 = arith.constant dense<0.000000e+00> : vector<256x8xf32>
    %38 = tpu.matmul %35, %37, %cst_42 {dimension_numbers = #tpu.dot_dimension_numbers<[1], [0], [0], [1], [0, 0, 1, 1], [], []>} : vector<256x4xf32>, vector<4x8xf32>, vector<256x8xf32> -> vector<256x8xf32>
    %39 = arith.addf %33, %38 : vector<256x8xf32>
    %c2_43 = arith.constant 2 : index
    %c7_44 = arith.constant 7 : index
    %c0_45 = arith.constant 0 : index
    %40 = vector.load %arg6[%c2_43, %c7_44, %c0_45] : memref<18x25x4xf32, #tpu.memory_space<vmem>>, vector<16x16x4xf32>
    %41 = vector.shape_cast %40 : vector<16x16x4xf32> to vector<256x4xf32>
    %c6 = arith.constant 6 : index
    %c0_46 = arith.constant 0 : index
    %c0_47 = arith.constant 0 : index
    %42 = vector.load %arg2[%c6, %c0_46, %c0_47] : memref<9x4x8xf32, #tpu.memory_space<vmem>>, vector<1x4x8xf32>
    %43 = vector.shape_cast %42 : vector<1x4x8xf32> to vector<4x8xf32>
    %cst_48 = arith.constant dense<0.000000e+00> : vector<256x8xf32>
    %44 = tpu.matmul %41, %43, %cst_48 {dimension_numbers = #tpu.dot_dimension_numbers<[1], [0], [0], [1], [0, 0, 1, 1], [], []>} : vector<256x4xf32>, vector<4x8xf32>, vector<256x8xf32> -> vector<256x8xf32>
    %45 = arith.addf %39, %44 : vector<256x8xf32>
    %c2_49 = arith.constant 2 : index
    %c8_50 = arith.constant 8 : index
    %c0_51 = arith.constant 0 : index
    %46 = vector.load %arg6[%c2_49, %c8_50, %c0_51] : memref<18x25x4xf32, #tpu.memory_space<vmem>>, vector<16x16x4xf32>
    %47 = vector.shape_cast %46 : vector<16x16x4xf32> to vector<256x4xf32>
    %c7_52 = arith.constant 7 : index
    %c0_53 = arith.constant 0 : index
    %c0_54 = arith.constant 0 : index
    %48 = vector.load %arg2[%c7_52, %c0_53, %c0_54] : memref<9x4x8xf32, #tpu.memory_space<vmem>>, vector<1x4x8xf32>
    %49 = vector.shape_cast %48 : vector<1x4x8xf32> to vector<4x8xf32>
    %cst_55 = arith.constant dense<0.000000e+00> : vector<256x8xf32>
    %50 = tpu.matmul %47, %49, %cst_55 {dimension_numbers = #tpu.dot_dimension_numbers<[1], [0], [0], [1], [0, 0, 1, 1], [], []>} : vector<256x4xf32>, vector<4x8xf32>, vector<256x8xf32> -> vector<256x8xf32>
    %51 = arith.addf %45, %50 : vector<256x8xf32>
    %c2_56 = arith.constant 2 : index
    %c9_57 = arith.constant 9 : index
    %c0_58 = arith.constant 0 : index
    %52 = vector.load %arg6[%c2_56, %c9_57, %c0_58] : memref<18x25x4xf32, #tpu.memory_space<vmem>>, vector<16x16x4xf32>
    %53 = vector.shape_cast %52 : vector<16x16x4xf32> to vector<256x4xf32>
    %c8_59 = arith.constant 8 : index
    %c0_60 = arith.constant 0 : index
    %c0_61 = arith.constant 0 : index
    %54 = vector.load %arg2[%c8_59, %c0_60, %c0_61] : memref<9x4x8xf32, #tpu.memory_space<vmem>>, vector<1x4x8xf32>
    %55 = vector.shape_cast %54 : vector<1x4x8xf32> to vector<4x8xf32>
    %cst_62 = arith.constant dense<0.000000e+00> : vector<256x8xf32>
    %56 = tpu.matmul %53, %55, %cst_62 {dimension_numbers = #tpu.dot_dimension_numbers<[1], [0], [0], [1], [0, 0, 1, 1], [], []>} : vector<256x4xf32>, vector<4x8xf32>, vector<256x8xf32> -> vector<256x8xf32>
    %57 = arith.addf %51, %56 : vector<256x8xf32>
    %58 = vector.shape_cast %57 : vector<256x8xf32> to vector<16x16x8xf32>
    %c0_63 = arith.constant 0 : index
    %c0_64 = arith.constant 0 : index
    %c0_65 = arith.constant 0 : index
    %c0_66 = arith.constant 0 : index
    %59 = vector.load %arg3[%c0_63, %c0_64, %c0_65, %c0_66] : memref<1x16x16x8xf32, #tpu.memory_space<vmem>>, vector<1x16x16x8xf32>
    %60 = vector.shape_cast %59 : vector<1x16x16x8xf32> to vector<16x16x8xf32>
    %61 = vector.shape_cast %58 : vector<16x16x8xf32> to vector<1x16x16x8xf32>
    tpu.vector_store %arg3[%c0_63, %c0_64, %c0_65, %c0_66], %61 {strides = array<i32>} : memref<1x16x16x8xf32, #tpu.memory_space<vmem>>, vector<1x16x16x8xf32>,
    %cst_67 = arith.constant dense<0.000000e+00> : vector<8xf32>
    %62 = vector.multi_reduction <add>, %57, %cst_67 [0] : vector<256x8xf32> to vector<8xf32>
    %63 = vector.shape_cast %62 : vector<8xf32> to vector<1x8xf32>
    %cst_68 = arith.constant 3.906250e-03 : f32
    %64 = vector.broadcast %cst_68 : f32 to vector<1x8xf32>
    %65 = arith.mulf %63, %64 : vector<1x8xf32>
    %66 = vector.broadcast %65 : vector<1x8xf32> to vector<256x8xf32>
    %67 = arith.subf %57, %66 : vector<256x8xf32>
    %68 = arith.mulf %67, %67 : vector<256x8xf32>
    %cst_69 = arith.constant dense<0.000000e+00> : vector<8xf32>
    %69 = vector.multi_reduction <add>, %68, %cst_69 [0] : vector<256x8xf32> to vector<8xf32>
    %70 = vector.shape_cast %69 : vector<8xf32> to vector<1x8xf32>
    %c0_70 = arith.constant 0 : index
    %c0_71 = arith.constant 0 : index
    %c0_72 = arith.constant 0 : index
    %71 = vector.load %arg4[%c0_70, %c0_71, %c0_72] : memref<1x1x8xf32, #tpu.memory_space<vmem>>, vector<1x1x8xf32>
    %72 = vector.shape_cast %71 : vector<1x1x8xf32> to vector<1x8xf32>
    %73 = vector.shape_cast %63 : vector<1x8xf32> to vector<1x1x8xf32>
    tpu.vector_store %arg4[%c0_70, %c0_71, %c0_72], %73 {strides = array<i32>} : memref<1x1x8xf32, #tpu.memory_space<vmem>>, vector<1x1x8xf32>,
    %c0_73 = arith.constant 0 : index
    %c0_74 = arith.constant 0 : index
    %c0_75 = arith.constant 0 : index
    %74 = vector.load %arg5[%c0_73, %c0_74, %c0_75] : memref<1x1x8xf32, #tpu.memory_space<vmem>>, vector<1x1x8xf32>
    %75 = vector.shape_cast %74 : vector<1x1x8xf32> to vector<1x8xf32>
    %76 = vector.shape_cast %70 : vector<1x8xf32> to vector<1x1x8xf32>
    tpu.vector_store %arg5[%c0_73, %c0_74, %c0_75], %76 {strides = array<i32>} : memref<1x1x8xf32, #tpu.memory_space<vmem>>, vector<1x1x8xf32>,
    return
  }
  func.func @transform_0(%arg0: i32) -> (i32, i32, i32, i32) {
    %c0_i32 = arith.constant 0 : i32
    %c0_i32_0 = arith.constant 0 : i32
    %c0_i32_1 = arith.constant 0 : i32
    %c0_i32_2 = arith.constant 0 : i32
    return %arg0, %c0_i32, %c0_i32_0, %c0_i32_1 : i32, i32, i32, i32
  }
  func.func @transform_1(%arg0: i32) -> (i32, i32, i32) {
    %c0_i32 = arith.constant 0 : i32
    %c0_i32_0 = arith.constant 0 : i32
    %c0_i32_1 = arith.constant 0 : i32
    %c0_i32_2 = arith.constant 0 : i32
    return %c0_i32, %c0_i32_0, %c0_i32_1 : i32, i32, i32
  }
  func.func @transform_2(%arg0: i32) -> (i32, i32, i32, i32) {
    %c0_i32 = arith.constant 0 : i32
    %c0_i32_0 = arith.constant 0 : i32
    %c0_i32_1 = arith.constant 0 : i32
    %c0_i32_2 = arith.constant 0 : i32
    return %arg0, %c0_i32, %c0_i32_0, %c0_i32_1 : i32, i32, i32, i32
  }
  func.func @transform_3(%arg0: i32) -> (i32, i32, i32) {
    %c0_i32 = arith.constant 0 : i32
    %c0_i32_0 = arith.constant 0 : i32
    %c0_i32_1 = arith.constant 0 : i32
    return %arg0, %c0_i32, %c0_i32_0 : i32, i32, i32
  }
  func.func @transform_4(%arg0: i32) -> (i32, i32, i32) {
    %c0_i32 = arith.constant 0 : i32
    %c0_i32_0 = arith.constant 0 : i32
    %c0_i32_1 = arith.constant 0 : i32
    return %arg0, %c0_i32, %c0_i32_0 : i32, i32, i32
  }
}

module attributes {stable_mosaic.version = 11 : i64} {
  func.func @_conv3x3_bn_stats_kernel(%arg0: i32, %arg1: memref<1x16x16x8xf32, #tpu.memory_space<vmem>>, %arg2: memref<2x8xf32, #tpu.memory_space<vmem>>, %arg3: memref<1x1xf32, #tpu.memory_space<smem>>, %arg4: memref<9x8x8xf32, #tpu.memory_space<vmem>>, %arg5: memref<1x16x16x8xf32, #tpu.memory_space<vmem>>, %arg6: memref<1x1x8xf32, #tpu.memory_space<vmem>>, %arg7: memref<1x1x8xf32, #tpu.memory_space<vmem>>, %arg8: memref<18x25x8xf32, #tpu.memory_space<vmem>>) attributes {dimension_semantics = [#tpu.dimension_semantics<parallel>], iteration_bounds = array<i64: 2>, scalar_prefetch = 0 : i64, scratch_operands = 1 : i64, tpu.core_type = #tpu.core_type<tc>, window_params = [{transform_indices = @transform_0, window_bounds = array<i64: 1, 16, 16, 8>}, {pipeline_mode = #tpu.pipeline_mode<synchronous>, transform_indices = @transform_1, window_bounds = array<i64: 2, 8>}, {transform_indices = @transform_2, window_bounds = array<i64: 1, 1>}, {pipeline_mode = #tpu.pipeline_mode<synchronous>, transform_indices = @transform_3, window_bounds = array<i64: 9, 8, 8>}, {transform_indices = @transform_4, window_bounds = array<i64: 1, 16, 16, 8>}, {transform_indices = @transform_5, window_bounds = array<i64: 1, 1, 8>}, {transform_indices = @transform_6, window_bounds = array<i64: 1, 1, 8>}]} {
    %c0 = arith.constant 0 : index
    %c0_0 = arith.constant 0 : index
    %c0_1 = arith.constant 0 : index
    %c0_2 = arith.constant 0 : index
    %0 = vector.load %arg1[%c0, %c0_0, %c0_1, %c0_2] : memref<1x16x16x8xf32, #tpu.memory_space<vmem>>, vector<1x16x16x8xf32>
    %1 = vector.shape_cast %0 : vector<1x16x16x8xf32> to vector<16x16x8xf32>
    %c0_3 = arith.constant 0 : index
    %c0_4 = arith.constant 0 : index
    %2 = vector.load %arg2[%c0_3, %c0_4] : memref<2x8xf32, #tpu.memory_space<vmem>>, vector<1x8xf32>
    %3 = vector.shape_cast %2 : vector<1x8xf32> to vector<1x1x8xf32>
    %c1 = arith.constant 1 : index
    %c0_5 = arith.constant 0 : index
    %4 = vector.load %arg2[%c1, %c0_5] : memref<2x8xf32, #tpu.memory_space<vmem>>, vector<1x8xf32>
    %5 = vector.shape_cast %4 : vector<1x8xf32> to vector<1x1x8xf32>
    %c0_6 = arith.constant 0 : index
    %c0_7 = arith.constant 0 : index
    %6 = memref.load %arg3[%c0_6, %c0_7] : memref<1x1xf32, #tpu.memory_space<smem>>
    %7 = vector.broadcast %3 : vector<1x1x8xf32> to vector<16x16x8xf32>
    %8 = arith.mulf %1, %7 : vector<16x16x8xf32>
    %9 = vector.broadcast %5 : vector<1x1x8xf32> to vector<16x16x8xf32>
    %10 = arith.addf %8, %9 : vector<16x16x8xf32>
    %cst = arith.constant 0.000000e+00 : f32
    %11 = vector.broadcast %cst : f32 to vector<16x16x8xf32>
    %12 = arith.cmpf oge, %10, %11 : vector<16x16x8xf32>
    %13 = vector.broadcast %6 : f32 to vector<16x16x8xf32>
    %14 = arith.mulf %13, %10 : vector<16x16x8xf32>
    %15 = arith.select %12, %10, %14 : vector<16x16x8xi1>, vector<16x16x8xf32>
    %cst_8 = arith.constant 0.000000e+00 : f32
    %16 = vector.broadcast %cst_8 : f32 to vector<18x25x8xf32>
    %c0_9 = arith.constant 0 : index
    %c0_10 = arith.constant 0 : index
    %c0_11 = arith.constant 0 : index
    %17 = vector.load %arg8[%c0_9, %c0_10, %c0_11] : memref<18x25x8xf32, #tpu.memory_space<vmem>>, vector<18x25x8xf32>
    tpu.vector_store %arg8[%c0_9, %c0_10, %c0_11], %16 {strides = array<i32>} : memref<18x25x8xf32, #tpu.memory_space<vmem>>, vector<18x25x8xf32>,
    %c1_12 = arith.constant 1 : index
    %c8 = arith.constant 8 : index
    %c0_13 = arith.constant 0 : index
    %18 = vector.load %arg8[%c1_12, %c8, %c0_13] : memref<18x25x8xf32, #tpu.memory_space<vmem>>, vector<16x16x8xf32>
    tpu.vector_store %arg8[%c1_12, %c8, %c0_13], %15 {strides = array<i32>} : memref<18x25x8xf32, #tpu.memory_space<vmem>>, vector<16x16x8xf32>,
    %c0_14 = arith.constant 0 : index
    %c7 = arith.constant 7 : index
    %c0_15 = arith.constant 0 : index
    %19 = vector.load %arg8[%c0_14, %c7, %c0_15] : memref<18x25x8xf32, #tpu.memory_space<vmem>>, vector<16x16x8xf32>
    %20 = vector.shape_cast %19 : vector<16x16x8xf32> to vector<256x8xf32>
    %c0_16 = arith.constant 0 : index
    %c0_17 = arith.constant 0 : index
    %c0_18 = arith.constant 0 : index
    %21 = vector.load %arg4[%c0_16, %c0_17, %c0_18] : memref<9x8x8xf32, #tpu.memory_space<vmem>>, vector<1x8x8xf32>
    %22 = vector.shape_cast %21 : vector<1x8x8xf32> to vector<8x8xf32>
    %cst_19 = arith.constant dense<0.000000e+00> : vector<256x8xf32>
    %23 = tpu.matmul %20, %22, %cst_19 {dimension_numbers = #tpu.dot_dimension_numbers<[1], [0], [0], [1], [0, 0, 1, 1], [], []>} : vector<256x8xf32>, vector<8x8xf32>, vector<256x8xf32> -> vector<256x8xf32>
    %c0_20 = arith.constant 0 : index
    %c8_21 = arith.constant 8 : index
    %c0_22 = arith.constant 0 : index
    %24 = vector.load %arg8[%c0_20, %c8_21, %c0_22] : memref<18x25x8xf32, #tpu.memory_space<vmem>>, vector<16x16x8xf32>
    %25 = vector.shape_cast %24 : vector<16x16x8xf32> to vector<256x8xf32>
    %c1_23 = arith.constant 1 : index
    %c0_24 = arith.constant 0 : index
    %c0_25 = arith.constant 0 : index
    %26 = vector.load %arg4[%c1_23, %c0_24, %c0_25] : memref<9x8x8xf32, #tpu.memory_space<vmem>>, vector<1x8x8xf32>
    %27 = vector.shape_cast %26 : vector<1x8x8xf32> to vector<8x8xf32>
    %cst_26 = arith.constant dense<0.000000e+00> : vector<256x8xf32>
    %28 = tpu.matmul %25, %27, %cst_26 {dimension_numbers = #tpu.dot_dimension_numbers<[1], [0], [0], [1], [0, 0, 1, 1], [], []>} : vector<256x8xf32>, vector<8x8xf32>, vector<256x8xf32> -> vector<256x8xf32>
    %29 = arith.addf %23, %28 : vector<256x8xf32>
    %c0_27 = arith.constant 0 : index
    %c9 = arith.constant 9 : index
    %c0_28 = arith.constant 0 : index
    %30 = vector.load %arg8[%c0_27, %c9, %c0_28] : memref<18x25x8xf32, #tpu.memory_space<vmem>>, vector<16x16x8xf32>
    %31 = vector.shape_cast %30 : vector<16x16x8xf32> to vector<256x8xf32>
    %c2 = arith.constant 2 : index
    %c0_29 = arith.constant 0 : index
    %c0_30 = arith.constant 0 : index
    %32 = vector.load %arg4[%c2, %c0_29, %c0_30] : memref<9x8x8xf32, #tpu.memory_space<vmem>>, vector<1x8x8xf32>
    %33 = vector.shape_cast %32 : vector<1x8x8xf32> to vector<8x8xf32>
    %cst_31 = arith.constant dense<0.000000e+00> : vector<256x8xf32>
    %34 = tpu.matmul %31, %33, %cst_31 {dimension_numbers = #tpu.dot_dimension_numbers<[1], [0], [0], [1], [0, 0, 1, 1], [], []>} : vector<256x8xf32>, vector<8x8xf32>, vector<256x8xf32> -> vector<256x8xf32>
    %35 = arith.addf %29, %34 : vector<256x8xf32>
    %c1_32 = arith.constant 1 : index
    %c7_33 = arith.constant 7 : index
    %c0_34 = arith.constant 0 : index
    %36 = vector.load %arg8[%c1_32, %c7_33, %c0_34] : memref<18x25x8xf32, #tpu.memory_space<vmem>>, vector<16x16x8xf32>
    %37 = vector.shape_cast %36 : vector<16x16x8xf32> to vector<256x8xf32>
    %c3 = arith.constant 3 : index
    %c0_35 = arith.constant 0 : index
    %c0_36 = arith.constant 0 : index
    %38 = vector.load %arg4[%c3, %c0_35, %c0_36] : memref<9x8x8xf32, #tpu.memory_space<vmem>>, vector<1x8x8xf32>
    %39 = vector.shape_cast %38 : vector<1x8x8xf32> to vector<8x8xf32>
    %cst_37 = arith.constant dense<0.000000e+00> : vector<256x8xf32>
    %40 = tpu.matmul %37, %39, %cst_37 {dimension_numbers = #tpu.dot_dimension_numbers<[1], [0], [0], [1], [0, 0, 1, 1], [], []>} : vector<256x8xf32>, vector<8x8xf32>, vector<256x8xf32> -> vector<256x8xf32>
    %41 = arith.addf %35, %40 : vector<256x8xf32>
    %c1_38 = arith.constant 1 : index
    %c8_39 = arith.constant 8 : index
    %c0_40 = arith.constant 0 : index
    %42 = vector.load %arg8[%c1_38, %c8_39, %c0_40] : memref<18x25x8xf32, #tpu.memory_space<vmem>>, vector<16x16x8xf32>
    %43 = vector.shape_cast %42 : vector<16x16x8xf32> to vector<256x8xf32>
    %c4 = arith.constant 4 : index
    %c0_41 = arith.constant 0 : index
    %c0_42 = arith.constant 0 : index
    %44 = vector.load %arg4[%c4, %c0_41, %c0_42] : memref<9x8x8xf32, #tpu.memory_space<vmem>>, vector<1x8x8xf32>
    %45 = vector.shape_cast %44 : vector<1x8x8xf32> to vector<8x8xf32>
    %cst_43 = arith.constant dense<0.000000e+00> : vector<256x8xf32>
    %46 = tpu.matmul %43, %45, %cst_43 {dimension_numbers = #tpu.dot_dimension_numbers<[1], [0], [0], [1], [0, 0, 1, 1], [], []>} : vector<256x8xf32>, vector<8x8xf32>, vector<256x8xf32> -> vector<256x8xf32>
    %47 = arith.addf %41, %46 : vector<256x8xf32>
    %c1_44 = arith.constant 1 : index
    %c9_45 = arith.constant 9 : index
    %c0_46 = arith.constant 0 : index
    %48 = vector.load %arg8[%c1_44, %c9_45, %c0_46] : memref<18x25x8xf32, #tpu.memory_space<vmem>>, vector<16x16x8xf32>
    %49 = vector.shape_cast %48 : vector<16x16x8xf32> to vector<256x8xf32>
    %c5 = arith.constant 5 : index
    %c0_47 = arith.constant 0 : index
    %c0_48 = arith.constant 0 : index
    %50 = vector.load %arg4[%c5, %c0_47, %c0_48] : memref<9x8x8xf32, #tpu.memory_space<vmem>>, vector<1x8x8xf32>
    %51 = vector.shape_cast %50 : vector<1x8x8xf32> to vector<8x8xf32>
    %cst_49 = arith.constant dense<0.000000e+00> : vector<256x8xf32>
    %52 = tpu.matmul %49, %51, %cst_49 {dimension_numbers = #tpu.dot_dimension_numbers<[1], [0], [0], [1], [0, 0, 1, 1], [], []>} : vector<256x8xf32>, vector<8x8xf32>, vector<256x8xf32> -> vector<256x8xf32>
    %53 = arith.addf %47, %52 : vector<256x8xf32>
    %c2_50 = arith.constant 2 : index
    %c7_51 = arith.constant 7 : index
    %c0_52 = arith.constant 0 : index
    %54 = vector.load %arg8[%c2_50, %c7_51, %c0_52] : memref<18x25x8xf32, #tpu.memory_space<vmem>>, vector<16x16x8xf32>
    %55 = vector.shape_cast %54 : vector<16x16x8xf32> to vector<256x8xf32>
    %c6 = arith.constant 6 : index
    %c0_53 = arith.constant 0 : index
    %c0_54 = arith.constant 0 : index
    %56 = vector.load %arg4[%c6, %c0_53, %c0_54] : memref<9x8x8xf32, #tpu.memory_space<vmem>>, vector<1x8x8xf32>
    %57 = vector.shape_cast %56 : vector<1x8x8xf32> to vector<8x8xf32>
    %cst_55 = arith.constant dense<0.000000e+00> : vector<256x8xf32>
    %58 = tpu.matmul %55, %57, %cst_55 {dimension_numbers = #tpu.dot_dimension_numbers<[1], [0], [0], [1], [0, 0, 1, 1], [], []>} : vector<256x8xf32>, vector<8x8xf32>, vector<256x8xf32> -> vector<256x8xf32>
    %59 = arith.addf %53, %58 : vector<256x8xf32>
    %c2_56 = arith.constant 2 : index
    %c8_57 = arith.constant 8 : index
    %c0_58 = arith.constant 0 : index
    %60 = vector.load %arg8[%c2_56, %c8_57, %c0_58] : memref<18x25x8xf32, #tpu.memory_space<vmem>>, vector<16x16x8xf32>
    %61 = vector.shape_cast %60 : vector<16x16x8xf32> to vector<256x8xf32>
    %c7_59 = arith.constant 7 : index
    %c0_60 = arith.constant 0 : index
    %c0_61 = arith.constant 0 : index
    %62 = vector.load %arg4[%c7_59, %c0_60, %c0_61] : memref<9x8x8xf32, #tpu.memory_space<vmem>>, vector<1x8x8xf32>
    %63 = vector.shape_cast %62 : vector<1x8x8xf32> to vector<8x8xf32>
    %cst_62 = arith.constant dense<0.000000e+00> : vector<256x8xf32>
    %64 = tpu.matmul %61, %63, %cst_62 {dimension_numbers = #tpu.dot_dimension_numbers<[1], [0], [0], [1], [0, 0, 1, 1], [], []>} : vector<256x8xf32>, vector<8x8xf32>, vector<256x8xf32> -> vector<256x8xf32>
    %65 = arith.addf %59, %64 : vector<256x8xf32>
    %c2_63 = arith.constant 2 : index
    %c9_64 = arith.constant 9 : index
    %c0_65 = arith.constant 0 : index
    %66 = vector.load %arg8[%c2_63, %c9_64, %c0_65] : memref<18x25x8xf32, #tpu.memory_space<vmem>>, vector<16x16x8xf32>
    %67 = vector.shape_cast %66 : vector<16x16x8xf32> to vector<256x8xf32>
    %c8_66 = arith.constant 8 : index
    %c0_67 = arith.constant 0 : index
    %c0_68 = arith.constant 0 : index
    %68 = vector.load %arg4[%c8_66, %c0_67, %c0_68] : memref<9x8x8xf32, #tpu.memory_space<vmem>>, vector<1x8x8xf32>
    %69 = vector.shape_cast %68 : vector<1x8x8xf32> to vector<8x8xf32>
    %cst_69 = arith.constant dense<0.000000e+00> : vector<256x8xf32>
    %70 = tpu.matmul %67, %69, %cst_69 {dimension_numbers = #tpu.dot_dimension_numbers<[1], [0], [0], [1], [0, 0, 1, 1], [], []>} : vector<256x8xf32>, vector<8x8xf32>, vector<256x8xf32> -> vector<256x8xf32>
    %71 = arith.addf %65, %70 : vector<256x8xf32>
    %72 = vector.shape_cast %71 : vector<256x8xf32> to vector<16x16x8xf32>
    %c0_70 = arith.constant 0 : index
    %c0_71 = arith.constant 0 : index
    %c0_72 = arith.constant 0 : index
    %c0_73 = arith.constant 0 : index
    %73 = vector.load %arg5[%c0_70, %c0_71, %c0_72, %c0_73] : memref<1x16x16x8xf32, #tpu.memory_space<vmem>>, vector<1x16x16x8xf32>
    %74 = vector.shape_cast %73 : vector<1x16x16x8xf32> to vector<16x16x8xf32>
    %75 = vector.shape_cast %72 : vector<16x16x8xf32> to vector<1x16x16x8xf32>
    tpu.vector_store %arg5[%c0_70, %c0_71, %c0_72, %c0_73], %75 {strides = array<i32>} : memref<1x16x16x8xf32, #tpu.memory_space<vmem>>, vector<1x16x16x8xf32>,
    %cst_74 = arith.constant dense<0.000000e+00> : vector<8xf32>
    %76 = vector.multi_reduction <add>, %71, %cst_74 [0] : vector<256x8xf32> to vector<8xf32>
    %77 = vector.shape_cast %76 : vector<8xf32> to vector<1x8xf32>
    %cst_75 = arith.constant 3.906250e-03 : f32
    %78 = vector.broadcast %cst_75 : f32 to vector<1x8xf32>
    %79 = arith.mulf %77, %78 : vector<1x8xf32>
    %80 = vector.broadcast %79 : vector<1x8xf32> to vector<256x8xf32>
    %81 = arith.subf %71, %80 : vector<256x8xf32>
    %82 = arith.mulf %81, %81 : vector<256x8xf32>
    %cst_76 = arith.constant dense<0.000000e+00> : vector<8xf32>
    %83 = vector.multi_reduction <add>, %82, %cst_76 [0] : vector<256x8xf32> to vector<8xf32>
    %84 = vector.shape_cast %83 : vector<8xf32> to vector<1x8xf32>
    %c0_77 = arith.constant 0 : index
    %c0_78 = arith.constant 0 : index
    %c0_79 = arith.constant 0 : index
    %85 = vector.load %arg6[%c0_77, %c0_78, %c0_79] : memref<1x1x8xf32, #tpu.memory_space<vmem>>, vector<1x1x8xf32>
    %86 = vector.shape_cast %85 : vector<1x1x8xf32> to vector<1x8xf32>
    %87 = vector.shape_cast %77 : vector<1x8xf32> to vector<1x1x8xf32>
    tpu.vector_store %arg6[%c0_77, %c0_78, %c0_79], %87 {strides = array<i32>} : memref<1x1x8xf32, #tpu.memory_space<vmem>>, vector<1x1x8xf32>,
    %c0_80 = arith.constant 0 : index
    %c0_81 = arith.constant 0 : index
    %c0_82 = arith.constant 0 : index
    %88 = vector.load %arg7[%c0_80, %c0_81, %c0_82] : memref<1x1x8xf32, #tpu.memory_space<vmem>>, vector<1x1x8xf32>
    %89 = vector.shape_cast %88 : vector<1x1x8xf32> to vector<1x8xf32>
    %90 = vector.shape_cast %84 : vector<1x8xf32> to vector<1x1x8xf32>
    tpu.vector_store %arg7[%c0_80, %c0_81, %c0_82], %90 {strides = array<i32>} : memref<1x1x8xf32, #tpu.memory_space<vmem>>, vector<1x1x8xf32>,
    return
  }
  func.func @transform_0(%arg0: i32) -> (i32, i32, i32, i32) {
    %c0_i32 = arith.constant 0 : i32
    %c0_i32_0 = arith.constant 0 : i32
    %c0_i32_1 = arith.constant 0 : i32
    %c0_i32_2 = arith.constant 0 : i32
    return %arg0, %c0_i32, %c0_i32_0, %c0_i32_1 : i32, i32, i32, i32
  }
  func.func @transform_1(%arg0: i32) -> (i32, i32) {
    %c0_i32 = arith.constant 0 : i32
    %c0_i32_0 = arith.constant 0 : i32
    %c0_i32_1 = arith.constant 0 : i32
    return %c0_i32, %c0_i32_0 : i32, i32
  }
  func.func @transform_2(%arg0: i32) -> (i32, i32) {
    %c0_i32 = arith.constant 0 : i32
    %c0_i32_0 = arith.constant 0 : i32
    %c0_i32_1 = arith.constant 0 : i32
    return %c0_i32, %c0_i32_0 : i32, i32
  }
  func.func @transform_3(%arg0: i32) -> (i32, i32, i32) {
    %c0_i32 = arith.constant 0 : i32
    %c0_i32_0 = arith.constant 0 : i32
    %c0_i32_1 = arith.constant 0 : i32
    %c0_i32_2 = arith.constant 0 : i32
    return %c0_i32, %c0_i32_0, %c0_i32_1 : i32, i32, i32
  }
  func.func @transform_4(%arg0: i32) -> (i32, i32, i32, i32) {
    %c0_i32 = arith.constant 0 : i32
    %c0_i32_0 = arith.constant 0 : i32
    %c0_i32_1 = arith.constant 0 : i32
    %c0_i32_2 = arith.constant 0 : i32
    return %arg0, %c0_i32, %c0_i32_0, %c0_i32_1 : i32, i32, i32, i32
  }
  func.func @transform_5(%arg0: i32) -> (i32, i32, i32) {
    %c0_i32 = arith.constant 0 : i32
    %c0_i32_0 = arith.constant 0 : i32
    %c0_i32_1 = arith.constant 0 : i32
    return %arg0, %c0_i32, %c0_i32_0 : i32, i32, i32
  }
  func.func @transform_6(%arg0: i32) -> (i32, i32, i32) {
    %c0_i32 = arith.constant 0 : i32
    %c0_i32_0 = arith.constant 0 : i32
    %c0_i32_1 = arith.constant 0 : i32
    return %arg0, %c0_i32, %c0_i32_0 : i32, i32, i32
  }
}

module attributes {stable_mosaic.version = 11 : i64} {
  func.func @_bn_prelu_kernel(%arg0: i32, %arg1: memref<1x16x16x8xf32, #tpu.memory_space<vmem>>, %arg2: memref<2x8xf32, #tpu.memory_space<vmem>>, %arg3: memref<1x1xf32, #tpu.memory_space<smem>>, %arg4: memref<1x16x16x8xf32, #tpu.memory_space<vmem>>) attributes {dimension_semantics = [#tpu.dimension_semantics<parallel>], iteration_bounds = array<i64: 2>, scalar_prefetch = 0 : i64, scratch_operands = 0 : i64, tpu.core_type = #tpu.core_type<tc>, window_params = [{transform_indices = @transform_0, window_bounds = array<i64: 1, 16, 16, 8>}, {pipeline_mode = #tpu.pipeline_mode<synchronous>, transform_indices = @transform_1, window_bounds = array<i64: 2, 8>}, {transform_indices = @transform_2, window_bounds = array<i64: 1, 1>}, {transform_indices = @transform_3, window_bounds = array<i64: 1, 16, 16, 8>}]} {
    %c0 = arith.constant 0 : index
    %c0_0 = arith.constant 0 : index
    %0 = vector.load %arg2[%c0, %c0_0] : memref<2x8xf32, #tpu.memory_space<vmem>>, vector<1x8xf32>
    %1 = vector.shape_cast %0 : vector<1x8xf32> to vector<1x1x8xf32>
    %c1 = arith.constant 1 : index
    %c0_1 = arith.constant 0 : index
    %2 = vector.load %arg2[%c1, %c0_1] : memref<2x8xf32, #tpu.memory_space<vmem>>, vector<1x8xf32>
    %3 = vector.shape_cast %2 : vector<1x8xf32> to vector<1x1x8xf32>
    %c0_2 = arith.constant 0 : index
    %c0_3 = arith.constant 0 : index
    %4 = memref.load %arg3[%c0_2, %c0_3] : memref<1x1xf32, #tpu.memory_space<smem>>
    %c0_4 = arith.constant 0 : index
    %c0_5 = arith.constant 0 : index
    %c0_6 = arith.constant 0 : index
    %c0_7 = arith.constant 0 : index
    %5 = vector.load %arg1[%c0_4, %c0_5, %c0_6, %c0_7] : memref<1x16x16x8xf32, #tpu.memory_space<vmem>>, vector<1x16x16x8xf32>
    %6 = vector.shape_cast %5 : vector<1x16x16x8xf32> to vector<16x16x8xf32>
    %7 = vector.broadcast %1 : vector<1x1x8xf32> to vector<16x16x8xf32>
    %8 = arith.mulf %6, %7 : vector<16x16x8xf32>
    %9 = vector.broadcast %3 : vector<1x1x8xf32> to vector<16x16x8xf32>
    %10 = arith.addf %8, %9 : vector<16x16x8xf32>
    %cst = arith.constant 0.000000e+00 : f32
    %11 = vector.broadcast %cst : f32 to vector<16x16x8xf32>
    %12 = arith.cmpf oge, %10, %11 : vector<16x16x8xf32>
    %13 = vector.broadcast %4 : f32 to vector<16x16x8xf32>
    %14 = arith.mulf %13, %10 : vector<16x16x8xf32>
    %15 = arith.select %12, %10, %14 : vector<16x16x8xi1>, vector<16x16x8xf32>
    %c0_8 = arith.constant 0 : index
    %c0_9 = arith.constant 0 : index
    %c0_10 = arith.constant 0 : index
    %c0_11 = arith.constant 0 : index
    %16 = vector.load %arg4[%c0_8, %c0_9, %c0_10, %c0_11] : memref<1x16x16x8xf32, #tpu.memory_space<vmem>>, vector<1x16x16x8xf32>
    %17 = vector.shape_cast %16 : vector<1x16x16x8xf32> to vector<16x16x8xf32>
    %18 = vector.shape_cast %15 : vector<16x16x8xf32> to vector<1x16x16x8xf32>
    tpu.vector_store %arg4[%c0_8, %c0_9, %c0_10, %c0_11], %18 {strides = array<i32>} : memref<1x16x16x8xf32, #tpu.memory_space<vmem>>, vector<1x16x16x8xf32>,
    return
  }
  func.func @transform_0(%arg0: i32) -> (i32, i32, i32, i32) {
    %c0_i32 = arith.constant 0 : i32
    %c0_i32_0 = arith.constant 0 : i32
    %c0_i32_1 = arith.constant 0 : i32
    %c0_i32_2 = arith.constant 0 : i32
    return %arg0, %c0_i32, %c0_i32_0, %c0_i32_1 : i32, i32, i32, i32
  }
  func.func @transform_1(%arg0: i32) -> (i32, i32) {
    %c0_i32 = arith.constant 0 : i32
    %c0_i32_0 = arith.constant 0 : i32
    %c0_i32_1 = arith.constant 0 : i32
    return %c0_i32, %c0_i32_0 : i32, i32
  }
  func.func @transform_2(%arg0: i32) -> (i32, i32) {
    %c0_i32 = arith.constant 0 : i32
    %c0_i32_0 = arith.constant 0 : i32
    %c0_i32_1 = arith.constant 0 : i32
    return %c0_i32, %c0_i32_0 : i32, i32
  }
  func.func @transform_3(%arg0: i32) -> (i32, i32, i32, i32) {
    %c0_i32 = arith.constant 0 : i32
    %c0_i32_0 = arith.constant 0 : i32
    %c0_i32_1 = arith.constant 0 : i32
    %c0_i32_2 = arith.constant 0 : i32
    return %arg0, %c0_i32, %c0_i32_0, %c0_i32_1 : i32, i32, i32, i32
  }
}

</mosaic_0001>

<bundles_post_ra>
// kernel: conv_block_nd_forward.5
= control target key start
LH: loop header
LB: loop body
LE: loop exit
PB: predicated region body
PF: predicated region fallthrough
CT: control target
= control target key end

     0   :  { %s518_s14 = smov 0   ;;  %s746_s0 = inlined_call_operand.vmem [shape: f32[2,16,16,8], index: 0, kind: input, shape index: {}]   ;;  %s747_s1 = inlined_call_operand.vmem [shape: f32[2,8], index: 1, kind: input, shape index: {}]   ;;  %s748_s2 = inlined_call_operand.<no memory space> [shape: f32[1,1], index: 2, kind: input, shape index: {}]   ;;  %s749_s3 = inlined_call_operand.vmem [shape: f32[2,16,16,8], index: 3, kind: output, shape index: {}]  }
   0x1   :  { %8 = sst [smem:[#allocation2]] %s748_s2 }
   0x2 LB: > { %s464_s15 = sadd.s32 4294967295, %s493_s14   ;;  %p468_p0 = scmp.ge.s32.totalorder %s493_s14, 1  ;;  %s493_s14 = sphi %s518_s14, %s14_s14  }
   0x3   : > { %p138_p1 = scmp.lt.s32.totalorder %s493_s14, 3 }
   0x5   : > { %p139_p2 = pnand %p468_p0, %p138_p1 }
   0x6   : > { %p162_p3 = scmp.lt.s32.totalorder (!%p139_p2), %s464_s15, 1  ;;  %s174_s16 = sld [smem:[#allocation2]] (!%p139_p2)  ;;  %v532_v0 = vld [vmem:[%s747_s1] ss:$0 sm:$0xff] (!%p139_p2)  ;;  %v542_v1 = vld [vmem:[%s747_s1 + $0x1] ss:$0 sm:$0xff] (!%p139_p2) }
   0x7   : > { %142 = sbr.rel (%p139_p2) target bundleno = 63 (0x3f), region = 32  ;;  %vm376_vm0 = vcmask (!%p139_p2), 64512  }
   0xc   : > { %v553_v11 = vstv (!%p139_p2), %s174_s16 }
   0xe   : > { %s751_s15 = smov (!%p162_p3, %s464_s15), 1 }
   0xf   : > { %s477_s2 = sshll.u32 %s751_s15, 8 }
  0x10   : > { %s537_s21 = scalar_lea.vmem %s746_s0, %s477_s2  ;;  %s571_s26 = scalar_lea.vmem %s749_s3, %s477_s2 }
  0x11   : > { %v175_v2 = vld [vmem:[%s537_s21] sm:$0xff]  ;;  %v176_v3 = vld [vmem:[%s537_s21 + $0x8] sm:$0xff]  ;;  %v177_v4 = vld [vmem:[%s537_s21 + $0x10] sm:$0xff] }
  0x12   : > { %v211_v5 = vmul.f32 %v532_v0, %v175_v2  ;;  %v212_v6 = vmul.f32 %v532_v0, %v176_v3  ;;  %v213_v7 = vmul.f32 %v532_v0, %v177_v4  ;;  %v178_v8 = vld [vmem:[%s537_s21 + $0x18] sm:$0xff]  ;;  %v179_v9 = vld [vmem:[%s537_s21 + $0x20] sm:$0xff]  ;;  %v180_v10 = vld [vmem:[%s537_s21 + $0x28] sm:$0xff] }
  0x13   : > { %v214_v12 = vmul.f32 %v532_v0, %v178_v8  ;;  %v215_v13 = vmul.f32 %v532_v0, %v179_v9  ;;  %v216_v14 = vmul.f32 %v532_v0, %v180_v10  ;;  %v181_v15 = vld [vmem:[%s537_s21 + $0x30] sm:$0xff]  ;;  %v182_v16 = vld [vmem:[%s537_s21 + $0x38] sm:$0xff]  ;;  %v183_v29 = vld [vmem:[%s537_s21 + $0x40] sm:$0xff] }
  0x14   : > { %v247_v17 = vadd.f32 %v542_v1, %v211_v5  ;;  %v248_v18 = vadd.f32 %v542_v1, %v212_v6  ;;  %v249_v19 = vadd.f32 %v542_v1, %v213_v7  ;;  %v217_v20 = vmul.f32 %v532_v0, %v181_v15  ;;  %v184_v33 = vld [vmem:[%s537_s21 + $0x48] sm:$0xff]  ;;  %v185_v34 = vld [vmem:[%s537_s21 + $0x50] sm:$0xff]  ;;  %v186_v35 = vld [vmem:[%s537_s21 + $0x58] sm:$0xff] }
  0x15   : > { %v250_v21 = vadd.f32 %v542_v1, %v214_v12  ;;  %v251_v22 = vadd.f32 %v542_v1, %v215_v13  ;;  %v252_v23 = vadd.f32 %v542_v1, %v216_v14  ;;  %v218_v24 = vmul.f32 %v532_v0, %v182_v16  ;;  %v187_v47 = vld [vmem:[%s537_s21 + $0x60] sm:$0xff]  ;;  %v188_v48 = vld [vmem:[%s537_s21 + $0x68] sm:$0xff]  ;;  %v189_v61 = vld [vmem:[%s537_s21 + $0x70] sm:$0xff] }
  0x16   : > { %vm279_vm1 = vcmp.ge.f32.partialorder %v247_v17, 0.0  ;;  %v312_v25 = vmul.f32 %v553_v11, %v247_v17  ;;  %vm280_vm2 = vcmp.ge.f32.partialorder %v248_v18, 0.0  ;;  %v313_v26 = vmul.f32 %v553_v11, %v248_v18  ;;  %v190_v62 = vld [vmem:[%s537_s21 + $0x78] sm:$0xff]  ;;  %v191_v7 = vld [vmem:[%s537_s21 + $0x80] sm:$0xff]  ;;  %v192_v8 = vld [vmem:[%s537_s21 + $0x88] sm:$0xff] }
  0x17   : > { %vm281_vm3 = vcmp.ge.f32.partialorder %v249_v19, 0.0  ;;  %v314_v27 = vmul.f32 %v553_v11, %v249_v19  ;;  %vm282_vm4 = vcmp.ge.f32.partialorder %v250_v21, 0.0  ;;  %v315_v28 = vmul.f32 %v553_v11, %v250_v21  ;;  %v193_v14 = vld [vmem:[%s537_s21 + $0x90] sm:$0xff]  ;;  %v194_v15 = vld [vmem:[%s537_s21 + $0x98] sm:$0xff] }
  0x18   : > { %v344_v30 = vsel %vm279_vm1, %v247_v17, %v312_v25  ;;  %v345_v31 = vsel %vm280_vm2, %v248_v18, %v313_v26  ;;  %vm283_vm5 = vcmp.ge.f32.partialorder %v251_v22, 0.0  ;;  %v316_v32 = vmul.f32 %v553_v11, %v251_v22  ;;  %v195_v26 = vld [vmem:[%s537_s21 + $0xa0] sm:$0xff] }
  0x19   : > { %377 = vst.msk [vmem:[%s571_s26] sm:$0xff] %vm376_vm0, %v344_v30  ;;  %378 = vst.msk [vmem:[%s571_s26 + $0x8] sm:$0xff] %vm376_vm0, %v345_v31  ;;  %v346_v36 = vsel %vm281_vm3, %v249_v19, %v314_v27  ;;  %v347_v37 = vsel %vm282_vm4, %v250_v21, %v315_v28  ;;  %vm284_vm6 = vcmp.ge.f32.partialorder %v252_v23, 0.0  ;;  %v317_v38 = vmul.f32 %v553_v11, %v252_v23  ;;  %v196_v27 = vld [vmem:[%s537_s21 + $0xa8] sm:$0xff] }
  0x1a   : > { %379 = vst.msk [vmem:[%s571_s26 + $0x10] sm:$0xff] %vm376_vm0, %v346_v36  ;;  %380 = vst.msk [vmem:[%s571_s26 + $0x18] sm:$0xff] %vm376_vm0, %v347_v37  ;;  %v348_v39 = vsel %vm283_vm5, %v251_v22, %v316_v32  ;;  %v253_v40 = vadd.f32 %v542_v1, %v217_v20  ;;  %v254_v41 = vadd.f32 %v542_v1, %v218_v24 }
  0x1b   : > { %v219_v42 = vmul.f32 %v532_v0, %v183_v29  ;;  %381 = vst.msk [vmem:[%s571_s26 + $0x20] sm:$0xff] %vm376_vm0, %v348_v39  ;;  %v349_v43 = vsel %vm284_vm6, %v252_v23, %v317_v38  ;;  %v220_v44 = vmul.f32 %v532_v0, %v184_v33  ;;  %v221_v45 = vmul.f32 %v532_v0, %v185_v34 }
  0x1c   : > { %v222_v46 = vmul.f32 %v532_v0, %v186_v35  ;;  %382 = vst.msk [vmem:[%s571_s26 + $0x28] sm:$0xff] %vm376_vm0, %v349_v43  ;;  %vm285_vm7 = vcmp.ge.f32.partialorder %v253_v40, 0.0  ;;  %v318_v49 = vmul.f32 %v553_v11, %v253_v40  ;;  %vm286_vm8 = vcmp.ge.f32.partialorder %v254_v41, 0.0 }
  0x1d   : > { %v319_v50 = vmul.f32 %v553_v11, %v254_v41  ;;  %v255_v51 = vadd.f32 %v542_v1, %v219_v42  ;;  %v256_v52 = vadd.f32 %v542_v1, %v220_v44  ;;  %v257_v53 = vadd.f32 %v542_v1, %v221_v45 }
  0x1e   : > { %v258_v54 = vadd.f32 %v542_v1, %v222_v46  ;;  %v350_v55 = vsel %vm285_vm7, %v253_v40, %v318_v49  ;;  %v223_v57 = vmul.f32 %v532_v0, %v187_v47  ;;  %v224_v58 = vmul.f32 %v532_v0, %v188_v48  ;;  %v197_v40 = vld [vmem:[%s537_s21 + $0xb0] sm:$0xff]  ;;  %v199_v48 = vld [vmem:[%s537_s21 + $0xc0] sm:$0xff]  ;;  %v200_v49 = vld [vmem:[%s537_s21 + $0xc8] sm:$0xff] }
  0x1f   : > { %v351_v56 = vsel %vm286_vm8, %v254_v41, %v319_v50  ;;  %383 = vst.msk [vmem:[%s571_s26 + $0x30] sm:$0xff] %vm376_vm0, %v350_v55  ;;  %vm287_vm9 = vcmp.ge.f32.partialorder %v255_v51, 0.0  ;;  %v320_v59 = vmul.f32 %v553_v11, %v255_v51  ;;  %vm288_vm10 = vcmp.ge.f32.partialorder %v256_v52, 0.0  ;;  %v198_v41 = vld [vmem:[%s537_s21 + $0xb8] sm:$0xff] }
  0x20   : > { %384 = vst.msk [vmem:[%s571_s26 + $0x38] sm:$0xff] %vm376_vm0, %v351_v56  ;;  %v321_v60 = vmul.f32 %v553_v11, %v256_v52  ;;  %vm289_vm11 = vcmp.ge.f32.partialorder %v257_v53, 0.0  ;;  %v322_v63 = vmul.f32 %v553_v11, %v257_v53  ;;  %vm290_vm12 = vcmp.ge.f32.partialorder %v258_v54, 0.0  ;;  %v202_v55 = vld [vmem:[%s537_s21 + $0xd8] sm:$0xff] }
  0x21   : > { %v323_v2 = vmul.f32 %v553_v11, %v258_v54  ;;  %v352_v3 = vsel %vm287_vm9, %v255_v51, %v320_v59  ;;  %v259_v5 = vadd.f32 %v542_v1, %v223_v57  ;;  %v260_v6 = vadd.f32 %v542_v1, %v224_v58 }
  0x22   : > { %v353_v4 = vsel %vm288_vm10, %v256_v52, %v321_v60  ;;  %385 = vst.msk [vmem:[%s571_s26 + $0x40] sm:$0xff] %vm376_vm0, %v352_v3  ;;  %v354_v9 = vsel %vm289_vm11, %v257_v53, %v322_v63  ;;  %v225_v12 = vmul.f32 %v532_v0, %v189_v61  ;;  %v226_v13 = vmul.f32 %v532_v0, %v190_v62 }
  0x23   : > { %386 = vst.msk [vmem:[%s571_s26 + $0x48] sm:$0xff] %vm376_vm0, %v353_v4  ;;  %v355_v10 = vsel %vm290_vm12, %v258_v54, %v323_v2  ;;  %387 = vst.msk [vmem:[%s571_s26 + $0x50] sm:$0xff] %vm376_vm0, %v354_v9  ;;  %vm291_vm13 = vcmp.ge.f32.partialorder %v259_v5, 0.0  ;;  %v324_v16 = vmul.f32 %v553_v11, %v259_v5  ;;  %vm292_vm14 = vcmp.ge.f32.partialorder %v260_v6, 0.0  ;;  %v201_v54 = vld [vmem:[%s537_s21 + $0xd0] sm:$0xff]  ;;  %v203_v4 = vld [vmem:[%s537_s21 + $0xe0] sm:$0xff] }
  0x24   : > { %388 = vst.msk [vmem:[%s571_s26 + $0x58] sm:$0xff] %vm376_vm0, %v355_v10  ;;  %v325_v17 = vmul.f32 %v553_v11, %v260_v6  ;;  %v261_v18 = vadd.f32 %v542_v1, %v225_v12  ;;  %v262_v19 = vadd.f32 %v542_v1, %v226_v13  ;;  %v227_v20 = vmul.f32 %v532_v0, %v191_v7 }
  0x25   : > { %v228_v21 = vmul.f32 %v532_v0, %v192_v8  ;;  %v356_v22 = vsel %vm291_vm13, %v259_v5, %v324_v16  ;;  %v229_v24 = vmul.f32 %v532_v0, %v193_v14  ;;  %v230_v25 = vmul.f32 %v532_v0, %v194_v15  ;;  %v204_v5 = vld [vmem:[%s537_s21 + $0xe8] sm:$0xff] }
  0x26   : > { %v357_v23 = vsel %vm292_vm14, %v260_v6, %v325_v17  ;;  %389 = vst.msk [vmem:[%s571_s26 + $0x60] sm:$0xff] %vm376_vm0, %v356_v22  ;;  %vm293_vm15 = vcmp.ge.f32.partialorder %v261_v18, 0.0  ;;  %v326_v28 = vmul.f32 %v553_v11, %v261_v18  ;;  %vm294_vm1 = vcmp.ge.f32.partialorder %v262_v19, 0.0 }
  0x27   : > { %390 = vst.msk [vmem:[%s571_s26 + $0x68] sm:$0xff] %vm376_vm0, %v357_v23  ;;  %v327_v29 = vmul.f32 %v553_v11, %v262_v19  ;;  %v263_v30 = vadd.f32 %v542_v1, %v227_v20  ;;  %v264_v31 = vadd.f32 %v542_v1, %v228_v21  ;;  %v265_v32 = vadd.f32 %v542_v1, %v229_v24  ;;  %v206_v20 = vld [vmem:[%s537_s21 + $0xf8] sm:$0xff] }
  0x28   : > { %v266_v33 = vadd.f32 %v542_v1, %v230_v25  ;;  %v358_v34 = vsel %vm293_vm15, %v261_v18, %v326_v28  ;;  %v231_v36 = vmul.f32 %v532_v0, %v195_v26  ;;  %v232_v37 = vmul.f32 %v532_v0, %v196_v27 }
  0x29   : > { %v359_v35 = vsel %vm294_vm1, %v262_v19, %v327_v29  ;;  %391 = vst.msk [vmem:[%s571_s26 + $0x70] sm:$0xff] %vm376_vm0, %v358_v34  ;;  %vm295_vm2 = vcmp.ge.f32.partialorder %v263_v30, 0.0  ;;  %v328_v38 = vmul.f32 %v553_v11, %v263_v30  ;;  %vm296_vm3 = vcmp.ge.f32.partialorder %v264_v31, 0.0  ;;  %v205_v19 = vld [vmem:[%s537_s21 + $0xf0] sm:$0xff] }
  0x2a   : > { %392 = vst.msk [vmem:[%s571_s26 + $0x78] sm:$0xff] %vm376_vm0, %v359_v35  ;;  %v329_v39 = vmul.f32 %v553_v11, %v264_v31  ;;  %vm297_vm4 = vcmp.ge.f32.partialorder %v265_v32, 0.0  ;;  %v330_v42 = vmul.f32 %v553_v11, %v265_v32  ;;  %vm298_vm5 = vcmp.ge.f32.partialorder %v266_v33, 0.0 }
  0x2b   : > { %v331_v43 = vmul.f32 %v553_v11, %v266_v33  ;;  %v360_v44 = vsel %vm295_vm2, %v263_v30, %v328_v38  ;;  %v267_v46 = vadd.f32 %v542_v1, %v231_v36  ;;  %v268_v47 = vadd.f32 %v542_v1, %v232_v37 }
  0x2c   : > { %v361_v45 = vsel %vm296_vm3, %v264_v31, %v329_v39  ;;  %393 = vst.msk [vmem:[%s571_s26 + $0x80] sm:$0xff] %vm376_vm0, %v360_v44  ;;  %v362_v50 = vsel %vm297_vm4, %v265_v32, %v330_v42  ;;  %v233_v52 = vmul.f32 %v532_v0, %v197_v40  ;;  %v234_v53 = vmul.f32 %v532_v0, %v198_v41 }
  0x2d   : > { %394 = vst.msk [vmem:[%s571_s26 + $0x88] sm:$0xff] %vm376_vm0, %v361_v45  ;;  %v363_v51 = vsel %vm298_vm5, %v266_v33, %v331_v43  ;;  %395 = vst.msk [vmem:[%s571_s26 + $0x90] sm:$0xff] %vm376_vm0, %v362_v50  ;;  %vm299_vm6 = vcmp.ge.f32.partialorder %v267_v46, 0.0  ;;  %v332_v56 = vmul.f32 %v553_v11, %v267_v46  ;;  %vm300_vm7 = vcmp.ge.f32.partialorder %v268_v47, 0.0 }
  0x2e   : > { %396 = vst.msk [vmem:[%s571_s26 + $0x98] sm:$0xff] %vm376_vm0, %v363_v51  ;;  %v333_v57 = vmul.f32 %v553_v11, %v268_v47  ;;  %v269_v58 = vadd.f32 %v542_v1, %v233_v52  ;;  %v270_v59 = vadd.f32 %v542_v1, %v234_v53  ;;  %v235_v60 = vmul.f32 %v532_v0, %v199_v48 }
  0x2f   : > { %v236_v61 = vmul.f32 %v532_v0, %v200_v49  ;;  %v364_v62 = vsel %vm299_vm6, %v267_v46, %v332_v56  ;;  %v237_v2 = vmul.f32 %v532_v0, %v201_v54  ;;  %v238_v3 = vmul.f32 %v532_v0, %v202_v55 }
  0x30   : > { %v365_v63 = vsel %vm300_vm7, %v268_v47, %v333_v57  ;;  %397 = vst.msk [vmem:[%s571_s26 + $0xa0] sm:$0xff] %vm376_vm0, %v364_v62  ;;  %vm301_vm8 = vcmp.ge.f32.partialorder %v269_v58, 0.0  ;;  %v334_v6 = vmul.f32 %v553_v11, %v269_v58  ;;  %vm302_vm9 = vcmp.ge.f32.partialorder %v270_v59, 0.0 }
  0x31   : > { %398 = vst.msk [vmem:[%s571_s26 + $0xa8] sm:$0xff] %vm376_vm0, %v365_v63  ;;  %v335_v7 = vmul.f32 %v553_v11, %v270_v59  ;;  %v271_v8 = vadd.f32 %v542_v1, %v235_v60  ;;  %v272_v9 = vadd.f32 %v542_v1, %v236_v61  ;;  %v273_v10 = vadd.f32 %v542_v1, %v237_v2 }
  0x32   : > { %v274_v12 = vadd.f32 %v542_v1, %v238_v3  ;;  %v366_v13 = vsel %vm301_vm8, %v269_v58, %v334_v6  ;;  %v239_v15 = vmul.f32 %v532_v0, %v203_v4  ;;  %v240_v16 = vmul.f32 %v532_v0, %v204_v5 }
  0x33   : > { %v367_v14 = vsel %vm302_vm9, %v270_v59, %v335_v7  ;;  %399 = vst.msk [vmem:[%s571_s26 + $0xb0] sm:$0xff] %vm376_vm0, %v366_v13  ;;  %vm303_vm10 = vcmp.ge.f32.partialorder %v271_v8, 0.0  ;;  %v336_v17 = vmul.f32 %v553_v11, %v271_v8  ;;  %vm304_vm11 = vcmp.ge.f32.partialorder %v272_v9, 0.0 }
  0x34   : > { %400 = vst.msk [vmem:[%s571_s26 + $0xb8] sm:$0xff] %vm376_vm0, %v367_v14  ;;  %v337_v18 = vmul.f32 %v553_v11, %v272_v9  ;;  %vm305_vm12 = vcmp.ge.f32.partialorder %v273_v10, 0.0  ;;  %v338_v21 = vmul.f32 %v553_v11, %v273_v10  ;;  %vm306_vm13 = vcmp.ge.f32.partialorder %v274_v12, 0.0 }
  0x35   : > { %v339_v22 = vmul.f32 %v553_v11, %v274_v12  ;;  %v368_v23 = vsel %vm303_vm10, %v271_v8, %v336_v17  ;;  %v275_v25 = vadd.f32 %v542_v1, %v239_v15  ;;  %v276_v26 = vadd.f32 %v542_v1, %v240_v16 }
  0x36   : > { %v369_v24 = vsel %vm304_vm11, %v272_v9, %v337_v18  ;;  %401 = vst.msk [vmem:[%s571_s26 + $0xc0] sm:$0xff] %vm376_vm0, %v368_v23  ;;  %v370_v27 = vsel %vm305_vm12, %v273_v10, %v338_v21  ;;  %v241_v29 = vmul.f32 %v532_v0, %v205_v19  ;;  %v242_v30 = vmul.f32 %v532_v0, %v206_v20 }
  0x37   : > { %402 = vst.msk [vmem:[%s571_s26 + $0xc8] sm:$0xff] %vm376_vm0, %v369_v24  ;;  %v371_v28 = vsel %vm306_vm13, %v274_v12, %v339_v22  ;;  %403 = vst.msk [vmem:[%s571_s26 + $0xd0] sm:$0xff] %vm376_vm0, %v370_v27  ;;  %vm307_vm14 = vcmp.ge.f32.partialorder %v275_v25, 0.0  ;;  %v340_v31 = vmul.f32 %v553_v11, %v275_v25  ;;  %vm308_vm15 = vcmp.ge.f32.partialorder %v276_v26, 0.0 }
  0x38   : > { %404 = vst.msk [vmem:[%s571_s26 + $0xd8] sm:$0xff] %vm376_vm0, %v371_v28  ;;  %v341_v32 = vmul.f32 %v553_v11, %v276_v26  ;;  %v277_v33 = vadd.f32 %v542_v1, %v241_v29  ;;  %v278_v34 = vadd.f32 %v542_v1, %v242_v30 }
  0x39   : > { %v372_v35 = vsel %vm307_vm14, %v275_v25, %v340_v31 }
  0x3a   : > { %v373_v36 = vsel %vm308_vm15, %v276_v26, %v341_v32  ;;  %405 = vst.msk [vmem:[%s571_s26 + $0xe0] sm:$0xff] %vm376_vm0, %v372_v35  ;;  %vm309_vm1 = vcmp.ge.f32.partialorder %v277_v33, 0.0  ;;  %v342_v0 = vmul.f32 %v553_v11, %v277_v33  ;;  %vm310_vm2 = vcmp.ge.f32.partialorder %v278_v34, 0.0 }
  0x3b   : > { %406 = vst.msk [vmem:[%s571_s26 + $0xe8] sm:$0xff] %vm376_vm0, %v373_v36  ;;  %v343_v37 = vmul.f32 %v553_v11, %v278_v34 }
  0x3c   : > { %v374_v38 = vsel %vm309_vm1, %v277_v33, %v342_v0 }
  0x3d   : > { %v375_v39 = vsel %vm310_vm2, %v278_v34, %v343_v37  ;;  %407 = vst.msk [vmem:[%s571_s26 + $0xf0] sm:$0xff] %vm376_vm0, %v374_v38 }
  0x3e   : > { %408 = vst.msk [vmem:[%s571_s26 + $0xf8] sm:$0xff] %vm376_vm0, %v375_v39 }
  0x3f PF: > { %s14_s14 = sadd.s32 1, %s493_s14  }
  0x40   : > { %p11_p4 = scmp.ge.s32.totalorder %s14_s14, 4  }
  0x42   :  { %13 = sbr.rel (!%p11_p4) target bundleno = 2 (0x2), region = 62 }

// kernel: conv_block_nd_forward.4
= control target key start
LH: loop header
LB: loop body
LE: loop exit
PB: predicated region body
PF: predicated region fallthrough
CT: control target
= control target key end

     0   :  { %s5715_s23 = smov 0   ;;  %s7208_s0 = inlined_call_operand.vmem [shape: f32[2,16,16,8], index: 0, kind: input, shape index: {}]   ;;  %s7209_s1 = inlined_call_operand.vmem [shape: f32[2,8], index: 1, kind: input, shape index: {}]   ;;  %s7210_s2 = inlined_call_operand.<no memory space> [shape: f32[1,1], index: 2, kind: input, shape index: {}]   ;;  %s7211_s3 = inlined_call_operand.vmem [shape: f32[9,8,8], index: 3, kind: input, shape index: {}]   ;;  %s7212_s4 = inlined_call_operand.vmem [shape: f32[2,16,16,8], index: 4, kind: output, shape index: {0}]   ;;  %s7213_s5 = inlined_call_operand.vmem [shape: f32[2,1,8], index: 5, kind: output, shape index: {1}]   ;;  %s7214_s6 = inlined_call_operand.vmem [shape: f32[2,1,8], index: 6, kind: output, shape index: {2}]  }
   0x1   :  { %12 = sst [smem:[#allocation3]] %s7210_s2 }
   0x2 LB: > { %s4342_s24 = sadd.s32 4294967295, %s5674_s23   ;;  %p4346_p0 = scmp.ge.s32.totalorder %s5674_s23, 1  ;;  %s5674_s23 = sphi %s5715_s23, %s18_s23  }
   0x3   : > { %p218_p1 = scmp.lt.s32.totalorder %s5674_s23, 3 }
   0x5   : > { %p219_p2 = pnand %p4346_p0, %p218_p1 }
   0x7   : > { %222 = sbr.rel (%p219_p2) target bundleno = 663 (0x297), region = 36 }
   0xe   : > { %v4353_v0 = vld [vmem:[%s7211_s3 + $0x8] sm:$0xff]  ;;  %vm474_vm0 = vcmask 64512   ;;  %v4484_v1 = vld [vmem:[%s7211_s3 + $0x20] sm:$0xff]  ;;  %p5731_p3 = scmp.lt.s32.totalorder %s4342_s24, 1  ;;  %v5676_v3 = vmov 0.0   ;;  %s5848_s7 = sld [smem:[#allocation3]] }
   0xf   : > { %v5738_v2 = vld [vmem:[%s7211_s3] sm:$0xff]  ;;  %4950 = vmatprep.subr.mxu1 %v4353_v0  ;;  %476 = vst.msk [vmem:[#allocation2 + $0x8] sm:$0xff] %vm474_vm0, %v5676_v3  ;;  %475 = vst.msk [vmem:[#allocation2] sm:$0xff] %vm474_vm0, %v5676_v3  ;;  %5150 = vmatprep.subr.mxu0 %v4484_v1  ;;  %v5859_v4 = vld [vmem:[%s7211_s3 + $0x28] sm:$0xff]  ;;  %vm478_vm1 = vcmask 57344  }
  0x10   : > { %477 = vst.msk [vmem:[#allocation2 + $0x10] sm:$0xff] %vm474_vm0, %v5676_v3  ;;  %480 = vst.msk [vmem:[#allocation2 + $0x20] sm:$0xff] %vm474_vm0, %v5676_v3  ;;  %4951 = vmatpush3.msra.mxu1 %v4353_v0  ;;  %5151 = vmatpush3.msra.mxu0 %v4484_v1  ;;  %s7305_s24 = smov (!%p5731_p3, %s4342_s24), 1  ;;  %v5903_v5 = vld [vmem:[%s7209_s1] ss:$0 sm:$0xff]  ;;  %v5942_v28 = vld [vmem:[%s7211_s3 + $0x10] sm:$0xff] }
  0x11   : > { %481 = vst.msk [vmem:[#allocation2 + $0x28] sm:$0xff] %vm474_vm0, %v5676_v3  ;;  %482 = vst.msk [vmem:[#allocation2 + $0x30] sm:$0xff] %vm474_vm0, %v5676_v3  ;;  %5000 = vmatprep.subr.mxu1 %v5738_v2  ;;  %5200 = vmatprep.subr.mxu0 %v5859_v4  ;;  %s4651_s10 = sshll.u32 %s7305_s24, 8  ;;  %v5915_v6 = vld [vmem:[%s7209_s1 + $0x1] ss:$0 sm:$0xff]  ;;  %s266_s12 = scalar_lea.vmem %s7213_s5, %s7305_s24 }
  0x12   : > { %484 = vst.msk [vmem:[#allocation2 + $0x40] sm:$0xff] %vm474_vm0, %v5676_v3  ;;  %485 = vst.msk [vmem:[#allocation2 + $0x48] sm:$0xff] %vm474_vm0, %v5676_v3  ;;  %s5910_s15 = scalar_lea.vmem %s7208_s0, %s4651_s10  ;;  %s6855_s9 = scalar_lea.vmem %s7212_s4, %s4651_s10 }
  0x13   : > { %486 = vst.msk [vmem:[#allocation2 + $0x50] sm:$0xff] %vm474_vm0, %v5676_v3  ;;  %488 = vst.msk [vmem:[#allocation2 + $0x60] sm:$0xff] %vm474_vm0, %v5676_v3  ;;  %v270_v7 = vld [vmem:[%s5910_s15] sm:$0xff]  ;;  %v271_v8 = vld [vmem:[%s5910_s15 + $0x8] sm:$0xff] }
  0x14   : > { %489 = vst.msk [vmem:[#allocation2 + $0x68] sm:$0xff] %vm474_vm0, %v5676_v3  ;;  %490 = vst.msk [vmem:[#allocation2 + $0x70] sm:$0xff] %vm474_vm0, %v5676_v3  ;;  %v272_v9 = vld [vmem:[%s5910_s15 + $0x10] sm:$0xff]  ;;  %v309_v10 = vmul.f32 %v5903_v5, %v270_v7  ;;  %v310_v11 = vmul.f32 %v5903_v5, %v271_v8  ;;  %v273_v13 = vld [vmem:[%s5910_s15 + $0x18] sm:$0xff]  ;;  %v5927_v18 = vstv %s5848_s7 }
  0x15   : > { %492 = vst.msk [vmem:[#allocation2 + $0x80] sm:$0xff] %vm474_vm0, %v5676_v3  ;;  %493 = vst.msk [vmem:[#allocation2 + $0x88] sm:$0xff] %vm474_vm0, %v5676_v3  ;;  %v311_v12 = vmul.f32 %v5903_v5, %v272_v9  ;;  %v274_v14 = vld [vmem:[%s5910_s15 + $0x20] sm:$0xff]  ;;  %v275_v15 = vld [vmem:[%s5910_s15 + $0x28] sm:$0xff]  ;;  %v312_v19 = vmul.f32 %v5903_v5, %v273_v13 }
  0x16   : > { %494 = vst.msk [vmem:[#allocation2 + $0x90] sm:$0xff] %vm474_vm0, %v5676_v3  ;;  %496 = vst.msk [vmem:[#allocation2 + $0xa0] sm:$0xff] %vm474_vm0, %v5676_v3  ;;  %v614_v16 = vld [vmem:[#allocation2 + $0x8] sm:$0xff]  ;;  %v313_v20 = vmul.f32 %v5903_v5, %v274_v14  ;;  %v314_v21 = vmul.f32 %v5903_v5, %v275_v15  ;;  %v276_v22 = vld [vmem:[%s5910_s15 + $0x30] sm:$0xff]  ;;  %v345_v23 = vadd.f32 %v5915_v6, %v309_v10 }
  0x17   : > { %497 = vst.msk [vmem:[#allocation2 + $0xa8] sm:$0xff] %vm474_vm0, %v5676_v3  ;;  %498 = vst.msk [vmem:[#allocation2 + $0xb0] sm:$0xff] %vm474_vm0, %v5676_v3  ;;  %v615_v17 = vld [vmem:[#allocation2 + $0x10] sm:$0xff]  ;;  %4952 = vmatprep.mubr.msk.f32.mxu1 %vm474_vm0, %v614_v16  ;;  %v346_v24 = vadd.f32 %v5915_v6, %v310_v11  ;;  %v347_v25 = vadd.f32 %v5915_v6, %v311_v12  ;;  %v315_v26 = vmul.f32 %v5903_v5, %v276_v22  ;;  %v277_v27 = vld [vmem:[%s5910_s15 + $0x38] sm:$0xff] }
  0x18   : > { %500 = vst.msk [vmem:[#allocation2 + $0xc0] sm:$0xff] %vm474_vm0, %v5676_v3  ;;  %501 = vst.msk [vmem:[#allocation2 + $0xc8] sm:$0xff] %vm474_vm0, %v5676_v3  ;;  %4953 = vmatmul.mubr.msk.f32.vlgmr.msra.gmra.mrb[0].mxu1 %vm474_vm0, %v615_v17  ;;  %v348_v29 = vadd.f32 %v5915_v6, %v312_v19  ;;  %v349_v30 = vadd.f32 %v5915_v6, %v313_v20  ;;  %v350_v31 = vadd.f32 %v5915_v6, %v314_v21  ;;  %v278_v37 = vld [vmem:[%s5910_s15 + $0x40] sm:$0xff]  ;;  %v279_v41 = vld [vmem:[%s5910_s15 + $0x48] sm:$0xff] }
  0x19   : > { %502 = vst.msk [vmem:[#allocation2 + $0xd0] sm:$0xff] %vm474_vm0, %v5676_v3  ;;  %504 = vst.msk [vmem:[#allocation2 + $0xe0] sm:$0xff] %vm474_vm0, %v5676_v3  ;;  %v316_v32 = vmul.f32 %v5903_v5, %v277_v27  ;;  %vm377_vm2 = vcmp.ge.f32.partialorder %v345_v23, 0.0  ;;  %v410_v33 = vmul.f32 %v5927_v18, %v345_v23  ;;  %vm378_vm3 = vcmp.ge.f32.partialorder %v346_v24, 0.0  ;;  %5001 = vmatpush3.msra.mxu1 %v5738_v2  ;;  %v280_v42 = vld [vmem:[%s5910_s15 + $0x50] sm:$0xff]  ;;  %v281_v43 = vld [vmem:[%s5910_s15 + $0x58] sm:$0xff] }
  0x1a   : > { %505 = vst.msk [vmem:[#allocation2 + $0xe8] sm:$0xff] %vm474_vm0, %v5676_v3  ;;  %506 = vst.msk [vmem:[#allocation2 + $0xf0] sm:$0xff] %vm474_vm0, %v5676_v3  ;;  %v411_v34 = vmul.f32 %v5927_v18, %v346_v24  ;;  %vm379_vm4 = vcmp.ge.f32.partialorder %v347_v25, 0.0  ;;  %v412_v35 = vmul.f32 %v5927_v18, %v347_v25  ;;  %vm380_vm5 = vcmp.ge.f32.partialorder %v348_v29, 0.0  ;;  %5050 = vmatprep.subr.mxu1 %v5942_v28  ;;  %v282_v55 = vld [vmem:[%s5910_s15 + $0x60] sm:$0xff]  ;;  %v283_v56 = vld [vmem:[%s5910_s15 + $0x68] sm:$0xff] }
  0x1b   : > { %508 = vst.msk [vmem:[#allocation2 + $0x100] sm:$0xff] %vm474_vm0, %v5676_v3  ;;  %509 = vst.msk [vmem:[#allocation2 + $0x108] sm:$0xff] %vm474_vm0, %v5676_v3  ;;  %v413_v36 = vmul.f32 %v5927_v18, %v348_v29  ;;  %v442_v38 = vsel %vm377_vm2, %v345_v23, %v410_v33  ;;  %vm381_vm6 = vcmp.ge.f32.partialorder %v349_v30, 0.0  ;;  %v414_v40 = vmul.f32 %v5927_v18, %v349_v30  ;;  %v284_v8 = vld [vmem:[%s5910_s15 + $0x70] sm:$0xff]  ;;  %v285_v14 = vld [vmem:[%s5910_s15 + $0x78] sm:$0xff] }
  0x1c   : > { %510 = vst.msk [vmem:[#allocation2 + $0x110] sm:$0xff] %vm474_vm0, %v5676_v3  ;;  %512 = vst.msk [vmem:[#allocation2 + $0x120] sm:$0xff] %vm474_vm0, %v5676_v3  ;;  %v443_v39 = vsel %vm378_vm3, %v346_v24, %v411_v34  ;;  %v444_v44 = vsel %vm379_vm4, %v347_v25, %v412_v35  ;;  %vm382_vm7 = vcmp.ge.f32.partialorder %v350_v31, 0.0  ;;  %v415_v46 = vmul.f32 %v5927_v18, %v350_v31  ;;  %v5991_v9 = vld [vmem:[%s7211_s3 + $0x30] sm:$0xff]  ;;  %v286_v20 = vld [vmem:[%s5910_s15 + $0x80] sm:$0xff] }
  0x1d   : > { %513 = vst.msk [vmem:[#allocation2 + $0x128] sm:$0xff] %vm474_vm0, %v5676_v3  ;;  %514 = vst.msk [vmem:[#allocation2 + $0x130] sm:$0xff] %vm474_vm0, %v5676_v3  ;;  %v445_v45 = vsel %vm380_vm5, %v348_v29, %v413_v36  ;;  %v446_v47 = vsel %vm381_vm6, %v349_v30, %v414_v40  ;;  %v351_v48 = vadd.f32 %v5915_v6, %v315_v26  ;;  %v287_v21 = vld [vmem:[%s5910_s15 + $0x88] sm:$0xff]  ;;  %v288_v25 = vld [vmem:[%s5910_s15 + $0x90] sm:$0xff] }
  0x1e   : > { %516 = vst.msk [vmem:[#allocation2 + $0x140] sm:$0xff] %vm474_vm0, %v5676_v3  ;;  %517 = vst.msk [vmem:[#allocation2 + $0x148] sm:$0xff] %vm474_vm0, %v5676_v3  ;;  %v352_v49 = vadd.f32 %v5915_v6, %v316_v32  ;;  %v317_v50 = vmul.f32 %v5903_v5, %v278_v37  ;;  %v447_v51 = vsel %vm382_vm7, %v350_v31, %v415_v46 }
  0x1f   : > { %518 = vst.msk [vmem:[#allocation2 + $0x150] sm:$0xff] %vm474_vm0, %v5676_v3  ;;  %520 = vst.msk [vmem:[#allocation2 + $0x160] sm:$0xff] %vm474_vm0, %v5676_v3  ;;  %v318_v52 = vmul.f32 %v5903_v5, %v279_v41  ;;  %v319_v53 = vmul.f32 %v5903_v5, %v280_v42  ;;  %v320_v54 = vmul.f32 %v5903_v5, %v281_v43  ;;  %vm383_vm8 = vcmp.ge.f32.partialorder %v351_v48, 0.0  ;;  %v289_v41 = vld [vmem:[%s5910_s15 + $0x98] sm:$0xff] }
  0x20   : > { %521 = vst.msk [vmem:[#allocation2 + $0x168] sm:$0xff] %vm474_vm0, %v5676_v3  ;;  %522 = vst.msk [vmem:[#allocation2 + $0x170] sm:$0xff] %vm474_vm0, %v5676_v3  ;;  %v416_v57 = vmul.f32 %v5927_v18, %v351_v48  ;;  %vm384_vm9 = vcmp.ge.f32.partialorder %v352_v49, 0.0  ;;  %v417_v58 = vmul.f32 %v5927_v18, %v352_v49  ;;  %v353_v59 = vadd.f32 %v5915_v6, %v317_v50 }
  0x21   : > { %524 = vst.msk [vmem:[#allocation2 + $0x180] sm:$0xff] %vm474_vm0, %v5676_v3  ;;  %525 = vst.msk [vmem:[#allocation2 + $0x188] sm:$0xff] %vm474_vm0, %v5676_v3  ;;  %v354_v60 = vadd.f32 %v5915_v6, %v318_v52  ;;  %v355_v61 = vadd.f32 %v5915_v6, %v319_v53  ;;  %v356_v62 = vadd.f32 %v5915_v6, %v320_v54  ;;  %v292_v54 = vld [vmem:[%s5910_s15 + $0xb0] sm:$0xff] }
  0x22   : > { %526 = vst.msk [vmem:[#allocation2 + $0x190] sm:$0xff] %vm474_vm0, %v5676_v3  ;;  %528 = vst.msk [vmem:[#allocation2 + $0x1a0] sm:$0xff] %vm474_vm0, %v5676_v3  ;;  %v448_v63 = vsel %vm383_vm8, %v351_v48, %v416_v57  ;;  %v449_v0 = vsel %vm384_vm9, %v352_v49, %v417_v58  ;;  %v321_v1 = vmul.f32 %v5903_v5, %v282_v55  ;;  %vm385_vm10 = vcmp.ge.f32.partialorder %v353_v59, 0.0  ;;  %v291_v49 = vld [vmem:[%s5910_s15 + $0xa8] sm:$0xff]  ;;  %v293_v55 = vld [vmem:[%s5910_s15 + $0xb8] sm:$0xff] }
  0x23   : > { %529 = vst.msk [vmem:[#allocation2 + $0x1a8] sm:$0xff] %vm474_vm0, %v5676_v3  ;;  %530 = vst.msk [vmem:[#allocation2 + $0x1b0] sm:$0xff] %vm474_vm0, %v5676_v3  ;;  %v322_v2 = vmul.f32 %v5903_v5, %v283_v56  ;;  %vm386_vm11 = vcmp.ge.f32.partialorder %v354_v60, 0.0  ;;  %v419_v7 = vmul.f32 %v5927_v18, %v354_v60  ;;  %vm387_vm12 = vcmp.ge.f32.partialorder %v355_v61, 0.0  ;;  %v294_v56 = vld [vmem:[%s5910_s15 + $0xc0] sm:$0xff] }
  0x24   : > { %532 = vst.msk [vmem:[#allocation2 + $0x1c0] sm:$0xff] %vm474_vm0, %v5676_v3  ;;  %533 = vst.msk [vmem:[#allocation2 + $0x1c8] sm:$0xff] %vm474_vm0, %v5676_v3  ;;  %v420_v12 = vmul.f32 %v5927_v18, %v355_v61  ;;  %vm388_vm13 = vcmp.ge.f32.partialorder %v356_v62, 0.0  ;;  %v421_v13 = vmul.f32 %v5927_v18, %v356_v62  ;;  %v357_v19 = vadd.f32 %v5915_v6, %v321_v1 }
  0x25   : > { %534 = vst.msk [vmem:[#allocation2 + $0x1d0] sm:$0xff] %vm474_vm0, %v5676_v3  ;;  %536 = vst.msk [vmem:[#allocation2 + $0x1e0] sm:$0xff] %vm474_vm0, %v5676_v3  ;;  %v451_v17 = vsel %vm386_vm11, %v354_v60, %v419_v7  ;;  %v358_v24 = vadd.f32 %v5915_v6, %v322_v2  ;;  %v323_v29 = vmul.f32 %v5903_v5, %v284_v8 }
  0x26   : > { %537 = vst.msk [vmem:[#allocation2 + $0x1e8] sm:$0xff] %vm474_vm0, %v5676_v3  ;;  %538 = vst.msk [vmem:[#allocation2 + $0x1f0] sm:$0xff] %vm474_vm0, %v5676_v3  ;;  %v452_v22 = vsel %vm387_vm12, %v355_v61, %v420_v12  ;;  %v453_v23 = vsel %vm388_vm13, %v356_v62, %v421_v13  ;;  %vm389_vm14 = vcmp.ge.f32.partialorder %v357_v19, 0.0  ;;  %v422_v27 = vmul.f32 %v5927_v18, %v357_v19 }
  0x27   : > { %540 = vst.msk [vmem:[#allocation2 + $0x200] sm:$0xff] %vm474_vm0, %v5676_v3  ;;  %541 = vst.msk [vmem:[#allocation2 + $0x208] sm:$0xff] %vm474_vm0, %v5676_v3  ;;  %v324_v30 = vmul.f32 %v5903_v5, %v285_v14  ;;  %vm390_vm15 = vcmp.ge.f32.partialorder %v358_v24, 0.0  ;;  %v325_v32 = vmul.f32 %v5903_v5, %v286_v20  ;;  %v326_v33 = vmul.f32 %v5903_v5, %v287_v21  ;;  %v295_v20 = vld [vmem:[%s5910_s15 + $0xc8] sm:$0xff]  ;;  %v296_v21 = vld [vmem:[%s5910_s15 + $0xd0] sm:$0xff] }
  0x28   : > { %542 = vst.msk [vmem:[#allocation2 + $0x210] sm:$0xff] %vm474_vm0, %v5676_v3  ;;  %544 = vst.msk [vmem:[#allocation2 + $0x220] sm:$0xff] %vm474_vm0, %v5676_v3  ;;  %v454_v34 = vsel %vm389_vm14, %v357_v19, %v422_v27  ;;  %v359_v35 = vadd.f32 %v5915_v6, %v323_v29  ;;  %v327_v37 = vmul.f32 %v5903_v5, %v288_v25  ;;  %v297_v25 = vld [vmem:[%s5910_s15 + $0xd8] sm:$0xff] }
  0x29   : > { %545 = vst.msk [vmem:[#allocation2 + $0x228] sm:$0xff] %vm474_vm0, %v5676_v3  ;;  %546 = vst.msk [vmem:[#allocation2 + $0x230] sm:$0xff] %vm474_vm0, %v5676_v3  ;;  %v360_v36 = vadd.f32 %v5915_v6, %v324_v30  ;;  %v362_v40 = vadd.f32 %v5915_v6, %v326_v33  ;;  %v328_v53 = vmul.f32 %v5903_v5, %v289_v41  ;;  %v298_v30 = vld [vmem:[%s5910_s15 + $0xe0] sm:$0xff] }
  0x2a   : > { %483 = vst.msk [vmem:[#allocation2 + $0x38] sm:$0x1] %vm478_vm1, %v5676_v3  ;;  %479 = vst.msk [vmem:[#allocation2 + $0x18] sm:$0x1] %vm478_vm1, %v5676_v3  ;;  %vm391_vm2 = vcmp.ge.f32.partialorder %v359_v35, 0.0  ;;  %v424_v43 = vmul.f32 %v5927_v18, %v359_v35  ;;  %v363_v52 = vadd.f32 %v5915_v6, %v327_v37  ;;  %v331_v2 = vmul.f32 %v5903_v5, %v292_v54 }
  0x2b   : > { %487 = vst.msk [vmem:[#allocation2 + $0x58] sm:$0x1] %vm478_vm1, %v5676_v3  ;;  %491 = vst.msk [vmem:[#allocation2 + $0x78] sm:$0x1] %vm478_vm1, %v5676_v3  ;;  %vm392_vm3 = vcmp.ge.f32.partialorder %v360_v36, 0.0  ;;  %vm394_vm5 = vcmp.ge.f32.partialorder %v362_v40, 0.0  ;;  %v427_v48 = vmul.f32 %v5927_v18, %v362_v40  ;;  %v364_v62 = vadd.f32 %v5915_v6, %v328_v53 }
  0x2c   : > { %495 = vst.msk [vmem:[#allocation2 + $0x98] sm:$0x1] %vm478_vm1, %v5676_v3  ;;  %499 = vst.msk [vmem:[#allocation2 + $0xb8] sm:$0x1] %vm478_vm1, %v5676_v3  ;;  %v456_v50 = vsel %vm391_vm2, %v359_v35, %v424_v43  ;;  %vm395_vm6 = vcmp.ge.f32.partialorder %v363_v52, 0.0  ;;  %v428_v61 = vmul.f32 %v5927_v18, %v363_v52  ;;  %v333_v7 = vmul.f32 %v5903_v5, %v294_v56  ;;  %v301_v35 = vld [vmem:[%s5910_s15 + $0xf8] sm:$0xff] }
  0x2d   : > { %503 = vst.msk [vmem:[#allocation2 + $0xd8] sm:$0x1] %vm478_vm1, %v5676_v3  ;;  %507 = vst.msk [vmem:[#allocation2 + $0xf8] sm:$0x1] %vm478_vm1, %v5676_v3  ;;  %v459_v58 = vsel %vm394_vm5, %v362_v40, %v427_v48  ;;  %vm396_vm7 = vcmp.ge.f32.partialorder %v364_v62, 0.0  ;;  %v367_v13 = vadd.f32 %v5915_v6, %v331_v2  ;;  %v335_v33 = vmul.f32 %v5903_v5, %v296_v21 }
  0x2e   : > { %511 = vst.msk [vmem:[#allocation2 + $0x118] sm:$0x1] %vm478_vm1, %v5676_v3  ;;  %515 = vst.msk [vmem:[#allocation2 + $0x138] sm:$0x1] %vm478_vm1, %v5676_v3  ;;  %v460_v8 = vsel %vm395_vm6, %v363_v52, %v428_v61  ;;  %v369_v19 = vadd.f32 %v5915_v6, %v333_v7  ;;  %v337_v43 = vmul.f32 %v5903_v5, %v298_v30 }
  0x2f   : > { %519 = vst.msk [vmem:[#allocation2 + $0x158] sm:$0x1] %vm478_vm1, %v5676_v3  ;;  %523 = vst.msk [vmem:[#allocation2 + $0x178] sm:$0x1] %vm478_vm1, %v5676_v3 }
  0x30   : > { %527 = vst.msk [vmem:[#allocation2 + $0x198] sm:$0x1] %vm478_vm1, %v5676_v3  ;;  %531 = vst.msk [vmem:[#allocation2 + $0x1b8] sm:$0x1] %vm478_vm1, %v5676_v3  ;;  %vm401_vm12 = vcmp.ge.f32.partialorder %v369_v19, 0.0  ;;  %v434_v29 = vmul.f32 %v5927_v18, %v369_v19 }
  0x31   : > { %535 = vst.msk [vmem:[#allocation2 + $0x1d8] sm:$0x1] %vm478_vm1, %v5676_v3  ;;  %539 = vst.msk [vmem:[#allocation2 + $0x1f8] sm:$0x1] %vm478_vm1, %v5676_v3 }
  0x32   : > { %543 = vst.msk [vmem:[#allocation2 + $0x218] sm:$0x1] %vm478_vm1, %v5676_v3  ;;  %547 = vst.msk [vmem:[#allocation2 + $0x238] sm:$0x1] %vm478_vm1, %v5676_v3  ;;  %v418_v3 = vmul.f32 %v5927_v18, %v353_v59 }
  0x33   : > { %549 = vst.msk [vmem:[#allocation2 + $0x28] sm:$0xff] %vm474_vm0, %v442_v38  ;;  %550 = vst.msk [vmem:[#allocation2 + $0x30] sm:$0xff] %vm474_vm0, %v443_v39  ;;  %v361_v39 = vadd.f32 %v5915_v6, %v325_v32  ;;  %v334_v32 = vmul.f32 %v5903_v5, %v295_v20 }
  0x34   : > { %551 = vst.msk [vmem:[#allocation2 + $0x48] sm:$0xff] %vm474_vm0, %v444_v44  ;;  %552 = vst.msk [vmem:[#allocation2 + $0x50] sm:$0xff] %vm474_vm0, %v445_v45  ;;  %v450_v16 = vsel %vm385_vm10, %v353_v59, %v418_v3  ;;  %v425_v44 = vmul.f32 %v5927_v18, %v360_v36  ;;  %v290_v45 = vld [vmem:[%s5910_s15 + $0xa0] sm:$0xff]  ;;  %v332_v3 = vmul.f32 %v5903_v5, %v293_v55  ;;  %vm399_vm10 = vcmp.ge.f32.partialorder %v367_v13, 0.0 }
  0x35   : > { %553 = vst.msk [vmem:[#allocation2 + $0x68] sm:$0xff] %vm474_vm0, %v446_v47  ;;  %554 = vst.msk [vmem:[#allocation2 + $0x70] sm:$0xff] %vm474_vm0, %v447_v51  ;;  %vm393_vm4 = vcmp.ge.f32.partialorder %v361_v39, 0.0  ;;  %v426_v47 = vmul.f32 %v5927_v18, %v361_v39  ;;  %v329_v59 = vmul.f32 %v5903_v5, %v290_v45  ;;  %v370_v41 = vadd.f32 %v5915_v6, %v334_v32 }
  0x36   : > { %555 = vst.msk [vmem:[#allocation2 + $0x88] sm:$0xff] %vm474_vm0, %v448_v63  ;;  %556 = vst.msk [vmem:[#allocation2 + $0x90] sm:$0xff] %vm474_vm0, %v449_v0  ;;  %v457_v51 = vsel %vm392_vm3, %v360_v36, %v425_v44  ;;  %v330_v63 = vmul.f32 %v5903_v5, %v291_v49  ;;  %v368_v14 = vadd.f32 %v5915_v6, %v332_v3 }
  0x37   : > { %557 = vst.msk [vmem:[#allocation2 + $0xa8] sm:$0xff] %vm474_vm0, %v450_v16  ;;  %558 = vst.msk [vmem:[#allocation2 + $0xb0] sm:$0xff] %vm474_vm0, %v451_v17  ;;  %v458_v57 = vsel %vm393_vm4, %v361_v39, %v426_v47  ;;  %v365_v1 = vadd.f32 %v5915_v6, %v329_v59  ;;  %v336_v39 = vmul.f32 %v5903_v5, %v297_v25  ;;  %vm402_vm13 = vcmp.ge.f32.partialorder %v370_v41, 0.0 }
  0x38   : > { %559 = vst.msk [vmem:[#allocation2 + $0xc8] sm:$0xff] %vm474_vm0, %v452_v22  ;;  %560 = vst.msk [vmem:[#allocation2 + $0xd0] sm:$0xff] %vm474_vm0, %v453_v23  ;;  %vm400_vm11 = vcmp.ge.f32.partialorder %v368_v14, 0.0  ;;  %v433_v27 = vmul.f32 %v5927_v18, %v368_v14  ;;  %v340_v47 = vmul.f32 %v5903_v5, %v301_v35  ;;  %v435_v48 = vmul.f32 %v5927_v18, %v370_v41 }
  0x39   : > { %561 = vst.msk [vmem:[#allocation2 + $0xe8] sm:$0xff] %vm474_vm0, %v454_v34  ;;  %563 = vst.msk [vmem:[#allocation2 + $0x108] sm:$0xff] %vm474_vm0, %v456_v50  ;;  %vm397_vm8 = vcmp.ge.f32.partialorder %v365_v1, 0.0  ;;  %v430_v12 = vmul.f32 %v5927_v18, %v365_v1  ;;  %v300_v34 = vld [vmem:[%s5910_s15 + $0xf0] sm:$0xff]  ;;  %v372_v45 = vadd.f32 %v5915_v6, %v336_v39  ;;  %v581_v39 = vld [vmem:[#allocation2 + $0x7] sm:$0xff] }
  0x3a   : > { %v616_v10 = vld [vmem:[#allocation2 + $0x28] sm:$0xff]  ;;  %v617_v11 = vld [vmem:[#allocation2 + $0x30] sm:$0xff]  ;;  %564 = vst.msk [vmem:[#allocation2 + $0x110] sm:$0xff] %vm474_vm0, %v457_v51  ;;  %565 = vst.msk [vmem:[#allocation2 + $0x128] sm:$0xff] %vm474_vm0, %v458_v57  ;;  %v465_v37 = vsel %vm400_vm11, %v368_v14, %v433_v27  ;;  %v373_v51 = vadd.f32 %v5915_v6, %v337_v43  ;;  %v467_v54 = vsel %vm402_vm13, %v370_v41, %v435_v48 }
  0x3b   : > { %4955 = vmatprep.mubr.msk.f32.mxu1 %vm474_vm0, %v616_v10  ;;  %5152 = vmatprep.mubr.msk.f32.mxu0 %vm474_vm0, %v616_v10  ;;  %v618_v15 = vld [vmem:[#allocation2 + $0x48] sm:$0xff]  ;;  %v619_v26 = vld [vmem:[#allocation2 + $0x50] sm:$0xff]  ;;  %566 = vst.msk [vmem:[#allocation2 + $0x130] sm:$0xff] %vm474_vm0, %v459_v58  ;;  %v429_v10 = vmul.f32 %v5927_v18, %v364_v62  ;;  %567 = vst.msk [vmem:[#allocation2 + $0x148] sm:$0xff] %vm474_vm0, %v460_v8  ;;  %v462_v23 = vsel %vm397_vm8, %v365_v1, %v430_v12 }
  0x3c   : > { %4956 = vmatmul.mubr.msk.f32.gmra.mrb[2].mxu1 %vm474_vm0, %v617_v11  ;;  %5153 = vmatmul.mubr.msk.f32.vlgmr.msra.gmra.mrb[0].mxu0 %vm474_vm0, %v617_v11  ;;  %v620_v31 = vld [vmem:[#allocation2 + $0x68] sm:$0xff]  ;;  %v621_v42 = vld [vmem:[#allocation2 + $0x70] sm:$0xff]  ;;  %v366_v11 = vadd.f32 %v5915_v6, %v330_v63  ;;  %569 = vst.msk [vmem:[#allocation2 + $0x168] sm:$0xff] %vm474_vm0, %v462_v23  ;;  %572 = vst.msk [vmem:[#allocation2 + $0x190] sm:$0xff] %vm474_vm0, %v465_v37  ;;  %v376_v57 = vadd.f32 %v5915_v6, %v340_v47  ;;  %vm405_vm2 = vcmp.ge.f32.partialorder %v373_v51, 0.0 }
  0x3d   : > { %5201 = vmatpush3.msra.mxu0 %v5859_v4  ;;  %4958 = vmatprep.mubr.msk.f32.mxu1 %vm474_vm0, %v618_v15  ;;  %v423_v4 = vmul.f32 %v5927_v18, %v358_v24  ;;  %v622_v46 = vld [vmem:[#allocation2 + $0x88] sm:$0xff]  ;;  %v623_v60 = vld [vmem:[#allocation2 + $0x90] sm:$0xff]  ;;  %v461_v16 = vsel %vm396_vm7, %v364_v62, %v429_v10  ;;  %574 = vst.msk [vmem:[#allocation2 + $0x1b0] sm:$0xff] %vm474_vm0, %v467_v54 }
  0x3e   : > { %5155 = vmatprep.mubr.msk.f32.mxu0 %vm474_vm0, %v618_v15  ;;  %5250 = vmatprep.subr.mxu0 %v5991_v9  ;;  %v6058_v0 = vld [vmem:[#allocation2 + $0xa8] sm:$0xff]  ;;  %v6076_v15 = vld [vmem:[#allocation2 + $0xb0] sm:$0xff]  ;;  %vm398_vm9 = vcmp.ge.f32.partialorder %v366_v11, 0.0  ;;  %v431_v17 = vmul.f32 %v5927_v18, %v366_v11  ;;  %568 = vst.msk [vmem:[#allocation2 + $0x150] sm:$0xff] %vm474_vm0, %v461_v16  ;;  %v438_v59 = vmul.f32 %v5927_v18, %v373_v51  ;;  %vm408_vm5 = vcmp.ge.f32.partialorder %v376_v57, 0.0 }
  0x3f   : > { %v455_v38 = vsel %vm390_vm15, %v358_v24, %v423_v4  ;;  %v6082_v22 = vld [vmem:[#allocation2 + $0xc8] sm:$0xff]  ;;  %v432_v24 = vmul.f32 %v5927_v18, %v367_v13  ;;  %v6105_v36 = vld [vmem:[#allocation2 + $0xd0] sm:$0xff]  ;;  %vm404_vm15 = vcmp.ge.f32.partialorder %v372_v45, 0.0  ;;  %v441_v63 = vmul.f32 %v5927_v18, %v376_v57 }
  0x40   : > { %4959 = vmatmul.mubr.msk.f32.gmra.mrb[4].mxu1 %vm474_vm0, %v619_v26  ;;  %5156 = vmatmul.mubr.msk.f32.gmra.mrb[2].mxu0 %vm474_vm0, %v619_v26  ;;  %562 = vst.msk [vmem:[#allocation2 + $0xf0] sm:$0xff] %vm474_vm0, %v455_v38  ;;  %v463_v26 = vsel %vm398_vm9, %v366_v11, %v431_v17  ;;  %v466_v38 = vsel %vm401_vm12, %v369_v19, %v434_v29  ;;  %v6111_v40 = vld [vmem:[#allocation2 + $0xe8] sm:$0xff]  ;;  %v6177_v10 = vld [vmem:[#allocation2 + $0x31] sm:$0xff] }
  0x41   : > { %4961 = vmatprep.mubr.msk.f32.mxu1 %vm474_vm0, %v620_v31  ;;  %5158 = vmatprep.mubr.msk.f32.mxu0 %vm474_vm0, %v620_v31  ;;  %v299_v31 = vld [vmem:[%s5910_s15 + $0xe8] sm:$0xff]  ;;  %570 = vst.msk [vmem:[#allocation2 + $0x170] sm:$0xff] %vm474_vm0, %v463_v26  ;;  %v464_v4 = vsel %vm399_vm10, %v367_v13, %v432_v24  ;;  %573 = vst.msk [vmem:[#allocation2 + $0x1a8] sm:$0xff] %vm474_vm0, %v466_v38  ;;  %v6155_v61 = vld [vmem:[#allocation2 + $0x110] sm:$0xff]  ;;  %v470_v62 = vsel %vm405_vm2, %v373_v51, %v438_v59  ;;  %s269_s15 = scalar_lea.vmem %s7214_s6, %s7305_s24 }
  0x42   : > { %571 = vst.msk [vmem:[#allocation2 + $0x188] sm:$0xff] %vm474_vm0, %v464_v4  ;;  %v338_v44 = vmul.f32 %v5903_v5, %v299_v31  ;;  %v6137_v53 = vld [vmem:[#allocation2 + $0x108] sm:$0xff]  ;;  %577 = vst.msk [vmem:[#allocation2 + $0x1e8] sm:$0xff] %vm474_vm0, %v470_v62  ;;  %v473_v8 = vsel %vm408_vm5, %v376_v57, %v441_v63  ;;  %v6186_v13 = vld [vmem:[%s7211_s3 + $0x38] sm:$0xff] }
  0x43   : > { %v6158_v1 = vld [vmem:[#allocation2 + $0x128] sm:$0xff]  ;;  %580 = vst.msk [vmem:[#allocation2 + $0x210] sm:$0xff] %vm474_vm0, %v473_v8  ;;  %v6197_v16 = vld [vmem:[#allocation2 + $0x51] sm:$0xff] }
  0x44   : > { %4962 = vmatmul.mubr.msk.f32.gmra.mrb[6].mxu1 %vm474_vm0, %v621_v42  ;;  %5159 = vmatmul.mubr.msk.f32.gmra.mrb[4].mxu0 %vm474_vm0, %v621_v42  ;;  %v371_v42 = vadd.f32 %v5915_v6, %v335_v33  ;;  %v374_v52 = vadd.f32 %v5915_v6, %v338_v44  ;;  %v6160_v2 = vld [vmem:[#allocation2 + $0x29] sm:$0xff]  ;;  %v6216_v20 = vld [vmem:[#allocation2 + $0x71] sm:$0xff] }
  0x45   : > { %4964 = vmatprep.mubr.msk.f32.mxu1 %vm474_vm0, %v622_v46  ;;  %5161 = vmatprep.mubr.msk.f32.mxu0 %vm474_vm0, %v622_v46  ;;  %v339_v46 = vmul.f32 %v5903_v5, %v300_v34  ;;  %v437_v5 = vmul.f32 %v5927_v18, %v372_v45  ;;  %v6179_v11 = vld [vmem:[#allocation2 + $0x148] sm:$0xff]  ;;  %v6195_v14 = vld [vmem:[#allocation2 + $0x150] sm:$0xff] }
  0x46   : > { %vm403_vm14 = vcmp.ge.f32.partialorder %v371_v42, 0.0  ;;  %v436_v49 = vmul.f32 %v5927_v18, %v371_v42  ;;  %vm406_vm3 = vcmp.ge.f32.partialorder %v374_v52, 0.0  ;;  %7250 = vst [vmem:[#allocation4_spill] sm:$0xff] %v6179_v11  ;;  %v6181_v12 = vld [vmem:[#allocation2 + $0x49] sm:$0xff]  ;;  %7251 = vst [vmem:[#allocation5_spill] sm:$0xff] %v6195_v14  ;;  %v6232_v25 = vld [vmem:[#allocation2 + $0x91] sm:$0xff] }
  0x47   : > { %v6132_v50 = vld [vmem:[#allocation2 + $0xf0] sm:$0xff]  ;;  %v375_v56 = vadd.f32 %v5915_v6, %v339_v46  ;;  %v469_v58 = vsel %vm404_vm15, %v372_v45, %v437_v5  ;;  %v6201_v17 = vld [vmem:[#allocation2 + $0x168] sm:$0xff]  ;;  %v6303_v46 = vld [vmem:[%s7211_s3 + $0x18] sm:$0xff] }
  0x48   : > { %4965 = vmatmul.mubr.msk.f32.gmra.mrb[8].mxu1 %vm474_vm0, %v623_v60  ;;  %5162 = vmatmul.mubr.msk.f32.gmra.mrb[6].mxu0 %vm474_vm0, %v623_v60  ;;  %v468_v55 = vsel %vm403_vm14, %v371_v42, %v436_v49  ;;  %576 = vst.msk [vmem:[#allocation2 + $0x1d0] sm:$0xff] %vm474_vm0, %v469_v58  ;;  %v439_v60 = vmul.f32 %v5927_v18, %v374_v52  ;;  %7252 = vst [vmem:[#allocation6_spill] sm:$0xff] %v6201_v17  ;;  %v6203_v19 = vld [vmem:[#allocation2 + $0x69] sm:$0xff]  ;;  %v6248_v30 = vld [vmem:[#allocation2 + $0xb1] sm:$0xff] }
  0x49   : > { %4967 = vmatprep.mubr.msk.f32.mxu1 %vm474_vm0, %v6058_v0  ;;  %5164 = vmatprep.mubr.msk.f32.mxu0 %vm474_vm0, %v6058_v0  ;;  %575 = vst.msk [vmem:[#allocation2 + $0x1c8] sm:$0xff] %vm474_vm0, %v468_v55  ;;  %vm407_vm4 = vcmp.ge.f32.partialorder %v375_v56, 0.0  ;;  %v440_v6 = vmul.f32 %v5927_v18, %v375_v56  ;;  %v6175_v18 = vld [vmem:[#allocation2 + $0x130] sm:$0xff]  ;;  %v6218_v21 = vld [vmem:[#allocation2 + $0x188] sm:$0xff] }
  0x4a   : > { %v471_v3 = vsel %vm406_vm3, %v374_v52, %v439_v60  ;;  %7254 = vst [vmem:[#allocation8_spill] sm:$0xff] %v6218_v21  ;;  %v6220_v23 = vld [vmem:[#allocation2 + $0x89] sm:$0xff]  ;;  %v6264_v33 = vld [vmem:[#allocation2 + $0xd1] sm:$0xff] }
  0x4b   : > { %v472_v7 = vsel %vm407_vm4, %v375_v56, %v440_v6  ;;  %578 = vst.msk [vmem:[#allocation2 + $0x1f0] sm:$0xff] %vm474_vm0, %v471_v3  ;;  %v6230_v24 = vld [vmem:[#allocation2 + $0x190] sm:$0xff]  ;;  %v6234_v26 = vld [vmem:[#allocation2 + $0x1a8] sm:$0xff] }
  0x4c   : > { %4968 = vmatmul.mubr.msk.f32.gmra.mrb[10].mxu1 %vm474_vm0, %v6076_v15  ;;  %5165 = vmatmul.mubr.msk.f32.gmra.mrb[8].mxu0 %vm474_vm0, %v6076_v15  ;;  %579 = vst.msk [vmem:[#allocation2 + $0x208] sm:$0xff] %vm474_vm0, %v472_v7  ;;  %7255 = vst [vmem:[#allocation9_spill] sm:$0xff] %v6230_v24  ;;  %v6236_v27 = vld [vmem:[#allocation2 + $0xa9] sm:$0xff]  ;;  %v6280_v38 = vld [vmem:[#allocation2 + $0xf1] sm:$0xff] }
  0x4d   : > { %4970 = vmatprep.mubr.msk.f32.mxu1 %vm474_vm0, %v6082_v22  ;;  %5167 = vmatprep.mubr.msk.f32.mxu0 %vm474_vm0, %v6082_v22  ;;  %7256 = vst [vmem:[#allocation10_spill] sm:$0xff] %v6234_v26  ;;  %v6246_v29 = vld [vmem:[#allocation2 + $0x1b0] sm:$0xff]  ;;  %v6266_v34 = vld [vmem:[#allocation2 + $0x1e8] sm:$0xff]  ;;  %7262 = vst [vmem:[#allocation16_spill] sm:$0xff] %v6280_v38 }
  0x4e   : > { %7257 = vst [vmem:[#allocation11_spill] sm:$0xff] %v6246_v29  ;;  %v6252_v4 = vld [vmem:[#allocation2 + $0xc9] sm:$0xff]  ;;  %7260 = vst [vmem:[#allocation14_spill] sm:$0xff] %v6266_v34  ;;  %v6291_v43 = vld [vmem:[#allocation2 + $0x111] sm:$0xff] }
  0x4f   : > { %v6262_v32 = vld [vmem:[#allocation2 + $0x1d0] sm:$0xff]  ;;  %v6293_v44 = vld [vmem:[#allocation2 + $0x27] sm:$0xff] }
  0x50   : > { %4971 = vmatmul.mubr.msk.f32.gmra.mrb[12].mxu1 %vm474_vm0, %v6105_v36  ;;  %5168 = vmatmul.mubr.msk.f32.gmra.mrb[10].mxu0 %vm474_vm0, %v6105_v36  ;;  %v6250_v31 = vld [vmem:[#allocation2 + $0x1c8] sm:$0xff]  ;;  %7259 = vst [vmem:[#allocation13_spill] sm:$0xff] %v6262_v32  ;;  %v6311_v48 = vld [vmem:[#allocation2 + $0x131] sm:$0xff] }
  0x51   : > { %4973 = vmatprep.mubr.msk.f32.mxu1 %vm474_vm0, %v6111_v40  ;;  %5170 = vmatprep.mubr.msk.f32.mxu0 %vm474_vm0, %v6111_v40  ;;  %7258 = vst [vmem:[#allocation12_spill] sm:$0xff] %v6250_v31  ;;  %v6268_v35 = vld [vmem:[#allocation2 + $0xe9] sm:$0xff]  ;;  %v6345_v56 = vld [vmem:[#allocation2 + $0x171] sm:$0xff] }
  0x52   : > { %v6278_v37 = vld [vmem:[#allocation2 + $0x1f0] sm:$0xff]  ;;  %v6314_v49 = vld [vmem:[#allocation2 + $0x47] sm:$0xff] }
  0x53   : > { %7261 = vst [vmem:[#allocation15_spill] sm:$0xff] %v6278_v37  ;;  %v6282_v41 = vld [vmem:[#allocation2 + $0x109] sm:$0xff]  ;;  %v6361_v60 = vld [vmem:[#allocation2 + $0x191] sm:$0xff] }
  0x54   : > { %4974 = vmatmul.mubr.msk.f32.gmra.mrb[14].mxu1 %vm474_vm0, %v6132_v50  ;;  %5171 = vmatmul.mubr.msk.f32.gmra.mrb[12].mxu0 %vm474_vm0, %v6132_v50  ;;  %v582_v42 = vld [vmem:[#allocation2 + $0xf] sm:$0xff]  ;;  %v6331_v52 = vld [vmem:[#allocation2 + $0x67] sm:$0xff] }
  0x55   : > { %4976 = vmatprep.mubr.msk.f32.mxu1 %vm474_vm0, %v6137_v53  ;;  %5173 = vmatprep.mubr.msk.f32.mxu0 %vm474_vm0, %v6137_v53  ;;  %v6295_v45 = vld [vmem:[#allocation2 + $0x129] sm:$0xff]  ;;  %7264 = vst [vmem:[#allocation18_spill] sm:$0xff] %v6331_v52  ;;  %v6377_v3 = vld [vmem:[#allocation2 + $0x1b1] sm:$0xff] }
  0x56   : > { %v6309_v47 = vld [vmem:[#allocation2 + $0x2f] sm:$0xff]  ;;  %v6347_v57 = vld [vmem:[#allocation2 + $0x87] sm:$0xff] }
  0x57   : > { %v6316_v5 = vld [vmem:[#allocation2 + $0x149] sm:$0xff]  ;;  %7266 = vst [vmem:[#allocation20_spill] sm:$0xff] %v6347_v57 }
  0x58   : > { %4977 = vmatmul.mubr.msk.f32.gmra.mrb[16].mxu1 %vm474_vm0, %v6155_v61  ;;  %5174 = vmatmul.mubr.msk.f32.gmra.mrb[14].mxu0 %vm474_vm0, %v6155_v61  ;;  %v6327_v51 = vld [vmem:[#allocation2 + $0x4f] sm:$0xff]  ;;  %v6363_v6 = vld [vmem:[#allocation2 + $0xa7] sm:$0xff] }
  0x59   : > { %4979 = vmatprep.mubr.msk.f32.mxu1 %vm474_vm0, %v6158_v1  ;;  %5202 = vmatprep.mubr.msk.f32.mxu0 %vm474_vm0, %v6160_v2  ;;  %7263 = vst [vmem:[#allocation17_spill] sm:$0xff] %v6327_v51  ;;  %v6333_v54 = vld [vmem:[#allocation2 + $0x169] sm:$0xff]  ;;  %7268 = vst [vmem:[#allocation22_spill] sm:$0xff] %v6363_v6 }
  0x5a   : > { %v6343_v55 = vld [vmem:[#allocation2 + $0x6f] sm:$0xff]  ;;  %v6379_v7 = vld [vmem:[#allocation2 + $0xc7] sm:$0xff] }
  0x5b   : > { %7265 = vst [vmem:[#allocation19_spill] sm:$0xff] %v6343_v55  ;;  %v6349_v58 = vld [vmem:[#allocation2 + $0x189] sm:$0xff]  ;;  %7270 = vst [vmem:[#allocation24_spill] sm:$0xff] %v6379_v7 }
  0x5c   : > { %4980 = vmatmul.mubr.msk.f32.gmra.mrb[18].mxu1 %vm474_vm0, %v6175_v18  ;;  %5203 = vmatmul.mubr.msk.f32.vlgmr.msra.gmra.mrb[0].mxu0 %vm474_vm0, %v6177_v10  ;;  %v6359_v59 = vld [vmem:[#allocation2 + $0x8f] sm:$0xff] }
  0x5d   : > { %5251 = vmatpush3.msra.mxu0 %v5991_v9  ;;  %4982 = vmatprep.mubr.msk.f32.mxu1 %vm474_vm0, %v6179_v11  ;;  %v6214_v9 = vld [vmem:[#allocation2 + $0x170] sm:$0xff]  ;;  %7267 = vst [vmem:[#allocation21_spill] sm:$0xff] %v6359_v59  ;;  %v6457_v11 = vld [vmem:[#allocation2 + $0x167] sm:$0xff] }
  0x5e   : > { %5205 = vmatprep.mubr.msk.f32.mxu0 %vm474_vm0, %v6181_v12  ;;  %5300 = vmatprep.subr.mxu0 %v6186_v13  ;;  %7253 = vst [vmem:[#allocation7_spill] sm:$0xff] %v6214_v9  ;;  %v6365_v62 = vld [vmem:[#allocation2 + $0x1a9] sm:$0xff] }
  0x5f   : > { %v6375_v63 = vld [vmem:[#allocation2 + $0xaf] sm:$0xff] }
  0x60   : > { %4983 = vmatmul.mubr.msk.f32.gmra.mrb[20].mxu1 %vm474_vm0, %v6195_v14  ;;  %5206 = vmatmul.mubr.msk.f32.gmra.mrb[2].mxu0 %vm474_vm0, %v6197_v16  ;;  %7269 = vst [vmem:[#allocation23_spill] sm:$0xff] %v6375_v63  ;;  %v6381_v8 = vld [vmem:[#allocation2 + $0x1c9] sm:$0xff]  ;;  %v6444_v14 = vld [vmem:[%s7211_s3 + $0x40] sm:$0xff] }
  0x61   : > { %4985 = vmatprep.mubr.msk.f32.mxu1 %vm474_vm0, %v6201_v17  ;;  %5208 = vmatprep.mubr.msk.f32.mxu0 %vm474_vm0, %v6203_v19  ;;  %v6437_v17 = vld [vmem:[#allocation2 + $0x12f] sm:$0xff] }
  0x64   : > { %4986 = vmatmul.mubr.msk.f32.gmra.mrb[22].mxu1 %vm474_vm0, %v6214_v9  ;;  %5209 = vmatmul.mubr.msk.f32.gmra.mrb[4].mxu0 %vm474_vm0, %v6216_v20  ;;  %v6427_v9 = vld [vmem:[#allocation2 + $0x127] sm:$0xff] }
  0x65   : > { %4988 = vmatprep.mubr.msk.f32.mxu1 %vm474_vm0, %v6218_v21  ;;  %5211 = vmatprep.mubr.msk.f32.mxu0 %vm474_vm0, %v6220_v23  ;;  %v6425_v21 = vld [vmem:[#allocation2 + $0x211] sm:$0xff] }
  0x66   : > { %7274 = vst [vmem:[#allocation28_spill] sm:$0xff] %v6425_v21 }
  0x68   : > { %4989 = vmatmul.mubr.msk.f32.gmra.mrb[24].mxu1 %vm474_vm0, %v6230_v24  ;;  %5212 = vmatmul.mubr.msk.f32.gmra.mrb[6].mxu0 %vm474_vm0, %v6232_v25  ;;  %v6423_v24 = vld [vmem:[#allocation2 + $0x10f] sm:$0xff] }
  0x69   : > { %4991 = vmatprep.mubr.msk.f32.mxu1 %vm474_vm0, %v6234_v26  ;;  %5214 = vmatprep.mubr.msk.f32.mxu0 %vm474_vm0, %v6236_v27  ;;  %v6413_v26 = vld [vmem:[#allocation2 + $0x209] sm:$0xff] }
  0x6a   : > { %7273 = vst [vmem:[#allocation27_spill] sm:$0xff] %v6413_v26 }
  0x6c   : > { %4992 = vmatmul.mubr.msk.f32.gmra.mrb[26].mxu1 %vm474_vm0, %v6246_v29  ;;  %5215 = vmatmul.mubr.msk.f32.gmra.mrb[8].mxu0 %vm474_vm0, %v6248_v30  ;;  %v6411_v29 = vld [vmem:[#allocation2 + $0x107] sm:$0xff] }
  0x6d   : > { %4994 = vmatprep.mubr.msk.f32.mxu1 %vm474_vm0, %v6250_v31  ;;  %5217 = vmatprep.mubr.msk.f32.mxu0 %vm474_vm0, %v6252_v4  ;;  %v6409_v31 = vld [vmem:[#allocation2 + $0x1f1] sm:$0xff] }
  0x70   : > { %4995 = vmatmul.mubr.msk.f32.gmra.mrb[28].mxu1 %vm474_vm0, %v6262_v32  ;;  %5218 = vmatmul.mubr.msk.f32.gmra.mrb[10].mxu0 %vm474_vm0, %v6264_v33  ;;  %v6407_v32 = vld [vmem:[#allocation2 + $0xef] sm:$0xff] }
  0x71   : > { %4997 = vmatprep.mubr.msk.f32.mxu1 %vm474_vm0, %v6266_v34  ;;  %5220 = vmatprep.mubr.msk.f32.mxu0 %vm474_vm0, %v6268_v35  ;;  %v6397_v34 = vld [vmem:[#allocation2 + $0x1e9] sm:$0xff]  ;;  %7272 = vst [vmem:[#allocation26_spill] sm:$0xff] %v6407_v32 }
  0x74   : > { %4998 = vmatmul.mubr.msk.f32.gmra.mrb[30].mxu1 %vm474_vm0, %v6278_v37  ;;  %5221 = vmatmul.mubr.msk.f32.gmra.mrb[12].mxu0 %vm474_vm0, %v6280_v38  ;;  %v6395_v37 = vld [vmem:[#allocation2 + $0xe7] sm:$0xff] }
  0x75   : > { %5002 = vmatprep.mubr.msk.f32.mxu1 %vm474_vm0, %v581_v39  ;;  %5223 = vmatprep.mubr.msk.f32.mxu0 %vm474_vm0, %v6282_v41  ;;  %v6391_v39 = vld [vmem:[#allocation2 + $0xcf] sm:$0xff] }
  0x76   : > { %7271 = vst [vmem:[#allocation25_spill] sm:$0xff] %v6391_v39 }
  0x78   : > { %5003 = vmatmul.mubr.msk.f32.vlgmr.msra.gmra.mrb[0].mxu1 %vm474_vm0, %v582_v42  ;;  %5224 = vmatmul.mubr.msk.f32.gmra.mrb[14].mxu0 %vm474_vm0, %v6291_v43  ;;  %v6393_v42 = vld [vmem:[#allocation2 + $0x1d1] sm:$0xff] }
  0x79   : > { %5005 = vmatprep.mubr.msk.f32.mxu1 %vm474_vm0, %v6293_v44  ;;  %5226 = vmatprep.mubr.msk.f32.mxu0 %vm474_vm0, %v6295_v45 }
  0x7a   : > { %5051 = vmatpush3.msra.mxu1 %v5942_v28  ;;  %v6329_v28 = vld [vmem:[#allocation2 + $0x151] sm:$0xff] }
  0x7b   : > { %5100 = vmatprep.subr.mxu1 %v6303_v46 }
  0x7c   : > { %5006 = vmatmul.mubr.msk.f32.gmra.mrb[2].mxu1 %vm474_vm0, %v6309_v47  ;;  %5227 = vmatmul.mubr.msk.f32.gmra.mrb[16].mxu0 %vm474_vm0, %v6311_v48 }
  0x7d   : > { %5008 = vmatprep.mubr.msk.f32.mxu1 %vm474_vm0, %v6314_v49  ;;  %5229 = vmatprep.mubr.msk.f32.mxu0 %vm474_vm0, %v6316_v5 }
  0x80   : > { %5009 = vmatmul.mubr.msk.f32.gmra.mrb[4].mxu1 %vm474_vm0, %v6327_v51  ;;  %5230 = vmatmul.mubr.msk.f32.gmra.mrb[18].mxu0 %vm474_vm0, %v6329_v28 }
  0x81   : > { %5011 = vmatprep.mubr.msk.f32.mxu1 %vm474_vm0, %v6331_v52  ;;  %5232 = vmatprep.mubr.msk.f32.mxu0 %vm474_vm0, %v6333_v54 }
  0x84   : > { %5012 = vmatmul.mubr.msk.f32.gmra.mrb[6].mxu1 %vm474_vm0, %v6343_v55  ;;  %5233 = vmatmul.mubr.msk.f32.gmra.mrb[20].mxu0 %vm474_vm0, %v6345_v56 }
  0x85   : > { %5014 = vmatprep.mubr.msk.f32.mxu1 %vm474_vm0, %v6347_v57  ;;  %5235 = vmatprep.mubr.msk.f32.mxu0 %vm474_vm0, %v6349_v58 }
  0x88   : > { %5015 = vmatmul.mubr.msk.f32.gmra.mrb[8].mxu1 %vm474_vm0, %v6359_v59  ;;  %5236 = vmatmul.mubr.msk.f32.gmra.mrb[22].mxu0 %vm474_vm0, %v6361_v60 }
  0x89   : > { %5017 = vmatprep.mubr.msk.f32.mxu1 %vm474_vm0, %v6363_v6  ;;  %5238 = vmatprep.mubr.msk.f32.mxu0 %vm474_vm0, %v6365_v62 }
  0x8c   : > { %5018 = vmatmul.mubr.msk.f32.gmra.mrb[10].mxu1 %vm474_vm0, %v6375_v63  ;;  %5239 = vmatmul.mubr.msk.f32.gmra.mrb[24].mxu0 %vm474_vm0, %v6377_v3 }
  0x8d   : > { %5020 = vmatprep.mubr.msk.f32.mxu1 %vm474_vm0, %v6379_v7  ;;  %5241 = vmatprep.mubr.msk.f32.mxu0 %vm474_vm0, %v6381_v8 }
  0x90   : > { %5021 = vmatmul.mubr.msk.f32.gmra.mrb[12].mxu1 %vm474_vm0, %v6391_v39  ;;  %5242 = vmatmul.mubr.msk.f32.gmra.mrb[26].mxu0 %vm474_vm0, %v6393_v42 }
  0x91   : > { %5023 = vmatprep.mubr.msk.f32.mxu1 %vm474_vm0, %v6395_v37  ;;  %5244 = vmatprep.mubr.msk.f32.mxu0 %vm474_vm0, %v6397_v34 }
  0x94   : > { %5024 = vmatmul.mubr.msk.f32.gmra.mrb[14].mxu1 %vm474_vm0, %v6407_v32  ;;  %5245 = vmatmul.mubr.msk.f32.gmra.mrb[28].mxu0 %vm474_vm0, %v6409_v31 }
  0x95   : > { %5026 = vmatprep.mubr.msk.f32.mxu1 %vm474_vm0, %v6411_v29  ;;  %5247 = vmatprep.mubr.msk.f32.mxu0 %vm474_vm0, %v6413_v26  ;;  %v6439_v26 = vld [vmem:[#allocation2 + $0x147] sm:$0xff] }
  0x98   : > { %5027 = vmatmul.mubr.msk.f32.gmra.mrb[16].mxu1 %vm474_vm0, %v6423_v24  ;;  %5248 = vmatmul.mubr.msk.f32.gmra.mrb[30].mxu0 %vm474_vm0, %v6425_v21  ;;  %v6453_v21 = vld [vmem:[#allocation2 + $0x14f] sm:$0xff] }
  0x99   : > { %5029 = vmatprep.mubr.msk.f32.mxu1 %vm474_vm0, %v6427_v9  ;;  %5252 = vmatprep.mubr.msk.f32.mxu0 %vm474_vm0, %v6314_v49 }
  0x9c   : > { %5030 = vmatmul.mubr.msk.f32.gmra.mrb[18].mxu1 %vm474_vm0, %v6437_v17  ;;  %5253 = vmatmul.mubr.msk.f32.vlgmr.msra.gmra.mrb[0].mxu0 %vm474_vm0, %v6327_v51  ;;  %v6470_v51 = vld [vmem:[#allocation2 + $0x187] sm:$0xff] }
  0x9d   : > { %5301 = vmatpush3.msra.mxu0 %v6186_v13  ;;  %5032 = vmatprep.mubr.msk.f32.mxu1 %vm474_vm0, %v6439_v26  ;;  %v6468_v13 = vld [vmem:[#allocation2 + $0x16f] sm:$0xff] }
  0x9e   : > { %5255 = vmatprep.mubr.msk.f32.mxu0 %vm474_vm0, %v6331_v52  ;;  %5350 = vmatprep.subr.mxu0 %v6444_v14  ;;  %v6482_v52 = vld [vmem:[#allocation2 + $0x1a7] sm:$0xff] }
  0xa0   : > { %5033 = vmatmul.mubr.msk.f32.gmra.mrb[20].mxu1 %vm474_vm0, %v6453_v21  ;;  %5256 = vmatmul.mubr.msk.f32.gmra.mrb[2].mxu0 %vm474_vm0, %v6343_v55  ;;  %v6480_v55 = vld [vmem:[#allocation2 + $0x18f] sm:$0xff] }
  0xa1   : > { %5035 = vmatprep.mubr.msk.f32.mxu1 %vm474_vm0, %v6457_v11  ;;  %5258 = vmatprep.mubr.msk.f32.mxu0 %vm474_vm0, %v6347_v57  ;;  %v6494_v57 = vld [vmem:[#allocation2 + $0x1c7] sm:$0xff] }
  0xa4   : > { %5036 = vmatmul.mubr.msk.f32.gmra.mrb[22].mxu1 %vm474_vm0, %v6468_v13  ;;  %5259 = vmatmul.mubr.msk.f32.gmra.mrb[4].mxu0 %vm474_vm0, %v6359_v59  ;;  %v6492_v59 = vld [vmem:[#allocation2 + $0x1af] sm:$0xff] }
  0xa5   : > { %5038 = vmatprep.mubr.msk.f32.mxu1 %vm474_vm0, %v6470_v51  ;;  %5261 = vmatprep.mubr.msk.f32.mxu0 %vm474_vm0, %v6363_v6  ;;  %v6506_v6 = vld [vmem:[#allocation2 + $0x1e7] sm:$0xff] }
  0xa8   : > { %5039 = vmatmul.mubr.msk.f32.gmra.mrb[24].mxu1 %vm474_vm0, %v6480_v55  ;;  %5262 = vmatmul.mubr.msk.f32.gmra.mrb[6].mxu0 %vm474_vm0, %v6375_v63  ;;  %v6504_v63 = vld [vmem:[#allocation2 + $0x1cf] sm:$0xff] }
  0xa9   : > { %5041 = vmatprep.mubr.msk.f32.mxu1 %vm474_vm0, %v6482_v52  ;;  %5264 = vmatprep.mubr.msk.f32.mxu0 %vm474_vm0, %v6379_v7  ;;  %v1290_v7 = vld [vmem:[#allocation2 + $0x9] sm:$0xff] }
  0xac   : > { %5042 = vmatmul.mubr.msk.f32.gmra.mrb[26].mxu1 %vm474_vm0, %v6492_v59  ;;  %5265 = vmatmul.mubr.msk.f32.gmra.mrb[8].mxu0 %vm474_vm0, %v6391_v39  ;;  %v6516_v39 = vld [vmem:[#allocation2 + $0x1ef] sm:$0xff] }
  0xad   : > { %5044 = vmatprep.mubr.msk.f32.mxu1 %vm474_vm0, %v6494_v57  ;;  %5267 = vmatprep.mubr.msk.f32.mxu0 %vm474_vm0, %v6395_v37  ;;  %7275 = vst [vmem:[#allocation29_spill] sm:$0xff] %v6516_v39 }
  0xb0   : > { %5045 = vmatmul.mubr.msk.f32.gmra.mrb[28].mxu1 %vm474_vm0, %v6504_v63  ;;  %5268 = vmatmul.mubr.msk.f32.gmra.mrb[10].mxu0 %vm474_vm0, %v6407_v32  ;;  %v1291_v32 = vld [vmem:[#allocation2 + $0x11] sm:$0xff] }
  0xb1   : > { %5047 = vmatprep.mubr.msk.f32.mxu1 %vm474_vm0, %v6506_v6  ;;  %5270 = vmatprep.mubr.msk.f32.mxu0 %vm474_vm0, %v6411_v29 }
  0xb4   : > { %5048 = vmatmul.mubr.msk.f32.gmra.mrb[30].mxu1 %vm474_vm0, %v6516_v39  ;;  %5271 = vmatmul.mubr.msk.f32.gmra.mrb[12].mxu0 %vm474_vm0, %v6423_v24 }
  0xb5   : > { %5052 = vmatprep.mubr.msk.f32.mxu1 %vm474_vm0, %v1290_v7  ;;  %5273 = vmatprep.mubr.msk.f32.mxu0 %vm474_vm0, %v6427_v9  ;;  %v6536_v7 = vld [vmem:[%s7211_s3 + $0x20] sm:$0xff] }
  0xb8   : > { %5053 = vmatmul.mubr.msk.f32.vlgmr.msra.gmra.mrb[0].mxu1 %vm474_vm0, %v1291_v32  ;;  %5274 = vmatmul.mubr.msk.f32.gmra.mrb[14].mxu0 %vm474_vm0, %v6437_v17  ;;  %v2869_v32 = vld [vmem:[#allocation2 + $0x227] sm:$0xff] }
  0xb9   : > { %5055 = vmatprep.mubr.msk.f32.mxu1 %vm474_vm0, %v6160_v2  ;;  %5276 = vmatprep.mubr.msk.f32.mxu0 %vm474_vm0, %v6439_v26  ;;  %v6579_v2 = vld [vmem:[#allocation2 + $0x207] sm:$0xff] }
  0xba   : > { %5101 = vmatpush3.msra.mxu1 %v6303_v46  ;;  %7276 = vst [vmem:[#allocation30_spill] sm:$0xff] %v6579_v2  ;;  %v2870_v46 = vld [vmem:[#allocation2 + $0x22f] sm:$0xff] }
  0xbb   : > { %5400 = vmatprep.subr.mxu1 %v6536_v7 }
  0xbc   : > { %5056 = vmatmul.mubr.msk.f32.gmra.mrb[2].mxu1 %vm474_vm0, %v6177_v10  ;;  %5277 = vmatmul.mubr.msk.f32.gmra.mrb[16].mxu0 %vm474_vm0, %v6453_v21  ;;  %v6589_v10 = vld [vmem:[#allocation2 + $0x20f] sm:$0xff] }
  0xbd   : > { %5058 = vmatprep.mubr.msk.f32.mxu1 %vm474_vm0, %v6181_v12  ;;  %5279 = vmatprep.mubr.msk.f32.mxu0 %vm474_vm0, %v6457_v11 }
  0xc0   : > { %5059 = vmatmul.mubr.msk.f32.gmra.mrb[4].mxu1 %vm474_vm0, %v6197_v16  ;;  %5280 = vmatmul.mubr.msk.f32.gmra.mrb[18].mxu0 %vm474_vm0, %v6468_v13 }
  0xc1   : > { %5061 = vmatprep.mubr.msk.f32.mxu1 %vm474_vm0, %v6203_v19  ;;  %5282 = vmatprep.mubr.msk.f32.mxu0 %vm474_vm0, %v6470_v51 }
  0xc4   : > { %5062 = vmatmul.mubr.msk.f32.gmra.mrb[6].mxu1 %vm474_vm0, %v6216_v20  ;;  %5283 = vmatmul.mubr.msk.f32.gmra.mrb[20].mxu0 %vm474_vm0, %v6480_v55 }
  0xc5   : > { %5064 = vmatprep.mubr.msk.f32.mxu1 %vm474_vm0, %v6220_v23  ;;  %5285 = vmatprep.mubr.msk.f32.mxu0 %vm474_vm0, %v6482_v52 }
  0xc8   : > { %5065 = vmatmul.mubr.msk.f32.gmra.mrb[8].mxu1 %vm474_vm0, %v6232_v25  ;;  %5286 = vmatmul.mubr.msk.f32.gmra.mrb[22].mxu0 %vm474_vm0, %v6492_v59 }
  0xc9   : > { %5067 = vmatprep.mubr.msk.f32.mxu1 %vm474_vm0, %v6236_v27  ;;  %5288 = vmatprep.mubr.msk.f32.mxu0 %vm474_vm0, %v6494_v57 }
  0xcc   : > { %5068 = vmatmul.mubr.msk.f32.gmra.mrb[10].mxu1 %vm474_vm0, %v6248_v30  ;;  %5289 = vmatmul.mubr.msk.f32.gmra.mrb[24].mxu0 %vm474_vm0, %v6504_v63 }
  0xcd   : > { %5070 = vmatprep.mubr.msk.f32.mxu1 %vm474_vm0, %v6252_v4  ;;  %5291 = vmatprep.mubr.msk.f32.mxu0 %vm474_vm0, %v6506_v6 }
  0xd0   : > { %5071 = vmatmul.mubr.msk.f32.gmra.mrb[12].mxu1 %vm474_vm0, %v6264_v33  ;;  %5292 = vmatmul.mubr.msk.f32.gmra.mrb[26].mxu0 %vm474_vm0, %v6516_v39  ;;  %v3226_v39 = vld [vmem:[#allocation2 + $0x48] sm:$0xff] }
  0xd1   : > { %5073 = vmatprep.mubr.msk.f32.mxu1 %vm474_vm0, %v6268_v35  ;;  %5294 = vmatprep.mubr.msk.f32.mxu0 %vm474_vm0, %v6579_v2  ;;  %v3227_v2 = vld [vmem:[#allocation2 + $0x50] sm:$0xff] }
  0xd4   : > { %5074 = vmatmul.mubr.msk.f32.gmra.mrb[14].mxu1 %vm474_vm0, %v6280_v38  ;;  %5295 = vmatmul.mubr.msk.f32.gmra.mrb[28].mxu0 %vm474_vm0, %v6589_v10  ;;  %v3228_v38 = vld [vmem:[#allocation2 + $0x68] sm:$0xff] }
  0xd5   : > { %5076 = vmatprep.mubr.msk.f32.mxu1 %vm474_vm0, %v6282_v41  ;;  %5297 = vmatprep.mubr.msk.f32.mxu0 %vm474_vm0, %v2869_v32  ;;  %v3229_v32 = vld [vmem:[#allocation2 + $0x70] sm:$0xff] }
  0xd8   : > { %5077 = vmatmul.mubr.msk.f32.gmra.mrb[16].mxu1 %vm474_vm0, %v6291_v43  ;;  %5298 = vmatmul.mubr.msk.f32.gmra.mrb[30].mxu0 %vm474_vm0, %v2870_v46  ;;  %v3230_v46 = vld [vmem:[#allocation2 + $0x88] sm:$0xff] }
  0xd9   : > { %5079 = vmatprep.mubr.msk.f32.mxu1 %vm474_vm0, %v6295_v45  ;;  %5302 = vmatprep.mubr.msk.f32.mxu0 %vm474_vm0, %v3226_v39  ;;  %v3231_v39 = vld [vmem:[#allocation2 + $0x90] sm:$0xff] }
  0xdc   : > { %5080 = vmatmul.mubr.msk.f32.gmra.mrb[18].mxu1 %vm474_vm0, %v6311_v48  ;;  %5303 = vmatmul.mubr.msk.f32.vlgmr.msra.gmra.mrb[0].mxu0 %vm474_vm0, %v3227_v2  ;;  %v7293_v2 = vld [vmem:[#allocation12_spill] sm:$0xff] }
  0xdd   : > { %5351 = vmatpush3.msra.mxu0 %v6444_v14  ;;  %5082 = vmatprep.mubr.msk.f32.mxu1 %vm474_vm0, %v6316_v5  ;;  %v7287_v14 = vld [vmem:[#allocation9_spill] sm:$0xff] }
  0xde   : > { %5305 = vmatprep.mubr.msk.f32.mxu0 %vm474_vm0, %v3228_v38  ;;  %v7288_v38 = vld [vmem:[#allocation22_spill] sm:$0xff] }
  0xe0   : > { %5083 = vmatmul.mubr.msk.f32.gmra.mrb[20].mxu1 %vm474_vm0, %v6329_v28  ;;  %5306 = vmatmul.mubr.msk.f32.gmra.mrb[2].mxu0 %vm474_vm0, %v3229_v32  ;;  %v7294_v32 = vld [vmem:[#allocation25_spill] sm:$0xff] }
  0xe1   : > { %5085 = vmatprep.mubr.msk.f32.mxu1 %vm474_vm0, %v6333_v54  ;;  %5308 = vmatprep.mubr.msk.f32.mxu0 %vm474_vm0, %v3230_v46  ;;  %v7295_v46 = vld [vmem:[#allocation13_spill] sm:$0xff] }
  0xe4   : > { %5086 = vmatmul.mubr.msk.f32.gmra.mrb[22].mxu1 %vm474_vm0, %v6345_v56  ;;  %5309 = vmatmul.mubr.msk.f32.gmra.mrb[4].mxu0 %vm474_vm0, %v3231_v39  ;;  %v7296_v39 = vld [vmem:[#allocation14_spill] sm:$0xff] }
  0xe5   : > { %5088 = vmatprep.mubr.msk.f32.mxu1 %vm474_vm0, %v6349_v58  ;;  %5311 = vmatprep.mubr.msk.f32.mxu0 %vm474_vm0, %v6058_v0  ;;  %v7277_v0 = vld [vmem:[#allocation4_spill] sm:$0xff] }
  0xe8   : > { %5089 = vmatmul.mubr.msk.f32.gmra.mrb[24].mxu1 %vm474_vm0, %v6361_v60  ;;  %5312 = vmatmul.mubr.msk.f32.gmra.mrb[6].mxu0 %vm474_vm0, %v6076_v15  ;;  %v7278_v15 = vld [vmem:[#allocation17_spill] sm:$0xff] }
  0xe9   : > { %5091 = vmatprep.mubr.msk.f32.mxu1 %vm474_vm0, %v6365_v62  ;;  %5314 = vmatprep.mubr.msk.f32.mxu0 %vm474_vm0, %v6082_v22  ;;  %v7279_v22 = vld [vmem:[#allocation5_spill] sm:$0xff] }
  0xec   : > { %5092 = vmatmul.mubr.msk.f32.gmra.mrb[26].mxu1 %vm474_vm0, %v6377_v3  ;;  %5315 = vmatmul.mubr.msk.f32.gmra.mrb[8].mxu0 %vm474_vm0, %v6105_v36  ;;  %v7280_v36 = vld [vmem:[#allocation18_spill] sm:$0xff] }
  0xed   : > { %5094 = vmatprep.mubr.msk.f32.mxu1 %vm474_vm0, %v6381_v8  ;;  %5317 = vmatprep.mubr.msk.f32.mxu0 %vm474_vm0, %v6111_v40  ;;  %v7281_v40 = vld [vmem:[#allocation6_spill] sm:$0xff] }
  0xf0   : > { %5095 = vmatmul.mubr.msk.f32.gmra.mrb[28].mxu1 %vm474_vm0, %v6393_v42  ;;  %5318 = vmatmul.mubr.msk.f32.gmra.mrb[10].mxu0 %vm474_vm0, %v6132_v50  ;;  %v7282_v50 = vld [vmem:[#allocation19_spill] sm:$0xff] }
  0xf1   : > { %5097 = vmatprep.mubr.msk.f32.mxu1 %vm474_vm0, %v6397_v34  ;;  %5320 = vmatprep.mubr.msk.f32.mxu0 %vm474_vm0, %v6137_v53  ;;  %v7283_v53 = vld [vmem:[#allocation7_spill] sm:$0xff] }
  0xf4   : > { %5098 = vmatmul.mubr.msk.f32.gmra.mrb[30].mxu1 %vm474_vm0, %v6409_v31  ;;  %5321 = vmatmul.mubr.msk.f32.gmra.mrb[12].mxu0 %vm474_vm0, %v6155_v61  ;;  %v7284_v61 = vld [vmem:[#allocation20_spill] sm:$0xff] }
  0xf5   : > { %5102 = vmatprep.mubr.msk.f32.mxu1 %vm474_vm0, %v6293_v44  ;;  %5323 = vmatprep.mubr.msk.f32.mxu0 %vm474_vm0, %v6158_v1  ;;  %v7285_v1 = vld [vmem:[#allocation8_spill] sm:$0xff]  ;;  %v7289_v44 = vld [vmem:[#allocation10_spill] sm:$0xff] }
  0xf8   : > { %5103 = vmatmul.mubr.msk.f32.vlgmr.msra.gmra.mrb[0].mxu1 %vm474_vm0, %v6309_v47  ;;  %5324 = vmatmul.mubr.msk.f32.gmra.mrb[14].mxu0 %vm474_vm0, %v6175_v18  ;;  %v7286_v18 = vld [vmem:[#allocation21_spill] sm:$0xff]  ;;  %v7290_v47 = vld [vmem:[#allocation23_spill] sm:$0xff] }
  0xf9   : > { %5105 = vmatprep.mubr.msk.f32.mxu1 %vm474_vm0, %v6314_v49  ;;  %5326 = vmatprep.mubr.msk.f32.mxu0 %vm474_vm0, %v7277_v0  ;;  %v7291_v49 = vld [vmem:[#allocation11_spill] sm:$0xff]  ;;  %v6705_v0 = vld [vmem:[#allocation2 + $0x208] sm:$0xff] }
  0xfa   : > { %5401 = vmatpush3.msra.mxu1 %v6536_v7  ;;  %v7292_v7 = vld [vmem:[#allocation24_spill] sm:$0xff] }
  0xfc   : > { %5106 = vmatmul.mubr.msk.f32.gmra.mrb[2].mxu1 %vm474_vm0, %v7278_v15  ;;  %5327 = vmatmul.mubr.msk.f32.gmra.mrb[16].mxu0 %vm474_vm0, %v7279_v22  ;;  %v7297_v15 = vld [vmem:[#allocation26_spill] sm:$0xff]  ;;  %v7298_v22 = vld [vmem:[#allocation15_spill] sm:$0xff] }
  0xfd   : > { %5108 = vmatprep.mubr.msk.f32.mxu1 %vm474_vm0, %v7280_v36  ;;  %5329 = vmatprep.mubr.msk.f32.mxu0 %vm474_vm0, %v7281_v40  ;;  %v6715_v36 = vld [vmem:[#allocation2 + $0x210] sm:$0xff] }
  0xfe   : > { %v3257_v40 = vld [vmem:[#allocation2 + $0x230] sm:$0xff] }
 0x100   : > { %5109 = vmatmul.mubr.msk.f32.gmra.mrb[4].mxu1 %vm474_vm0, %v7282_v50  ;;  %5330 = vmatmul.mubr.msk.f32.gmra.mrb[18].mxu0 %vm474_vm0, %v7283_v53 }
 0x101   : > { %5111 = vmatprep.mubr.msk.f32.mxu1 %vm474_vm0, %v7284_v61  ;;  %5332 = vmatprep.mubr.msk.f32.mxu0 %vm474_vm0, %v7285_v1 }
 0x104   : > { %5112 = vmatmul.mubr.msk.f32.gmra.mrb[6].mxu1 %vm474_vm0, %v7286_v18  ;;  %5333 = vmatmul.mubr.msk.f32.gmra.mrb[20].mxu0 %vm474_vm0, %v7287_v14 }
 0x105   : > { %5114 = vmatprep.mubr.msk.f32.mxu1 %vm474_vm0, %v7288_v38  ;;  %5335 = vmatprep.mubr.msk.f32.mxu0 %vm474_vm0, %v7289_v44 }
 0x108   : > { %5115 = vmatmul.mubr.msk.f32.gmra.mrb[8].mxu1 %vm474_vm0, %v7290_v47  ;;  %5336 = vmatmul.mubr.msk.f32.gmra.mrb[22].mxu0 %vm474_vm0, %v7291_v49 }
 0x109   : > { %5117 = vmatprep.mubr.msk.f32.mxu1 %vm474_vm0, %v7292_v7  ;;  %5338 = vmatprep.mubr.msk.f32.mxu0 %vm474_vm0, %v7293_v2 }
 0x10c   : > { %5118 = vmatmul.mubr.msk.f32.gmra.mrb[10].mxu1 %vm474_vm0, %v7294_v32  ;;  %5339 = vmatmul.mubr.msk.f32.gmra.mrb[24].mxu0 %vm474_vm0, %v7295_v46 }
 0x10d   : > { %5120 = vmatprep.mubr.msk.f32.mxu1 %vm474_vm0, %v6395_v37  ;;  %5341 = vmatprep.mubr.msk.f32.mxu0 %vm474_vm0, %v7296_v39  ;;  %v3256_v37 = vld [vmem:[#allocation2 + $0x228] sm:$0xff] }
 0x110   : > { %5121 = vmatmul.mubr.msk.f32.gmra.mrb[12].mxu1 %vm474_vm0, %v7297_v15  ;;  %5342 = vmatmul.mubr.msk.f32.gmra.mrb[26].mxu0 %vm474_vm0, %v7298_v22 }
 0x111   : > { %5123 = vmatprep.mubr.msk.f32.mxu1 %vm474_vm0, %v6411_v29  ;;  %5344 = vmatprep.mubr.msk.f32.mxu0 %vm474_vm0, %v6705_v0  ;;  %v3644_v29 = vld [vmem:[#allocation2 + $0x231] sm:$0xff] }
 0x114   : > { %5124 = vmatmul.mubr.msk.f32.gmra.mrb[14].mxu1 %vm474_vm0, %v6423_v24  ;;  %5345 = vmatmul.mubr.msk.f32.gmra.mrb[28].mxu0 %vm474_vm0, %v6715_v36  ;;  %v2086_v24 = vld [vmem:[#allocation2 + $0x188] sm:$0xff] }
 0x115   : > { %5126 = vmatprep.mubr.msk.f32.mxu1 %vm474_vm0, %v6427_v9  ;;  %5347 = vmatprep.mubr.msk.f32.mxu0 %vm474_vm0, %v3256_v37  ;;  %v2082_v9 = vld [vmem:[#allocation2 + $0x148] sm:$0xff] }
 0x118   : > { %5127 = vmatmul.mubr.msk.f32.gmra.mrb[16].mxu1 %vm474_vm0, %v6437_v17  ;;  %5348 = vmatmul.mubr.msk.f32.gmra.mrb[30].mxu0 %vm474_vm0, %v3257_v40  ;;  %v2080_v17 = vld [vmem:[#allocation2 + $0x128] sm:$0xff] }
 0x119   : > { %5129 = vmatprep.mubr.msk.f32.mxu1 %vm474_vm0, %v6439_v26  ;;  %5352 = vmatprep.mubr.msk.f32.mxu0 %vm474_vm0, %v6181_v12  ;;  %v7300_v12 = vld [vmem:[#allocation16_spill] sm:$0xff]  ;;  %v3643_v26 = vld [vmem:[#allocation2 + $0x229] sm:$0xff] }
 0x11c   : > { %5130 = vmatmul.mubr.msk.f32.gmra.mrb[18].mxu1 %vm474_vm0, %v6453_v21  ;;  %5353 = vmatmul.mubr.msk.f32.vlgmr.msra.gmra.mrb[0].mxu0 %vm474_vm0, %v6197_v16  ;;  %v7301_v16 = vld [vmem:[#allocation30_spill] sm:$0xff]  ;;  %v2084_v21 = vld [vmem:[#allocation2 + $0x168] sm:$0xff] }
 0x11d   : > { %5132 = vmatprep.mubr.msk.f32.mxu1 %vm474_vm0, %v6457_v11  ;;  %5355 = vmatprep.mubr.msk.f32.mxu0 %vm474_vm0, %v6203_v19  ;;  %v7299_v11 = vld [vmem:[#allocation29_spill] sm:$0xff]  ;;  %v2081_v19 = vld [vmem:[#allocation2 + $0x130] sm:$0xff] }
 0x120   : > { %5133 = vmatmul.mubr.msk.f32.gmra.mrb[20].mxu1 %vm474_vm0, %v6468_v13  ;;  %5356 = vmatmul.mubr.msk.f32.gmra.mrb[2].mxu0 %vm474_vm0, %v6216_v20  ;;  %v2083_v20 = vld [vmem:[#allocation2 + $0x150] sm:$0xff] }
 0x121   : > { %5135 = vmatprep.mubr.msk.f32.mxu1 %vm474_vm0, %v6470_v51  ;;  %5358 = vmatprep.mubr.msk.f32.mxu0 %vm474_vm0, %v6220_v23  ;;  %v2085_v23 = vld [vmem:[#allocation2 + $0x170] sm:$0xff] }
 0x124   : > { %5136 = vmatmul.mubr.msk.f32.gmra.mrb[22].mxu1 %vm474_vm0, %v6480_v55  ;;  %5359 = vmatmul.mubr.msk.f32.gmra.mrb[4].mxu0 %vm474_vm0, %v6232_v25  ;;  %v7302_v25 = vld [vmem:[#allocation27_spill] sm:$0xff] }
 0x125   : > { %5138 = vmatprep.mubr.msk.f32.mxu1 %vm474_vm0, %v6482_v52  ;;  %5361 = vmatprep.mubr.msk.f32.mxu0 %vm474_vm0, %v6236_v27  ;;  %v7303_v27 = vld [vmem:[#allocation28_spill] sm:$0xff] }
 0x128   : > { %5139 = vmatmul.mubr.msk.f32.gmra.mrb[24].mxu1 %vm474_vm0, %v6492_v59  ;;  %5362 = vmatmul.mubr.msk.f32.gmra.mrb[6].mxu0 %vm474_vm0, %v6248_v30 }
 0x129   : > { %5141 = vmatprep.mubr.msk.f32.mxu1 %vm474_vm0, %v6494_v57  ;;  %5364 = vmatprep.mubr.msk.f32.mxu0 %vm474_vm0, %v6252_v4 }
 0x12c   : > { %5142 = vmatmul.mubr.msk.f32.gmra.mrb[26].mxu1 %vm474_vm0, %v6504_v63  ;;  %5365 = vmatmul.mubr.msk.f32.gmra.mrb[8].mxu0 %vm474_vm0, %v6264_v33 }
 0x12d   : > { %5144 = vmatprep.mubr.msk.f32.mxu1 %vm474_vm0, %v6506_v6  ;;  %5367 = vmatprep.mubr.msk.f32.mxu0 %vm474_vm0, %v6268_v35 }
 0x130   : > { %5145 = vmatmul.mubr.msk.f32.gmra.mrb[28].mxu1 %vm474_vm0, %v7299_v11  ;;  %5368 = vmatmul.mubr.msk.f32.gmra.mrb[10].mxu0 %vm474_vm0, %v7300_v12 }
 0x131   : > { %5147 = vmatprep.mubr.msk.f32.mxu1 %vm474_vm0, %v7301_v16  ;;  %5370 = vmatprep.mubr.msk.f32.mxu0 %vm474_vm0, %v6282_v41 }
 0x134   : > { %5148 = vmatmul.mubr.msk.f32.gmra.mrb[30].mxu1 %vm474_vm0, %v6589_v10  ;;  %5371 = vmatmul.mubr.msk.f32.gmra.mrb[12].mxu0 %vm474_vm0, %v6291_v43 }
 0x135   : > { %5176 = vmatprep.mubr.msk.f32.mxu1 %vm474_vm0, %v2080_v17  ;;  %5373 = vmatprep.mubr.msk.f32.mxu0 %vm474_vm0, %v6295_v45 }
 0x138   : > { %5177 = vmatmul.mubr.msk.f32.vlgmr.msra.gmra.mrb[16].mxu1 %vm474_vm0, %v2081_v19  ;;  %5374 = vmatmul.mubr.msk.f32.gmra.mrb[14].mxu0 %vm474_vm0, %v6311_v48 }
 0x139   : > { %5179 = vmatprep.mubr.msk.f32.mxu1 %vm474_vm0, %v2082_v9  ;;  %5376 = vmatprep.mubr.msk.f32.mxu0 %vm474_vm0, %v6316_v5 }
 0x13c   : > { %5180 = vmatmul.mubr.msk.f32.gmra.mrb[18].mxu1 %vm474_vm0, %v2083_v20  ;;  %5377 = vmatmul.mubr.msk.f32.gmra.mrb[16].mxu0 %vm474_vm0, %v6329_v28 }
 0x13d   : > { %5182 = vmatprep.mubr.msk.f32.mxu1 %vm474_vm0, %v2084_v21  ;;  %5379 = vmatprep.mubr.msk.f32.mxu0 %vm474_vm0, %v6333_v54 }
 0x140   : > { %5183 = vmatmul.mubr.msk.f32.gmra.mrb[20].mxu1 %vm474_vm0, %v2085_v23  ;;  %5380 = vmatmul.mubr.msk.f32.gmra.mrb[18].mxu0 %vm474_vm0, %v6345_v56 }
 0x141   : > { %5185 = vmatprep.mubr.msk.f32.mxu1 %vm474_vm0, %v2086_v24  ;;  %5382 = vmatprep.mubr.msk.f32.mxu0 %vm474_vm0, %v6349_v58 }
 0x144   : > { %5186 = vmatmul.mubr.msk.f32.gmra.mrb[22].mxu1 %vm474_vm0, %v7287_v14  ;;  %5383 = vmatmul.mubr.msk.f32.gmra.mrb[20].mxu0 %vm474_vm0, %v6361_v60 }
 0x145   : > { %5188 = vmatprep.mubr.msk.f32.mxu1 %vm474_vm0, %v7289_v44  ;;  %5385 = vmatprep.mubr.msk.f32.mxu0 %vm474_vm0, %v6365_v62 }
 0x148   : > { %5189 = vmatmul.mubr.msk.f32.gmra.mrb[24].mxu1 %vm474_vm0, %v7291_v49  ;;  %5386 = vmatmul.mubr.msk.f32.gmra.mrb[22].mxu0 %vm474_vm0, %v6377_v3 }
 0x149   : > { %5191 = vmatprep.mubr.msk.f32.mxu1 %vm474_vm0, %v7293_v2  ;;  %5388 = vmatprep.mubr.msk.f32.mxu0 %vm474_vm0, %v6381_v8 }
 0x14c   : > { %5192 = vmatmul.mubr.msk.f32.gmra.mrb[26].mxu1 %vm474_vm0, %v7295_v46  ;;  %5389 = vmatmul.mubr.msk.f32.gmra.mrb[24].mxu0 %vm474_vm0, %v6393_v42 }
 0x14d   : > { %5194 = vmatprep.mubr.msk.f32.mxu1 %vm474_vm0, %v7296_v39  ;;  %5391 = vmatprep.mubr.msk.f32.mxu0 %vm474_vm0, %v6397_v34 }
 0x150   : > { %5195 = vmatmul.mubr.msk.f32.gmra.mrb[28].mxu1 %vm474_vm0, %v7298_v22  ;;  %5392 = vmatmul.mubr.msk.f32.gmra.mrb[26].mxu0 %vm474_vm0, %v6409_v31 }
 0x151   : > { %5197 = vmatprep.mubr.msk.f32.mxu1 %vm474_vm0, %v6705_v0  ;;  %5394 = vmatprep.mubr.msk.f32.mxu0 %vm474_vm0, %v7302_v25 }
 0x154   : > { %5198 = vmatmul.mubr.msk.f32.gmra.mrb[30].mxu1 %vm474_vm0, %v6715_v36  ;;  %5395 = vmatmul.mubr.msk.f32.gmra.mrb[28].mxu0 %vm474_vm0, %v7303_v27 }
 0x155   : > { %5397 = vmatprep.mubr.msk.f32.mxu0 %vm474_vm0, %v3643_v26 }
 0x158   : > { %5398 = vmatmul.mubr.msk.f32.gmra.mrb[30].mxu0 %vm474_vm0, %v3644_v29 }
 0x1cb   : > { %v5104_v30 = vpop.f32.mrb[0].mxu1 }
 0x1cc   : > { %v1873_v31 = vpop.f32.mrb[1].mxu1 }
 0x1cf   : > { %v5107_v4 = vpop.f32.mrb[2].mxu1 }
 0x1d0   : > { %v1883_v33 = vpop.f32.mrb[3].mxu1 }
 0x1d3   : > { %v5110_v34 = vpop.f32.mrb[4].mxu1 }
 0x1d4   : > { %v1893_v35 = vpop.f32.mrb[5].mxu1 }
 0x1d7   : > { %v5113_v41 = vpop.f32.mrb[6].mxu1 }
 0x1d8   : > { %v1903_v43 = vpop.f32.mrb[7].mxu1 }
 0x1db   : > { %v5116_v45 = vpop.f32.mrb[8].mxu1 }
 0x1dc   : > { %v1913_v48 = vpop.f32.mrb[9].mxu1 }
 0x1df   : > { %v5119_v5 = vpop.f32.mrb[10].mxu1 }
 0x1e0   : > { %v1923_v51 = vpop.f32.mrb[11].mxu1 }
 0x1e3   : > { %v6842_v28 = vpop.f32.mrb[12].mxu1 }
 0x1e4   : > { %v6844_v52 = vpop.f32.mrb[13].mxu1 }
 0x1e7   : > { %v6846_v54 = vpop.f32.mrb[14].mxu1 }
 0x1e8   : > { %v6848_v55 = vpop.f32.mrb[15].mxu1 }
 0x1ef   : > { %v5354_v56 = vpop.f32.mrb[0].mxu0 }
 0x1f0   : > { %v6857_v57 = vadd.f32 %v5354_v56, %v5104_v30  ;;  %v3809_v58 = vpop.f32.mrb[1].mxu0 }
 0x1f1   : > { %v6859_v59 = vadd.f32 %v3809_v58, %v1873_v31 }
 0x1f2   : > { %4001 = vst.msk [vmem:[%s6855_s9 + $0x8] sm:$0xff] %vm474_vm0, %v6857_v57  ;;  %v4033_v60 = vsel %vm474_vm0, %v6857_v57, 0.0 }
 0x1f3   : > { %4000 = vst.msk [vmem:[%s6855_s9] sm:$0xff] %vm474_vm0, %v6859_v59  ;;  %v4032_v6 = vsel %vm474_vm0, %v6859_v59, 0.0  ;;  %v5357_v62 = vpop.f32.mrb[2].mxu0 }
 0x1f4   : > { %v6871_v63 = vadd.f32 %v5357_v62, %v5107_v4  ;;  %v3819_v3 = vpop.f32.mrb[3].mxu0  ;;  %v4034_v42 = vadd.f32 %v4033_v60, %v4032_v6 }
 0x1f5   : > { %v6873_v8 = vadd.f32 %v3819_v3, %v1883_v33 }
 0x1f6   : > { %4003 = vst.msk [vmem:[%s6855_s9 + $0x18] sm:$0xff] %vm474_vm0, %v6871_v63  ;;  %v4037_v1 = vsel %vm474_vm0, %v6871_v63, 0.0 }
 0x1f7   : > { %4002 = vst.msk [vmem:[%s6855_s9 + $0x10] sm:$0xff] %vm474_vm0, %v6873_v8  ;;  %v4035_v13 = vsel %vm474_vm0, %v6873_v8, 0.0  ;;  %v5360_v10 = vpop.f32.mrb[4].mxu0 }
 0x1f8   : > { %v4036_v50 = vadd.f32 %v4035_v13, %v4034_v42  ;;  %v6883_v53 = vadd.f32 %v5360_v10, %v5110_v34  ;;  %v3829_v61 = vpop.f32.mrb[5].mxu0 }
 0x1f9   : > { %v6887_v18 = vadd.f32 %v3829_v61, %v1893_v35 }
 0x1fa   : > { %4005 = vst.msk [vmem:[%s6855_s9 + $0x28] sm:$0xff] %vm474_vm0, %v6883_v53  ;;  %v4038_v14 = vadd.f32 %v4037_v1, %v4036_v50  ;;  %v4041_v2 = vsel %vm474_vm0, %v6883_v53, 0.0 }
 0x1fb   : > { %4004 = vst.msk [vmem:[%s6855_s9 + $0x20] sm:$0xff] %vm474_vm0, %v6887_v18  ;;  %v4039_v38 = vsel %vm474_vm0, %v6887_v18, 0.0  ;;  %v5363_v44 = vpop.f32.mrb[6].mxu0 }
 0x1fc   : > { %v4040_v47 = vadd.f32 %v4039_v38, %v4038_v14  ;;  %v6897_v49 = vadd.f32 %v5363_v44, %v5113_v41  ;;  %v3839_v7 = vpop.f32.mrb[7].mxu0 }
 0x1fd   : > { %v6901_v32 = vadd.f32 %v3839_v7, %v1903_v43 }
 0x1fe   : > { %4007 = vst.msk [vmem:[%s6855_s9 + $0x38] sm:$0xff] %vm474_vm0, %v6897_v49  ;;  %v4042_v46 = vadd.f32 %v4041_v2, %v4040_v47  ;;  %v4045_v37 = vsel %vm474_vm0, %v6897_v49, 0.0 }
 0x1ff   : > { %4006 = vst.msk [vmem:[%s6855_s9 + $0x30] sm:$0xff] %vm474_vm0, %v6901_v32  ;;  %v4043_v39 = vsel %vm474_vm0, %v6901_v32, 0.0  ;;  %v5366_v0 = vpop.f32.mrb[8].mxu0 }
 0x200   : > { %v4044_v15 = vadd.f32 %v4043_v39, %v4042_v46  ;;  %v6911_v22 = vadd.f32 %v5366_v0, %v5116_v45  ;;  %v3849_v36 = vpop.f32.mrb[9].mxu0 }
 0x201   : > { %v6915_v40 = vadd.f32 %v3849_v36, %v1913_v48 }
 0x202   : > { %4009 = vst.msk [vmem:[%s6855_s9 + $0x48] sm:$0xff] %vm474_vm0, %v6911_v22  ;;  %v4046_v11 = vadd.f32 %v4045_v37, %v4044_v15  ;;  %v4049_v20 = vsel %vm474_vm0, %v6911_v22, 0.0 }
 0x203   : > { %4008 = vst.msk [vmem:[%s6855_s9 + $0x40] sm:$0xff] %vm474_vm0, %v6915_v40  ;;  %v4047_v12 = vsel %vm474_vm0, %v6915_v40, 0.0  ;;  %v5369_v16 = vpop.f32.mrb[10].mxu0 }
 0x204   : > { %v4048_v17 = vadd.f32 %v4047_v12, %v4046_v11  ;;  %v6925_v19 = vadd.f32 %v5369_v16, %v5119_v5  ;;  %v3859_v9 = vpop.f32.mrb[11].mxu0 }
 0x205   : > { %v6929_v21 = vadd.f32 %v3859_v9, %v1923_v51 }
 0x206   : > { %4011 = vst.msk [vmem:[%s6855_s9 + $0x58] sm:$0xff] %vm474_vm0, %v6925_v19  ;;  %v4050_v23 = vadd.f32 %v4049_v20, %v4048_v17  ;;  %v4053_v30 = vsel %vm474_vm0, %v6925_v19, 0.0 }
 0x207   : > { %4010 = vst.msk [vmem:[%s6855_s9 + $0x50] sm:$0xff] %vm474_vm0, %v6929_v21  ;;  %v4051_v24 = vsel %vm474_vm0, %v6929_v21, 0.0  ;;  %v5372_v25 = vpop.f32.mrb[12].mxu0 }
 0x208   : > { %v4052_v26 = vadd.f32 %v4051_v24, %v4050_v23  ;;  %v6940_v27 = vadd.f32 %v5372_v25, %v6842_v28  ;;  %v3869_v29 = vpop.f32.mrb[13].mxu0 }
 0x209   : > { %v6945_v31 = vadd.f32 %v3869_v29, %v6844_v52 }
 0x20a   : > { %4013 = vst.msk [vmem:[%s6855_s9 + $0x68] sm:$0xff] %vm474_vm0, %v6940_v27  ;;  %v4054_v4 = vadd.f32 %v4053_v30, %v4052_v26  ;;  %v4057_v5 = vsel %vm474_vm0, %v6940_v27, 0.0 }
 0x20b   : > { %4012 = vst.msk [vmem:[%s6855_s9 + $0x60] sm:$0xff] %vm474_vm0, %v6945_v31  ;;  %v4055_v33 = vsel %vm474_vm0, %v6945_v31, 0.0  ;;  %v5178_v34 = vpop.f32.mrb[16].mxu1  ;;  %v5375_v35 = vpop.f32.mrb[14].mxu0 }
 0x20c   : > { %v4056_v41 = vadd.f32 %v4055_v33, %v4054_v4  ;;  %v6956_v43 = vadd.f32 %v5375_v35, %v6846_v54  ;;  %v2340_v45 = vpop.f32.mrb[17].mxu1  ;;  %v3879_v48 = vpop.f32.mrb[15].mxu0 }
 0x20d   : > { %v6961_v51 = vadd.f32 %v3879_v48, %v6848_v55 }
 0x20e   : > { %4015 = vst.msk [vmem:[%s6855_s9 + $0x78] sm:$0xff] %vm474_vm0, %v6956_v43  ;;  %v4058_v28 = vadd.f32 %v4057_v5, %v4056_v41  ;;  %v4061_v55 = vsel %vm474_vm0, %v6956_v43, 0.0 }
 0x20f   : > { %4014 = vst.msk [vmem:[%s6855_s9 + $0x70] sm:$0xff] %vm474_vm0, %v6961_v51  ;;  %v4059_v52 = vsel %vm474_vm0, %v6961_v51, 0.0  ;;  %v5181_v54 = vpop.f32.mrb[18].mxu1  ;;  %v5378_v56 = vpop.f32.mrb[16].mxu0 }
 0x210   : > { %v4060_v58 = vadd.f32 %v4059_v52, %v4058_v28  ;;  %v6971_v60 = vadd.f32 %v5378_v56, %v5178_v34  ;;  %v2350_v6 = vpop.f32.mrb[19].mxu1  ;;  %v3889_v62 = vpop.f32.mrb[17].mxu0 }
 0x211   : > { %v6975_v3 = vadd.f32 %v3889_v62, %v2340_v45 }
 0x212   : > { %4017 = vst.msk [vmem:[%s6855_s9 + $0x88] sm:$0xff] %vm474_vm0, %v6971_v60  ;;  %v4062_v42 = vadd.f32 %v4061_v55, %v4060_v58  ;;  %v4065_v44 = vsel %vm474_vm0, %v6971_v60, 0.0 }
 0x213   : > { %4016 = vst.msk [vmem:[%s6855_s9 + $0x80] sm:$0xff] %vm474_vm0, %v6975_v3  ;;  %v4063_v13 = vsel %vm474_vm0, %v6975_v3, 0.0  ;;  %v5184_v10 = vpop.f32.mrb[20].mxu1  ;;  %v5381_v50 = vpop.f32.mrb[18].mxu0 }
 0x214   : > { %v4064_v61 = vadd.f32 %v4063_v13, %v4062_v42  ;;  %v6985_v1 = vadd.f32 %v5381_v50, %v5181_v54  ;;  %v2360_v14 = vpop.f32.mrb[21].mxu1  ;;  %v3899_v38 = vpop.f32.mrb[19].mxu0 }
 0x215   : > { %v6989_v47 = vadd.f32 %v3899_v38, %v2350_v6 }
 0x216   : > { %4019 = vst.msk [vmem:[%s6855_s9 + $0x98] sm:$0xff] %vm474_vm0, %v6985_v1  ;;  %v4066_v7 = vadd.f32 %v4065_v44, %v4064_v61  ;;  %v4069_v11 = vsel %vm474_vm0, %v6985_v1, 0.0 }
 0x217   : > { %4018 = vst.msk [vmem:[%s6855_s9 + $0x90] sm:$0xff] %vm474_vm0, %v6989_v47  ;;  %v4067_v2 = vsel %vm474_vm0, %v6989_v47, 0.0  ;;  %v5187_v46 = vpop.f32.mrb[22].mxu1  ;;  %v5384_v39 = vpop.f32.mrb[20].mxu0 }
 0x218   : > { %v4068_v0 = vadd.f32 %v4067_v2, %v4066_v7  ;;  %v6999_v15 = vadd.f32 %v5384_v39, %v5184_v10  ;;  %v2370_v36 = vpop.f32.mrb[23].mxu1  ;;  %v3909_v37 = vpop.f32.mrb[21].mxu0 }
 0x219   : > { %v7003_v12 = vadd.f32 %v3909_v37, %v2360_v14 }
 0x21a   : > { %4021 = vst.msk [vmem:[%s6855_s9 + $0xa8] sm:$0xff] %vm474_vm0, %v6999_v15  ;;  %v4070_v16 = vadd.f32 %v4069_v11, %v4068_v0  ;;  %v4073_v29 = vsel %vm474_vm0, %v6999_v15, 0.0 }
 0x21b   : > { %4020 = vst.msk [vmem:[%s6855_s9 + $0xa0] sm:$0xff] %vm474_vm0, %v7003_v12  ;;  %v4071_v17 = vsel %vm474_vm0, %v7003_v12, 0.0  ;;  %v5190_v9 = vpop.f32.mrb[24].mxu1  ;;  %v5387_v20 = vpop.f32.mrb[22].mxu0 }
 0x21c   : > { %v4072_v23 = vadd.f32 %v4071_v17, %v4070_v16  ;;  %v7013_v24 = vadd.f32 %v5387_v20, %v5187_v46  ;;  %v2380_v25 = vpop.f32.mrb[25].mxu1  ;;  %v3919_v26 = vpop.f32.mrb[23].mxu0 }
 0x21d   : > { %v7017_v30 = vadd.f32 %v3919_v26, %v2370_v36 }
 0x21e   : > { %4023 = vst.msk [vmem:[%s6855_s9 + $0xb8] sm:$0xff] %vm474_vm0, %v7013_v24  ;;  %v4074_v4 = vadd.f32 %v4073_v29, %v4072_v23  ;;  %v4077_v28 = vsel %vm474_vm0, %v7013_v24, 0.0 }
 0x21f   : > { %4022 = vst.msk [vmem:[%s6855_s9 + $0xb0] sm:$0xff] %vm474_vm0, %v7017_v30  ;;  %v4075_v33 = vsel %vm474_vm0, %v7017_v30, 0.0  ;;  %v5193_v34 = vpop.f32.mrb[26].mxu1  ;;  %v5390_v35 = vpop.f32.mrb[24].mxu0 }
 0x220   : > { %v4076_v41 = vadd.f32 %v4075_v33, %v4074_v4  ;;  %v7027_v45 = vadd.f32 %v5390_v35, %v5190_v9  ;;  %v2390_v48 = vpop.f32.mrb[27].mxu1  ;;  %v3929_v5 = vpop.f32.mrb[25].mxu0 }
 0x221   : > { %v7031_v52 = vadd.f32 %v3929_v5, %v2380_v25 }
 0x222   : > { %4025 = vst.msk [vmem:[%s6855_s9 + $0xc8] sm:$0xff] %vm474_vm0, %v7027_v45  ;;  %v4078_v54 = vadd.f32 %v4077_v28, %v4076_v41  ;;  %v4081_v10 = vsel %vm474_vm0, %v7027_v45, 0.0 }
 0x223   : > { %4024 = vst.msk [vmem:[%s6855_s9 + $0xc0] sm:$0xff] %vm474_vm0, %v7031_v52  ;;  %v4079_v56 = vsel %vm474_vm0, %v7031_v52, 0.0  ;;  %v5196_v58 = vpop.f32.mrb[28].mxu1  ;;  %v5393_v6 = vpop.f32.mrb[26].mxu0 }
 0x224   : > { %v4080_v62 = vadd.f32 %v4079_v56, %v4078_v54  ;;  %v5428_v55 = vadd.f32 %v5393_v6, %v5193_v34  ;;  %v2400_v42 = vpop.f32.mrb[29].mxu1  ;;  %v3939_v13 = vpop.f32.mrb[27].mxu0 }
 0x225   : > { %v5429_v50 = vadd.f32 %v3939_v13, %v2390_v48 }
 0x226   : > { %4027 = vst.msk [vmem:[%s6855_s9 + $0xd8] sm:$0xff] %vm474_vm0, %v5428_v55  ;;  %v4082_v61 = vadd.f32 %v4081_v10, %v4080_v62  ;;  %v4085_v0 = vsel %vm474_vm0, %v5428_v55, 0.0 }
 0x227   : > { %4026 = vst.msk [vmem:[%s6855_s9 + $0xd0] sm:$0xff] %vm474_vm0, %v5429_v50  ;;  %v4083_v14 = vsel %vm474_vm0, %v5429_v50, 0.0  ;;  %v5199_v38 = vpop.f32.mrb[30].mxu1  ;;  %v5396_v44 = vpop.f32.mrb[28].mxu0 }
 0x228   : > { %v4084_v7 = vadd.f32 %v4083_v14, %v4082_v61  ;;  %v5430_v2 = vadd.f32 %v5396_v44, %v5196_v58  ;;  %v2410_v46 = vpop.f32.mrb[31].mxu1  ;;  %v3949_v39 = vpop.f32.mrb[29].mxu0 }
 0x229   : > { %v5431_v36 = vadd.f32 %v3949_v39, %v2400_v42 }
 0x22a   : > { %4029 = vst.msk [vmem:[%s6855_s9 + $0xe8] sm:$0xff] %vm474_vm0, %v5430_v2  ;;  %v4086_v37 = vadd.f32 %v4085_v0, %v4084_v7  ;;  %v4089_v23 = vsel %vm474_vm0, %v5430_v2, 0.0 }
 0x22b   : > { %4028 = vst.msk [vmem:[%s6855_s9 + $0xe0] sm:$0xff] %vm474_vm0, %v5431_v36  ;;  %v4087_v11 = vsel %vm474_vm0, %v5431_v36, 0.0  ;;  %v5399_v16 = vpop.f32.mrb[30].mxu0 }
 0x22c   : > { %v4088_v17 = vadd.f32 %v4087_v11, %v4086_v37  ;;  %v5432_v9 = vadd.f32 %v5399_v16, %v5199_v38  ;;  %v3959_v20 = vpop.f32.mrb[31].mxu0 }
 0x22d   : > { %v5433_v25 = vadd.f32 %v3959_v20, %v2410_v46 }
 0x22e   : > { %4031 = vst.msk [vmem:[%s6855_s9 + $0xf8] sm:$0xff] %vm474_vm0, %v5432_v9  ;;  %v4090_v26 = vadd.f32 %v4089_v23, %v4088_v17  ;;  %v4093_v33 = vsel %vm474_vm0, %v5432_v9, 0.0 }
 0x22f   : > { %4030 = vst.msk [vmem:[%s6855_s9 + $0xf0] sm:$0xff] %vm474_vm0, %v5433_v25  ;;  %v4091_v29 = vsel %vm474_vm0, %v5433_v25, 0.0 }
 0x230   : > { %v4092_v4 = vadd.f32 %v4091_v29, %v4090_v26 }
 0x232   : > { %v4094_v34 = vadd.f32 %v4093_v33, %v4092_v4 }
 0x234   : > { %v4095_v35 = vrot.slane %v4094_v34, 4 }
 0x236   : > { %v4096_v41 = vadd.f32 %v4095_v35, %v4094_v34 }
 0x238   : > { %v4097_v48 = vrot.slane %v4096_v41, 2 }
 0x23a   : > { %v4098_v5 = vadd.f32 %v4097_v48, %v4096_v41 }
 0x23c   : > { %v4099_v28 = vrot.slane %v4098_v5, 1 }
 0x23e   : > { %v4100_v54 = vadd.f32 %v4099_v28, %v4098_v5 }
 0x240   : > { %v4101_v56 = vmul.f32 0.00390625, %v4100_v54  ;;  %4235 = vst.msk [vmem:[%s266_s12] sm:$0x1] %vm478_vm1, %v4100_v54 }
 0x242   : > { %v4112_v58 = vsub.f32 %v6929_v21, %v4101_v56  ;;  %v4113_v6 = vsub.f32 %v6925_v19, %v4101_v56  ;;  %v4114_v62 = vsub.f32 %v6945_v31, %v4101_v56  ;;  %v7070_v42 = vsub.f32 %v6940_v27, %v4101_v56 }
 0x243   : > { %v7073_v13 = vsub.f32 %v6961_v51, %v4101_v56  ;;  %v7076_v10 = vsub.f32 %v6956_v43, %v4101_v56  ;;  %v7079_v61 = vsub.f32 %v6975_v3, %v4101_v56  ;;  %v7082_v14 = vsub.f32 %v6971_v60, %v4101_v56 }
 0x244   : > { %v7085_v21 = vsub.f32 %v6989_v47, %v4101_v56  ;;  %v7088_v19 = vsub.f32 %v6985_v1, %v4101_v56  ;;  %v7091_v27 = vsub.f32 %v7003_v12, %v4101_v56  ;;  %v7094_v31 = vsub.f32 %v6999_v15, %v4101_v56 }
 0x245   : > { %v7097_v43 = vsub.f32 %v7017_v30, %v4101_v56  ;;  %v7100_v51 = vsub.f32 %v7013_v24, %v4101_v56  ;;  %v7103_v60 = vsub.f32 %v7031_v52, %v4101_v56  ;;  %v7106_v3 = vsub.f32 %v7027_v45, %v4101_v56 }
 0x246   : > { %v7108_v1 = vsub.f32 %v5429_v50, %v4101_v56  ;;  %v7110_v47 = vsub.f32 %v5428_v55, %v4101_v56  ;;  %v7112_v12 = vsub.f32 %v5431_v36, %v4101_v56  ;;  %v7114_v15 = vsub.f32 %v5430_v2, %v4101_v56 }
 0x247   : > { %v7116_v38 = vsub.f32 %v5433_v25, %v4101_v56  ;;  %v7118_v30 = vsub.f32 %v5432_v9, %v4101_v56  ;;  %v4102_v24 = vsub.f32 %v6859_v59, %v4101_v56  ;;  %v4103_v52 = vsub.f32 %v6857_v57, %v4101_v56 }
 0x248   : > { %v4104_v44 = vsub.f32 %v6873_v8, %v4101_v56  ;;  %v4105_v45 = vsub.f32 %v6871_v63, %v4101_v56  ;;  %v4106_v55 = vsub.f32 %v6887_v18, %v4101_v56  ;;  %v4107_v2 = vsub.f32 %v6883_v53, %v4101_v56 }
 0x249   : > { %v4134_v50 = vmul.f32 %v4102_v24, %v4102_v24  ;;  %v4135_v7 = vmul.f32 %v4103_v52, %v4103_v52  ;;  %v4108_v59 = vsub.f32 %v6901_v32, %v4101_v56  ;;  %v4109_v63 = vsub.f32 %v6897_v49, %v4101_v56 }
 0x24a   : > { %v4136_v46 = vmul.f32 %v4104_v44, %v4104_v44  ;;  %v4137_v39 = vmul.f32 %v4105_v45, %v4105_v45  ;;  %v4138_v57 = vmul.f32 %v4106_v55, %v4106_v55  ;;  %v4139_v16 = vmul.f32 %v4107_v2, %v4107_v2 }
 0x24b   : > { %v4166_v0 = vsel %vm474_vm0, %v4134_v50, 0.0  ;;  %v4167_v36 = vsel %vm474_vm0, %v4135_v7, 0.0  ;;  %v4110_v53 = vsub.f32 %v6915_v40, %v4101_v56  ;;  %v4140_v9 = vmul.f32 %v4108_v59, %v4108_v59 }
 0x24c   : > { %v4168_v37 = vadd.f32 %v4167_v36, %v4166_v0  ;;  %v4169_v8 = vsel %vm474_vm0, %v4136_v46, 0.0  ;;  %v4171_v18 = vsel %vm474_vm0, %v4137_v39, 0.0  ;;  %v4173_v20 = vsel %vm474_vm0, %v4138_v57, 0.0 }
 0x24d   : > { %v4111_v25 = vsub.f32 %v6911_v22, %v4101_v56  ;;  %v4141_v26 = vmul.f32 %v4109_v63, %v4109_v63  ;;  %v4175_v32 = vsel %vm474_vm0, %v4139_v16, 0.0  ;;  %v4142_v4 = vmul.f32 %v4110_v53, %v4110_v53 }
 0x24e   : > { %v4170_v11 = vadd.f32 %v4169_v8, %v4168_v37  ;;  %v4177_v33 = vsel %vm474_vm0, %v4140_v9, 0.0  ;;  %v4144_v48 = vmul.f32 %v4112_v58, %v4112_v58  ;;  %v4145_v28 = vmul.f32 %v4113_v6, %v4113_v6 }
 0x24f   : > { %v4143_v34 = vmul.f32 %v4111_v25, %v4111_v25  ;;  %v4179_v35 = vsel %vm474_vm0, %v4141_v26, 0.0  ;;  %v4181_v40 = vsel %vm474_vm0, %v4142_v4, 0.0  ;;  %v4146_v56 = vmul.f32 %v4114_v62, %v4114_v62 }
 0x250   : > { %v4172_v17 = vadd.f32 %v4171_v18, %v4170_v11  ;;  %v4185_v24 = vsel %vm474_vm0, %v4144_v48, 0.0  ;;  %v4147_v44 = vmul.f32 %v7070_v42, %v7070_v42  ;;  %v4187_v45 = vsel %vm474_vm0, %v4145_v28, 0.0 }
 0x251   : > { %v4183_v54 = vsel %vm474_vm0, %v4143_v34, 0.0  ;;  %v4148_v58 = vmul.f32 %v7073_v13, %v7073_v13  ;;  %v4189_v7 = vsel %vm474_vm0, %v4146_v56, 0.0  ;;  %v4149_v6 = vmul.f32 %v7076_v10, %v7076_v10 }
 0x252   : > { %v4174_v23 = vadd.f32 %v4173_v20, %v4172_v17  ;;  %v4191_v62 = vsel %vm474_vm0, %v4147_v44, 0.0  ;;  %v4150_v2 = vmul.f32 %v7079_v61, %v7079_v61  ;;  %v4151_v0 = vmul.f32 %v7082_v14, %v7082_v14 }
 0x253   : > { %v4193_v42 = vsel %vm474_vm0, %v4148_v58, 0.0  ;;  %v4195_v13 = vsel %vm474_vm0, %v4149_v6, 0.0  ;;  %v4152_v37 = vmul.f32 %v7085_v21, %v7085_v21  ;;  %v4153_v57 = vmul.f32 %v7088_v19, %v7088_v19 }
 0x254   : > { %v4176_v29 = vadd.f32 %v4175_v32, %v4174_v23  ;;  %v4197_v10 = vsel %vm474_vm0, %v4150_v2, 0.0  ;;  %v4199_v61 = vsel %vm474_vm0, %v4151_v0, 0.0  ;;  %v4154_v11 = vmul.f32 %v7091_v27, %v7091_v27 }
 0x255   : > { %v4201_v14 = vsel %vm474_vm0, %v4152_v37, 0.0  ;;  %v4155_v16 = vmul.f32 %v7094_v31, %v7094_v31  ;;  %v4203_v21 = vsel %vm474_vm0, %v4153_v57, 0.0  ;;  %v4156_v17 = vmul.f32 %v7097_v43, %v7097_v43 }
 0x256   : > { %v4178_v49 = vadd.f32 %v4177_v33, %v4176_v29  ;;  %v4205_v19 = vsel %vm474_vm0, %v4154_v11, 0.0  ;;  %v4157_v9 = vmul.f32 %v7100_v51, %v7100_v51  ;;  %v4158_v23 = vmul.f32 %v7103_v60, %v7103_v60 }
 0x257   : > { %v4207_v27 = vsel %vm474_vm0, %v4155_v16, 0.0  ;;  %v4209_v31 = vsel %vm474_vm0, %v4156_v17, 0.0  ;;  %v4159_v26 = vmul.f32 %v7106_v3, %v7106_v3  ;;  %v4160_v29 = vmul.f32 %v7108_v1, %v7108_v1 }
 0x258   : > { %v4180_v41 = vadd.f32 %v4179_v35, %v4178_v49  ;;  %v4211_v43 = vsel %vm474_vm0, %v4157_v9, 0.0  ;;  %v4213_v51 = vsel %vm474_vm0, %v4158_v23, 0.0  ;;  %v4161_v33 = vmul.f32 %v7110_v47, %v7110_v47 }
 0x259   : > { %v4215_v60 = vsel %vm474_vm0, %v4159_v26, 0.0  ;;  %v4162_v34 = vmul.f32 %v7112_v12, %v7112_v12  ;;  %v4217_v3 = vsel %vm474_vm0, %v4160_v29, 0.0  ;;  %v4165_v28 = vmul.f32 %v7118_v30, %v7118_v30 }
 0x25a   : > { %v4182_v5 = vadd.f32 %v4181_v40, %v4180_v41  ;;  %v4163_v41 = vmul.f32 %v7114_v15, %v7114_v15  ;;  %v4219_v1 = vsel %vm474_vm0, %v4161_v33, 0.0  ;;  %v4164_v40 = vmul.f32 %v7116_v38, %v7116_v38 }
 0x25b   : > { %v4221_v47 = vsel %vm474_vm0, %v4162_v34, 0.0  ;;  %v4227_v15 = vsel %vm474_vm0, %v4165_v28, 0.0 }
 0x25c   : > { %v4184_v22 = vadd.f32 %v4183_v54, %v4182_v5  ;;  %v4223_v12 = vsel %vm474_vm0, %v4163_v41, 0.0 }
 0x25e   : > { %v4186_v52 = vadd.f32 %v4185_v24, %v4184_v22  ;;  %v4225_v22 = vsel %vm474_vm0, %v4164_v40, 0.0 }
 0x260   : > { %v4188_v50 = vadd.f32 %v4187_v45, %v4186_v52 }
 0x262   : > { %v4190_v55 = vadd.f32 %v4189_v7, %v4188_v50 }
 0x264   : > { %v4192_v46 = vadd.f32 %v4191_v62, %v4190_v55 }
 0x266   : > { %v4194_v39 = vadd.f32 %v4193_v42, %v4192_v46 }
 0x268   : > { %v4196_v36 = vadd.f32 %v4195_v13, %v4194_v39 }
 0x26a   : > { %v4198_v59 = vadd.f32 %v4197_v10, %v4196_v36 }
 0x26c   : > { %v4200_v8 = vadd.f32 %v4199_v61, %v4198_v59 }
 0x26e   : > { %v4202_v63 = vadd.f32 %v4201_v14, %v4200_v8 }
 0x270   : > { %v4204_v18 = vadd.f32 %v4203_v21, %v4202_v63 }
 0x272   : > { %v4206_v53 = vadd.f32 %v4205_v19, %v4204_v18 }
 0x274   : > { %v4208_v20 = vadd.f32 %v4207_v27, %v4206_v53 }
 0x276   : > { %v4210_v25 = vadd.f32 %v4209_v31, %v4208_v20 }
 0x278   : > { %v4212_v32 = vadd.f32 %v4211_v43, %v4210_v25 }
 0x27a   : > { %v4214_v4 = vadd.f32 %v4213_v51, %v4212_v32 }
 0x27c   : > { %v4216_v49 = vadd.f32 %v4215_v60, %v4214_v4 }
 0x27e   : > { %v4218_v35 = vadd.f32 %v4217_v3, %v4216_v49 }
 0x280   : > { %v4220_v48 = vadd.f32 %v4219_v1, %v4218_v35 }
 0x282   : > { %v4222_v5 = vadd.f32 %v4221_v47, %v4220_v48 }
 0x284   : > { %v4224_v54 = vadd.f32 %v4223_v12, %v4222_v5 }
 0x286   : > { %v4226_v56 = vadd.f32 %v4225_v22, %v4224_v54 }
 0x288   : > { %v4228_v24 = vadd.f32 %v4227_v15, %v4226_v56 }
 0x28a   : > { %v4229_v52 = vrot.slane %v4228_v24, 4 }
 0x28c   : > { %v4230_v44 = vadd.f32 %v4229_v52, %v4228_v24 }
 0x28e   : > { %v4231_v45 = vrot.slane %v4230_v44, 2 }
 0x290   : > { %v4232_v50 = vadd.f32 %v4231_v45, %v4230_v44 }
 0x292   : > { %v4233_v38 = vrot.slane %v4232_v50, 1 }
 0x294   : > { %v4234_v58 = vadd.f32 %v4233_v38, %v4232_v50 }
 0x296   : > { %4236 = vst.msk [vmem:[%s269_s15] sm:$0x1] %vm478_vm1, %v4234_v58 }
 0x297 PF: > { %s18_s23 = sadd.s32 1, %s5674_s23  }
 0x298   : > { %p15_p4 = scmp.ge.s32.totalorder %s18_s23, 4  }
 0x29a   :  { %17 = sbr.rel (!%p15_p4) target bundleno = 2 (0x2), region = 100 }

// kernel: conv_block_nd_forward.3
= control target key start
LH: loop header
LB: loop body
LE: loop exit
PB: predicated region body
PF: predicated region fallthrough
CT: control target
= control target key end

     0   :  { %s5511_s15 = smov 0   ;;  %s6942_s0 = inlined_call_operand.vmem [shape: f32[2,16,16,4], index: 0, kind: input, shape index: {}]   ;;  %s6943_s1 = inlined_call_operand.vmem [shape: f32[9,4,8], index: 1, kind: input, shape index: {}]   ;;  %s6944_s2 = inlined_call_operand.vmem [shape: f32[2,16,16,8], index: 2, kind: output, shape index: {0}]   ;;  %s6945_s3 = inlined_call_operand.vmem [shape: f32[2,1,8], index: 3, kind: output, shape index: {1}]   ;;  %s6946_s4 = inlined_call_operand.vmem [shape: f32[2,1,8], index: 4, kind: output, shape index: {2}]  }
   0x1 LB: > { %s4145_s16 = sadd.s32 4294967295, %s5483_s15   ;;  %p4149_p0 = scmp.ge.s32.totalorder %s5483_s15, 1  ;;  %s5483_s15 = sphi %s5511_s15, %s15_s15  }
   0x2   : > { %p167_p1 = scmp.lt.s32.totalorder %s5483_s15, 3 }
   0x4   : > { %p168_p2 = pnand %p4149_p0, %p167_p1 }
   0x6   : > { %171 = sbr.rel (%p168_p2) target bundleno = 662 (0x296), region = 28 }
   0xd   : > { %v5522_v0 = vld [vmem:[%s6943_s1 + $0x4] sm:$0xf]  ;;  %vm517_vm0 = vcmask 1043456   ;;  %vm247_vm1 = vcmask 31744   ;;  %p5526_p3 = scmp.lt.s32.totalorder %s4145_s16, 1  ;;  %v5485_v1 = vmov 0.0  }
   0xe   : > { %4760 = vmatprep.subr.msk.mxu1 %vm517_vm0, %v5522_v0  ;;  %249 = vst.msk [vmem:[#allocation2 + $0x8] sm:$0xff] %vm247_vm1, %v5485_v1  ;;  %248 = vst.msk [vmem:[#allocation2] sm:$0xff] %vm247_vm1, %v5485_v1  ;;  %v5643_v2 = vld [vmem:[%s6943_s1 + $0x10] sm:$0xf]  ;;  %v386_v3 = vld [vmem:[%s6943_s1] sm:$0xf] }
   0xf   : > { %250 = vst.msk [vmem:[#allocation2 + $0x10] sm:$0xff] %vm247_vm1, %v5485_v1  ;;  %253 = vst.msk [vmem:[#allocation2 + $0x20] sm:$0xff] %vm247_vm1, %v5485_v1  ;;  %v5651_v4 = vld [vmem:[%s6943_s1 + $0x14] sm:$0xf]  ;;  %4761 = vmatpush3.msk.msra.mxu1 %vm517_vm0, %v5522_v0  ;;  %4960 = vmatprep.subr.msk.mxu0 %vm517_vm0, %v5643_v2  ;;  %s7057_s16 = smov (!%p5526_p3, %s4145_s16), 1  ;;  %vm251_vm2 = vcmask 24576  }
  0x10   : > { %254 = vst.msk [vmem:[#allocation2 + $0x28] sm:$0xff] %vm247_vm1, %v5485_v1  ;;  %255 = vst.msk [vmem:[#allocation2 + $0x30] sm:$0xff] %vm247_vm1, %v5485_v1  ;;  %4961 = vmatpush3.msk.msra.mxu0 %vm517_vm0, %v5643_v2  ;;  %4810 = vmatprep.subr.msk.mxu1 %vm517_vm0, %v386_v3  ;;  %s4461_s26 = sshll.u32 %s7057_s16, 8  ;;  %v5724_v11 = vld [vmem:[%s6943_s1 + $0x8] sm:$0xf]  ;;  %vm3801_vm3 = vcmask 64512   ;;  %s211_s21 = scalar_lea.vmem %s6945_s3, %s7057_s16 }
  0x11   : > { %257 = vst.msk [vmem:[#allocation2 + $0x40] sm:$0xff] %vm247_vm1, %v5485_v1  ;;  %258 = vst.msk [vmem:[#allocation2 + $0x48] sm:$0xff] %vm247_vm1, %v5485_v1  ;;  %5010 = vmatprep.subr.msk.mxu0 %vm517_vm0, %v5651_v4  ;;  %s5710_s29 = scalar_lea.vmem %s6942_s0, %s4461_s26  ;;  %v5773_v33 = vld [vmem:[%s6943_s1 + $0x18] sm:$0xf]  ;;  %v5902_v63 = vld [vmem:[%s6943_s1 + $0x1c] sm:$0xf]  ;;  %s6589_s18 = scalar_lea.vmem %s6944_s2, %s4461_s26 }
  0x12   : > { %259 = vst.msk [vmem:[#allocation2 + $0x50] sm:$0xff] %vm247_vm1, %v5485_v1  ;;  %261 = vst.msk [vmem:[#allocation2 + $0x60] sm:$0xff] %vm247_vm1, %v5485_v1  ;;  %v215_v5 = vld [vmem:[%s5710_s29] sm:$0xff]  ;;  %v216_v6 = vld [vmem:[%s5710_s29 + $0x8] sm:$0xff]  ;;  %vm4037_vm4 = vcmask 57344   ;;  %s214_s24 = scalar_lea.vmem %s6946_s4, %s7057_s16 }
  0x13   : > { %262 = vst.msk [vmem:[#allocation2 + $0x68] sm:$0xff] %vm247_vm1, %v5485_v1  ;;  %263 = vst.msk [vmem:[#allocation2 + $0x70] sm:$0xff] %vm247_vm1, %v5485_v1  ;;  %v217_v7 = vld [vmem:[%s5710_s29 + $0x10] sm:$0xff]  ;;  %v218_v8 = vld [vmem:[%s5710_s29 + $0x18] sm:$0xff] }
  0x14   : > { %265 = vst.msk [vmem:[#allocation2 + $0x80] sm:$0xff] %vm247_vm1, %v5485_v1  ;;  %266 = vst.msk [vmem:[#allocation2 + $0x88] sm:$0xff] %vm247_vm1, %v5485_v1  ;;  %v219_v9 = vld [vmem:[%s5710_s29 + $0x20] sm:$0xff]  ;;  %v220_v10 = vld [vmem:[%s5710_s29 + $0x28] sm:$0xff] }
  0x15   : > { %267 = vst.msk [vmem:[#allocation2 + $0x90] sm:$0xff] %vm247_vm1, %v5485_v1  ;;  %269 = vst.msk [vmem:[#allocation2 + $0xa0] sm:$0xff] %vm247_vm1, %v5485_v1  ;;  %v387_v12 = vld [vmem:[#allocation2 + $0x8] sm:$0xff]  ;;  %v221_v14 = vld [vmem:[%s5710_s29 + $0x30] sm:$0xff] }
  0x16   : > { %270 = vst.msk [vmem:[#allocation2 + $0xa8] sm:$0xff] %vm247_vm1, %v5485_v1  ;;  %271 = vst.msk [vmem:[#allocation2 + $0xb0] sm:$0xff] %vm247_vm1, %v5485_v1  ;;  %v388_v13 = vld [vmem:[#allocation2 + $0x10] sm:$0xff]  ;;  %4762 = vmatprep.mubr.msk.f32.mxu1 %vm247_vm1, %v387_v12  ;;  %v222_v15 = vld [vmem:[%s5710_s29 + $0x38] sm:$0xff] }
  0x17   : > { %273 = vst.msk [vmem:[#allocation2 + $0xc0] sm:$0xff] %vm247_vm1, %v5485_v1  ;;  %274 = vst.msk [vmem:[#allocation2 + $0xc8] sm:$0xff] %vm247_vm1, %v5485_v1  ;;  %v223_v16 = vld [vmem:[%s5710_s29 + $0x40] sm:$0xff]  ;;  %v224_v17 = vld [vmem:[%s5710_s29 + $0x48] sm:$0xff]  ;;  %4763 = vmatmul.mubr.msk.f32.vlgmr.msra.gmra.mrb[0].mxu1 %vm247_vm1, %v388_v13 }
  0x18   : > { %275 = vst.msk [vmem:[#allocation2 + $0xd0] sm:$0xff] %vm247_vm1, %v5485_v1  ;;  %277 = vst.msk [vmem:[#allocation2 + $0xe0] sm:$0xff] %vm247_vm1, %v5485_v1  ;;  %v225_v18 = vld [vmem:[%s5710_s29 + $0x50] sm:$0xff]  ;;  %v226_v19 = vld [vmem:[%s5710_s29 + $0x58] sm:$0xff]  ;;  %4811 = vmatpush3.msk.msra.mxu1 %vm517_vm0, %v386_v3 }
  0x19   : > { %278 = vst.msk [vmem:[#allocation2 + $0xe8] sm:$0xff] %vm247_vm1, %v5485_v1  ;;  %279 = vst.msk [vmem:[#allocation2 + $0xf0] sm:$0xff] %vm247_vm1, %v5485_v1  ;;  %v227_v20 = vld [vmem:[%s5710_s29 + $0x60] sm:$0xff]  ;;  %v228_v21 = vld [vmem:[%s5710_s29 + $0x68] sm:$0xff]  ;;  %4860 = vmatprep.subr.msk.mxu1 %vm517_vm0, %v5724_v11 }
  0x1a   : > { %281 = vst.msk [vmem:[#allocation2 + $0x100] sm:$0xff] %vm247_vm1, %v5485_v1  ;;  %282 = vst.msk [vmem:[#allocation2 + $0x108] sm:$0xff] %vm247_vm1, %v5485_v1  ;;  %v229_v22 = vld [vmem:[%s5710_s29 + $0x70] sm:$0xff]  ;;  %v230_v23 = vld [vmem:[%s5710_s29 + $0x78] sm:$0xff] }
  0x1b   : > { %283 = vst.msk [vmem:[#allocation2 + $0x110] sm:$0xff] %vm247_vm1, %v5485_v1  ;;  %285 = vst.msk [vmem:[#allocation2 + $0x120] sm:$0xff] %vm247_vm1, %v5485_v1  ;;  %v231_v24 = vld [vmem:[%s5710_s29 + $0x80] sm:$0xff]  ;;  %v232_v25 = vld [vmem:[%s5710_s29 + $0x88] sm:$0xff] }
  0x1c   : > { %286 = vst.msk [vmem:[#allocation2 + $0x128] sm:$0xff] %vm247_vm1, %v5485_v1  ;;  %287 = vst.msk [vmem:[#allocation2 + $0x130] sm:$0xff] %vm247_vm1, %v5485_v1  ;;  %v233_v26 = vld [vmem:[%s5710_s29 + $0x90] sm:$0xff]  ;;  %v234_v27 = vld [vmem:[%s5710_s29 + $0x98] sm:$0xff] }
  0x1d   : > { %289 = vst.msk [vmem:[#allocation2 + $0x140] sm:$0xff] %vm247_vm1, %v5485_v1  ;;  %290 = vst.msk [vmem:[#allocation2 + $0x148] sm:$0xff] %vm247_vm1, %v5485_v1  ;;  %v235_v28 = vld [vmem:[%s5710_s29 + $0xa0] sm:$0xff]  ;;  %v236_v29 = vld [vmem:[%s5710_s29 + $0xa8] sm:$0xff] }
  0x1e   : > { %291 = vst.msk [vmem:[#allocation2 + $0x150] sm:$0xff] %vm247_vm1, %v5485_v1  ;;  %293 = vst.msk [vmem:[#allocation2 + $0x160] sm:$0xff] %vm247_vm1, %v5485_v1  ;;  %v237_v38 = vld [vmem:[%s5710_s29 + $0xb0] sm:$0xff]  ;;  %v238_v39 = vld [vmem:[%s5710_s29 + $0xb8] sm:$0xff] }
  0x1f   : > { %294 = vst.msk [vmem:[#allocation2 + $0x168] sm:$0xff] %vm247_vm1, %v5485_v1  ;;  %295 = vst.msk [vmem:[#allocation2 + $0x170] sm:$0xff] %vm247_vm1, %v5485_v1  ;;  %v239_v40 = vld [vmem:[%s5710_s29 + $0xc0] sm:$0xff]  ;;  %v240_v42 = vld [vmem:[%s5710_s29 + $0xc8] sm:$0xff] }
  0x20   : > { %297 = vst.msk [vmem:[#allocation2 + $0x180] sm:$0xff] %vm247_vm1, %v5485_v1  ;;  %298 = vst.msk [vmem:[#allocation2 + $0x188] sm:$0xff] %vm247_vm1, %v5485_v1  ;;  %v241_v44 = vld [vmem:[%s5710_s29 + $0xd0] sm:$0xff]  ;;  %v242_v45 = vld [vmem:[%s5710_s29 + $0xd8] sm:$0xff] }
  0x21   : > { %299 = vst.msk [vmem:[#allocation2 + $0x190] sm:$0xff] %vm247_vm1, %v5485_v1  ;;  %301 = vst.msk [vmem:[#allocation2 + $0x1a0] sm:$0xff] %vm247_vm1, %v5485_v1  ;;  %v243_v46 = vld [vmem:[%s5710_s29 + $0xe0] sm:$0xff]  ;;  %v244_v47 = vld [vmem:[%s5710_s29 + $0xe8] sm:$0xff] }
  0x22   : > { %302 = vst.msk [vmem:[#allocation2 + $0x1a8] sm:$0xff] %vm247_vm1, %v5485_v1  ;;  %303 = vst.msk [vmem:[#allocation2 + $0x1b0] sm:$0xff] %vm247_vm1, %v5485_v1  ;;  %v245_v57 = vld [vmem:[%s5710_s29 + $0xf0] sm:$0xff]  ;;  %v246_v58 = vld [vmem:[%s5710_s29 + $0xf8] sm:$0xff] }
  0x23   : > { %305 = vst.msk [vmem:[#allocation2 + $0x1c0] sm:$0xff] %vm247_vm1, %v5485_v1  ;;  %306 = vst.msk [vmem:[#allocation2 + $0x1c8] sm:$0xff] %vm247_vm1, %v5485_v1 }
  0x24   : > { %307 = vst.msk [vmem:[#allocation2 + $0x1d0] sm:$0xff] %vm247_vm1, %v5485_v1  ;;  %309 = vst.msk [vmem:[#allocation2 + $0x1e0] sm:$0xff] %vm247_vm1, %v5485_v1 }
  0x25   : > { %310 = vst.msk [vmem:[#allocation2 + $0x1e8] sm:$0xff] %vm247_vm1, %v5485_v1  ;;  %311 = vst.msk [vmem:[#allocation2 + $0x1f0] sm:$0xff] %vm247_vm1, %v5485_v1 }
  0x26   : > { %313 = vst.msk [vmem:[#allocation2 + $0x200] sm:$0xff] %vm247_vm1, %v5485_v1  ;;  %314 = vst.msk [vmem:[#allocation2 + $0x208] sm:$0xff] %vm247_vm1, %v5485_v1 }
  0x27   : > { %315 = vst.msk [vmem:[#allocation2 + $0x210] sm:$0xff] %vm247_vm1, %v5485_v1  ;;  %317 = vst.msk [vmem:[#allocation2 + $0x220] sm:$0xff] %vm247_vm1, %v5485_v1 }
  0x28   : > { %318 = vst.msk [vmem:[#allocation2 + $0x228] sm:$0xff] %vm247_vm1, %v5485_v1  ;;  %319 = vst.msk [vmem:[#allocation2 + $0x230] sm:$0xff] %vm247_vm1, %v5485_v1 }
  0x29   : > { %256 = vst.msk [vmem:[#allocation2 + $0x38] sm:$0x1] %vm251_vm2, %v5485_v1  ;;  %252 = vst.msk [vmem:[#allocation2 + $0x18] sm:$0x1] %vm251_vm2, %v5485_v1 }
  0x2a   : > { %260 = vst.msk [vmem:[#allocation2 + $0x58] sm:$0x1] %vm251_vm2, %v5485_v1  ;;  %264 = vst.msk [vmem:[#allocation2 + $0x78] sm:$0x1] %vm251_vm2, %v5485_v1 }
  0x2b   : > { %268 = vst.msk [vmem:[#allocation2 + $0x98] sm:$0x1] %vm251_vm2, %v5485_v1  ;;  %272 = vst.msk [vmem:[#allocation2 + $0xb8] sm:$0x1] %vm251_vm2, %v5485_v1 }
  0x2c   : > { %276 = vst.msk [vmem:[#allocation2 + $0xd8] sm:$0x1] %vm251_vm2, %v5485_v1  ;;  %280 = vst.msk [vmem:[#allocation2 + $0xf8] sm:$0x1] %vm251_vm2, %v5485_v1 }
  0x2d   : > { %284 = vst.msk [vmem:[#allocation2 + $0x118] sm:$0x1] %vm251_vm2, %v5485_v1  ;;  %288 = vst.msk [vmem:[#allocation2 + $0x138] sm:$0x1] %vm251_vm2, %v5485_v1 }
  0x2e   : > { %292 = vst.msk [vmem:[#allocation2 + $0x158] sm:$0x1] %vm251_vm2, %v5485_v1  ;;  %296 = vst.msk [vmem:[#allocation2 + $0x178] sm:$0x1] %vm251_vm2, %v5485_v1 }
  0x2f   : > { %300 = vst.msk [vmem:[#allocation2 + $0x198] sm:$0x1] %vm251_vm2, %v5485_v1  ;;  %304 = vst.msk [vmem:[#allocation2 + $0x1b8] sm:$0x1] %vm251_vm2, %v5485_v1 }
  0x30   : > { %308 = vst.msk [vmem:[#allocation2 + $0x1d8] sm:$0x1] %vm251_vm2, %v5485_v1  ;;  %312 = vst.msk [vmem:[#allocation2 + $0x1f8] sm:$0x1] %vm251_vm2, %v5485_v1 }
  0x31   : > { %316 = vst.msk [vmem:[#allocation2 + $0x218] sm:$0x1] %vm251_vm2, %v5485_v1  ;;  %320 = vst.msk [vmem:[#allocation2 + $0x238] sm:$0x1] %vm251_vm2, %v5485_v1 }
  0x32   : > { %322 = vst.msk [vmem:[#allocation2 + $0x28] sm:$0xff] %vm247_vm1, %v215_v5  ;;  %323 = vst.msk [vmem:[#allocation2 + $0x30] sm:$0xff] %vm247_vm1, %v216_v6 }
  0x33   : > { %324 = vst.msk [vmem:[#allocation2 + $0x48] sm:$0xff] %vm247_vm1, %v217_v7  ;;  %325 = vst.msk [vmem:[#allocation2 + $0x50] sm:$0xff] %vm247_vm1, %v218_v8 }
  0x34   : > { %326 = vst.msk [vmem:[#allocation2 + $0x68] sm:$0xff] %vm247_vm1, %v219_v9  ;;  %327 = vst.msk [vmem:[#allocation2 + $0x70] sm:$0xff] %vm247_vm1, %v220_v10 }
  0x35   : > { %328 = vst.msk [vmem:[#allocation2 + $0x88] sm:$0xff] %vm247_vm1, %v221_v14  ;;  %329 = vst.msk [vmem:[#allocation2 + $0x90] sm:$0xff] %vm247_vm1, %v222_v15 }
  0x36   : > { %330 = vst.msk [vmem:[#allocation2 + $0xa8] sm:$0xff] %vm247_vm1, %v223_v16  ;;  %331 = vst.msk [vmem:[#allocation2 + $0xb0] sm:$0xff] %vm247_vm1, %v224_v17 }
  0x37   : > { %332 = vst.msk [vmem:[#allocation2 + $0xc8] sm:$0xff] %vm247_vm1, %v225_v18  ;;  %333 = vst.msk [vmem:[#allocation2 + $0xd0] sm:$0xff] %vm247_vm1, %v226_v19 }
  0x38   : > { %334 = vst.msk [vmem:[#allocation2 + $0xe8] sm:$0xff] %vm247_vm1, %v227_v20  ;;  %335 = vst.msk [vmem:[#allocation2 + $0xf0] sm:$0xff] %vm247_vm1, %v228_v21 }
  0x39   : > { %336 = vst.msk [vmem:[#allocation2 + $0x108] sm:$0xff] %vm247_vm1, %v229_v22  ;;  %337 = vst.msk [vmem:[#allocation2 + $0x110] sm:$0xff] %vm247_vm1, %v230_v23  ;;  %v389_v30 = vld [vmem:[#allocation2 + $0x28] sm:$0xff]  ;;  %v390_v31 = vld [vmem:[#allocation2 + $0x30] sm:$0xff] }
  0x3a   : > { %338 = vst.msk [vmem:[#allocation2 + $0x128] sm:$0xff] %vm247_vm1, %v231_v24  ;;  %339 = vst.msk [vmem:[#allocation2 + $0x130] sm:$0xff] %vm247_vm1, %v232_v25  ;;  %v5763_v32 = vld [vmem:[#allocation2 + $0x48] sm:$0xff]  ;;  %4765 = vmatprep.mubr.msk.f32.mxu1 %vm247_vm1, %v389_v30  ;;  %4962 = vmatprep.mubr.msk.f32.mxu0 %vm247_vm1, %v389_v30  ;;  %v5781_v34 = vld [vmem:[#allocation2 + $0x50] sm:$0xff] }
  0x3b   : > { %340 = vst.msk [vmem:[#allocation2 + $0x148] sm:$0xff] %vm247_vm1, %v233_v26  ;;  %341 = vst.msk [vmem:[#allocation2 + $0x150] sm:$0xff] %vm247_vm1, %v234_v27  ;;  %4766 = vmatmul.mubr.msk.f32.gmra.mrb[2].mxu1 %vm247_vm1, %v390_v31  ;;  %4963 = vmatmul.mubr.msk.f32.vlgmr.msra.gmra.mrb[0].mxu0 %vm247_vm1, %v390_v31  ;;  %v5785_v35 = vld [vmem:[#allocation2 + $0x68] sm:$0xff]  ;;  %v5797_v36 = vld [vmem:[#allocation2 + $0x70] sm:$0xff] }
  0x3c   : > { %342 = vst.msk [vmem:[#allocation2 + $0x168] sm:$0xff] %vm247_vm1, %v235_v28  ;;  %343 = vst.msk [vmem:[#allocation2 + $0x170] sm:$0xff] %vm247_vm1, %v236_v29  ;;  %5011 = vmatpush3.msk.msra.mxu0 %vm517_vm0, %v5651_v4  ;;  %4768 = vmatprep.mubr.msk.f32.mxu1 %vm247_vm1, %v5763_v32  ;;  %v5799_v37 = vld [vmem:[#allocation2 + $0x88] sm:$0xff]  ;;  %v5813_v41 = vld [vmem:[#allocation2 + $0x90] sm:$0xff] }
  0x3d   : > { %4965 = vmatprep.mubr.msk.f32.mxu0 %vm247_vm1, %v5763_v32  ;;  %5060 = vmatprep.subr.msk.mxu0 %vm517_vm0, %v5773_v33  ;;  %344 = vst.msk [vmem:[#allocation2 + $0x188] sm:$0xff] %vm247_vm1, %v237_v38  ;;  %345 = vst.msk [vmem:[#allocation2 + $0x190] sm:$0xff] %vm247_vm1, %v238_v39  ;;  %v5818_v43 = vld [vmem:[#allocation2 + $0xa8] sm:$0xff]  ;;  %v5836_v48 = vld [vmem:[#allocation2 + $0xb0] sm:$0xff] }
  0x3e   : > { %346 = vst.msk [vmem:[#allocation2 + $0x1a8] sm:$0xff] %vm247_vm1, %v239_v40  ;;  %347 = vst.msk [vmem:[#allocation2 + $0x1b0] sm:$0xff] %vm247_vm1, %v240_v42  ;;  %v5839_v49 = vld [vmem:[#allocation2 + $0xc8] sm:$0xff]  ;;  %v5849_v50 = vld [vmem:[#allocation2 + $0xd0] sm:$0xff] }
  0x3f   : > { %4769 = vmatmul.mubr.msk.f32.gmra.mrb[4].mxu1 %vm247_vm1, %v5781_v34  ;;  %4966 = vmatmul.mubr.msk.f32.gmra.mrb[2].mxu0 %vm247_vm1, %v5781_v34  ;;  %348 = vst.msk [vmem:[#allocation2 + $0x1c8] sm:$0xff] %vm247_vm1, %v241_v44  ;;  %349 = vst.msk [vmem:[#allocation2 + $0x1d0] sm:$0xff] %vm247_vm1, %v242_v45  ;;  %v5851_v51 = vld [vmem:[#allocation2 + $0xe8] sm:$0xff]  ;;  %v5861_v52 = vld [vmem:[#allocation2 + $0xf0] sm:$0xff] }
  0x40   : > { %4771 = vmatprep.mubr.msk.f32.mxu1 %vm247_vm1, %v5785_v35  ;;  %4968 = vmatprep.mubr.msk.f32.mxu0 %vm247_vm1, %v5785_v35  ;;  %350 = vst.msk [vmem:[#allocation2 + $0x1e8] sm:$0xff] %vm247_vm1, %v243_v46  ;;  %351 = vst.msk [vmem:[#allocation2 + $0x1f0] sm:$0xff] %vm247_vm1, %v244_v47  ;;  %v5863_v53 = vld [vmem:[#allocation2 + $0x108] sm:$0xff]  ;;  %v5873_v54 = vld [vmem:[#allocation2 + $0x110] sm:$0xff] }
  0x41   : > { %6994 = vst [vmem:[#allocation3_spill] sm:$0xff] %v5873_v54  ;;  %v5875_v55 = vld [vmem:[#allocation2 + $0x29] sm:$0xff]  ;;  %352 = vst.msk [vmem:[#allocation2 + $0x208] sm:$0xff] %vm247_vm1, %v245_v57  ;;  %v5893_v60 = vld [vmem:[#allocation2 + $0x31] sm:$0xff] }
  0x42   : > { %v5877_v56 = vld [vmem:[#allocation2 + $0x128] sm:$0xff]  ;;  %353 = vst.msk [vmem:[#allocation2 + $0x210] sm:$0xff] %vm247_vm1, %v246_v58  ;;  %v5891_v59 = vld [vmem:[#allocation2 + $0x130] sm:$0xff] }
  0x43   : > { %4772 = vmatmul.mubr.msk.f32.gmra.mrb[6].mxu1 %vm247_vm1, %v5797_v36  ;;  %4969 = vmatmul.mubr.msk.f32.gmra.mrb[4].mxu0 %vm247_vm1, %v5797_v36  ;;  %6995 = vst [vmem:[#allocation4_spill] sm:$0xff] %v5877_v56  ;;  %6996 = vst [vmem:[#allocation5_spill] sm:$0xff] %v5891_v59  ;;  %v5895_v61 = vld [vmem:[#allocation2 + $0x148] sm:$0xff]  ;;  %v5912_v0 = vld [vmem:[#allocation2 + $0x150] sm:$0xff] }
  0x44   : > { %4774 = vmatprep.mubr.msk.f32.mxu1 %vm247_vm1, %v5799_v37  ;;  %4971 = vmatprep.mubr.msk.f32.mxu0 %vm247_vm1, %v5799_v37  ;;  %6997 = vst [vmem:[#allocation6_spill] sm:$0xff] %v5895_v61  ;;  %v5897_v62 = vld [vmem:[#allocation2 + $0x49] sm:$0xff]  ;;  %6998 = vst [vmem:[#allocation7_spill] sm:$0xff] %v5912_v0  ;;  %v5914_v1 = vld [vmem:[#allocation2 + $0x51] sm:$0xff] }
  0x45   : > { %v5918_v3 = vld [vmem:[#allocation2 + $0x168] sm:$0xff]  ;;  %v5932_v5 = vld [vmem:[#allocation2 + $0x170] sm:$0xff] }
  0x46   : > { %6999 = vst [vmem:[#allocation8_spill] sm:$0xff] %v5918_v3  ;;  %v5920_v4 = vld [vmem:[#allocation2 + $0x69] sm:$0xff]  ;;  %7000 = vst [vmem:[#allocation9_spill] sm:$0xff] %v5932_v5  ;;  %v5934_v6 = vld [vmem:[#allocation2 + $0x71] sm:$0xff] }
  0x47   : > { %4775 = vmatmul.mubr.msk.f32.gmra.mrb[8].mxu1 %vm247_vm1, %v5813_v41  ;;  %4972 = vmatmul.mubr.msk.f32.gmra.mrb[6].mxu0 %vm247_vm1, %v5813_v41  ;;  %v5936_v7 = vld [vmem:[#allocation2 + $0x188] sm:$0xff]  ;;  %v5948_v9 = vld [vmem:[#allocation2 + $0x190] sm:$0xff] }
  0x48   : > { %4777 = vmatprep.mubr.msk.f32.mxu1 %vm247_vm1, %v5818_v43  ;;  %4974 = vmatprep.mubr.msk.f32.mxu0 %vm247_vm1, %v5818_v43  ;;  %7001 = vst [vmem:[#allocation10_spill] sm:$0xff] %v5936_v7  ;;  %v5938_v8 = vld [vmem:[#allocation2 + $0x89] sm:$0xff]  ;;  %7002 = vst [vmem:[#allocation11_spill] sm:$0xff] %v5948_v9  ;;  %v5950_v10 = vld [vmem:[#allocation2 + $0x91] sm:$0xff] }
  0x49   : > { %v5952_v12 = vld [vmem:[#allocation2 + $0x1a8] sm:$0xff]  ;;  %v5964_v14 = vld [vmem:[#allocation2 + $0x1b0] sm:$0xff] }
  0x4a   : > { %7003 = vst [vmem:[#allocation12_spill] sm:$0xff] %v5952_v12  ;;  %v5954_v13 = vld [vmem:[#allocation2 + $0xa9] sm:$0xff]  ;;  %7004 = vst [vmem:[#allocation13_spill] sm:$0xff] %v5964_v14  ;;  %v5966_v15 = vld [vmem:[#allocation2 + $0xb1] sm:$0xff] }
  0x4b   : > { %4778 = vmatmul.mubr.msk.f32.gmra.mrb[10].mxu1 %vm247_vm1, %v5836_v48  ;;  %4975 = vmatmul.mubr.msk.f32.gmra.mrb[8].mxu0 %vm247_vm1, %v5836_v48  ;;  %v5968_v16 = vld [vmem:[#allocation2 + $0x1c8] sm:$0xff]  ;;  %v5980_v18 = vld [vmem:[#allocation2 + $0x1d0] sm:$0xff] }
  0x4c   : > { %4780 = vmatprep.mubr.msk.f32.mxu1 %vm247_vm1, %v5839_v49  ;;  %4977 = vmatprep.mubr.msk.f32.mxu0 %vm247_vm1, %v5839_v49  ;;  %7005 = vst [vmem:[#allocation14_spill] sm:$0xff] %v5968_v16  ;;  %v5970_v17 = vld [vmem:[#allocation2 + $0xc9] sm:$0xff]  ;;  %7006 = vst [vmem:[#allocation15_spill] sm:$0xff] %v5980_v18  ;;  %v5982_v19 = vld [vmem:[#allocation2 + $0xd1] sm:$0xff] }
  0x4d   : > { %v5984_v20 = vld [vmem:[#allocation2 + $0x1e8] sm:$0xff]  ;;  %v5996_v22 = vld [vmem:[#allocation2 + $0x1f0] sm:$0xff] }
  0x4e   : > { %7007 = vst [vmem:[#allocation16_spill] sm:$0xff] %v5984_v20  ;;  %v5986_v21 = vld [vmem:[#allocation2 + $0xe9] sm:$0xff]  ;;  %7008 = vst [vmem:[#allocation17_spill] sm:$0xff] %v5996_v22  ;;  %v5998_v23 = vld [vmem:[#allocation2 + $0xf1] sm:$0xff] }
  0x4f   : > { %4781 = vmatmul.mubr.msk.f32.gmra.mrb[12].mxu1 %vm247_vm1, %v5849_v50  ;;  %4978 = vmatmul.mubr.msk.f32.gmra.mrb[10].mxu0 %vm247_vm1, %v5849_v50  ;;  %v354_v24 = vld [vmem:[#allocation2 + $0x7] sm:$0xff]  ;;  %v355_v26 = vld [vmem:[#allocation2 + $0xf] sm:$0xff] }
  0x50   : > { %4783 = vmatprep.mubr.msk.f32.mxu1 %vm247_vm1, %v5851_v51  ;;  %4980 = vmatprep.mubr.msk.f32.mxu0 %vm247_vm1, %v5851_v51  ;;  %v6000_v25 = vld [vmem:[#allocation2 + $0x109] sm:$0xff]  ;;  %v6009_v27 = vld [vmem:[#allocation2 + $0x111] sm:$0xff] }
  0x51   : > { %v6011_v28 = vld [vmem:[#allocation2 + $0x27] sm:$0xff]  ;;  %v6027_v31 = vld [vmem:[#allocation2 + $0x2f] sm:$0xff] }
  0x52   : > { %7009 = vst [vmem:[#allocation18_spill] sm:$0xff] %v6011_v28  ;;  %v6013_v29 = vld [vmem:[#allocation2 + $0x129] sm:$0xff]  ;;  %7010 = vst [vmem:[#allocation19_spill] sm:$0xff] %v6027_v31  ;;  %v6049_v40 = vld [vmem:[#allocation2 + $0x151] sm:$0xff] }
  0x53   : > { %4784 = vmatmul.mubr.msk.f32.gmra.mrb[14].mxu1 %vm247_vm1, %v5861_v52  ;;  %4981 = vmatmul.mubr.msk.f32.gmra.mrb[12].mxu0 %vm247_vm1, %v5861_v52  ;;  %v6021_v30 = vld [vmem:[%s6943_s1 + $0xc] sm:$0xf]  ;;  %v6065_v46 = vld [vmem:[#allocation2 + $0x171] sm:$0xff] }
  0x54   : > { %4786 = vmatprep.mubr.msk.f32.mxu1 %vm247_vm1, %v5863_v53  ;;  %4983 = vmatprep.mubr.msk.f32.mxu0 %vm247_vm1, %v5863_v53  ;;  %v6033_v38 = vld [vmem:[#allocation2 + $0x47] sm:$0xff]  ;;  %v6063_v45 = vld [vmem:[#allocation2 + $0x6f] sm:$0xff] }
  0x55   : > { %7011 = vst [vmem:[#allocation20_spill] sm:$0xff] %v6033_v38  ;;  %v6035_v39 = vld [vmem:[#allocation2 + $0x149] sm:$0xff]  ;;  %7014 = vst [vmem:[#allocation23_spill] sm:$0xff] %v6063_v45 }
  0x56   : > { %v6051_v42 = vld [vmem:[#allocation2 + $0x67] sm:$0xff]  ;;  %v6079_v58 = vld [vmem:[#allocation2 + $0x8f] sm:$0xff] }
  0x57   : > { %4787 = vmatmul.mubr.msk.f32.gmra.mrb[16].mxu1 %vm247_vm1, %v5873_v54  ;;  %4984 = vmatmul.mubr.msk.f32.gmra.mrb[14].mxu0 %vm247_vm1, %v5873_v54  ;;  %7013 = vst [vmem:[#allocation22_spill] sm:$0xff] %v6051_v42  ;;  %v6053_v44 = vld [vmem:[#allocation2 + $0x169] sm:$0xff]  ;;  %7016 = vst [vmem:[#allocation25_spill] sm:$0xff] %v6079_v58 }
  0x58   : > { %4789 = vmatprep.mubr.msk.f32.mxu1 %vm247_vm1, %v5877_v56  ;;  %5012 = vmatprep.mubr.msk.f32.mxu0 %vm247_vm1, %v5875_v55  ;;  %v6067_v47 = vld [vmem:[#allocation2 + $0x87] sm:$0xff]  ;;  %v6145_v56 = vld [vmem:[#allocation2 + $0x211] sm:$0xff] }
  0x59   : > { %7015 = vst [vmem:[#allocation24_spill] sm:$0xff] %v6067_v47  ;;  %v6069_v57 = vld [vmem:[#allocation2 + $0x189] sm:$0xff]  ;;  %7024 = vst [vmem:[#allocation33_spill] sm:$0xff] %v6145_v56 }
  0x5a   : > { %v6157_v54 = vld [vmem:[#allocation2 + $0x12f] sm:$0xff] }
  0x5b   : > { %4790 = vmatmul.mubr.msk.f32.gmra.mrb[18].mxu1 %vm247_vm1, %v5891_v59  ;;  %5013 = vmatmul.mubr.msk.f32.vlgmr.msra.gmra.mrb[0].mxu0 %vm247_vm1, %v5893_v60  ;;  %v6133_v59 = vld [vmem:[#allocation2 + $0x209] sm:$0xff] }
  0x5c   : > { %5061 = vmatpush3.msk.msra.mxu0 %vm517_vm0, %v5773_v33  ;;  %4792 = vmatprep.mubr.msk.f32.mxu1 %vm247_vm1, %v5895_v61  ;;  %v6029_v33 = vld [vmem:[#allocation2 + $0x131] sm:$0xff]  ;;  %v6131_v61 = vld [vmem:[#allocation2 + $0x107] sm:$0xff]  ;;  %7023 = vst [vmem:[#allocation32_spill] sm:$0xff] %v6133_v59 }
  0x5d   : > { %5015 = vmatprep.mubr.msk.f32.mxu0 %vm247_vm1, %v5897_v62  ;;  %5110 = vmatprep.subr.msk.mxu0 %vm517_vm0, %v5902_v63 }
  0x5f   : > { %4793 = vmatmul.mubr.msk.f32.gmra.mrb[20].mxu1 %vm247_vm1, %v5912_v0  ;;  %5016 = vmatmul.mubr.msk.f32.gmra.mrb[2].mxu0 %vm247_vm1, %v5914_v1  ;;  %v6129_v0 = vld [vmem:[#allocation2 + $0x1f1] sm:$0xff] }
  0x60   : > { %4795 = vmatprep.mubr.msk.f32.mxu1 %vm247_vm1, %v5918_v3  ;;  %5018 = vmatprep.mubr.msk.f32.mxu0 %vm247_vm1, %v5920_v4  ;;  %v6127_v3 = vld [vmem:[#allocation2 + $0xef] sm:$0xff]  ;;  %7022 = vst [vmem:[#allocation31_spill] sm:$0xff] %v6129_v0 }
  0x61   : > { %7021 = vst [vmem:[#allocation30_spill] sm:$0xff] %v6127_v3 }
  0x63   : > { %4796 = vmatmul.mubr.msk.f32.gmra.mrb[22].mxu1 %vm247_vm1, %v5932_v5  ;;  %5019 = vmatmul.mubr.msk.f32.gmra.mrb[4].mxu0 %vm247_vm1, %v5934_v6  ;;  %v6117_v5 = vld [vmem:[#allocation2 + $0x1e9] sm:$0xff] }
  0x64   : > { %4798 = vmatprep.mubr.msk.f32.mxu1 %vm247_vm1, %v5936_v7  ;;  %5021 = vmatprep.mubr.msk.f32.mxu0 %vm247_vm1, %v5938_v8  ;;  %v6115_v7 = vld [vmem:[#allocation2 + $0xe7] sm:$0xff] }
  0x67   : > { %4799 = vmatmul.mubr.msk.f32.gmra.mrb[24].mxu1 %vm247_vm1, %v5948_v9  ;;  %5022 = vmatmul.mubr.msk.f32.gmra.mrb[6].mxu0 %vm247_vm1, %v5950_v10  ;;  %v6113_v9 = vld [vmem:[#allocation2 + $0x1d1] sm:$0xff] }
  0x68   : > { %4801 = vmatprep.mubr.msk.f32.mxu1 %vm247_vm1, %v5952_v12  ;;  %5024 = vmatprep.mubr.msk.f32.mxu0 %vm247_vm1, %v5954_v13  ;;  %v6111_v12 = vld [vmem:[#allocation2 + $0xcf] sm:$0xff] }
  0x69   : > { %7020 = vst [vmem:[#allocation29_spill] sm:$0xff] %v6111_v12 }
  0x6b   : > { %4802 = vmatmul.mubr.msk.f32.gmra.mrb[26].mxu1 %vm247_vm1, %v5964_v14  ;;  %5025 = vmatmul.mubr.msk.f32.gmra.mrb[8].mxu0 %vm247_vm1, %v5966_v15  ;;  %v6101_v14 = vld [vmem:[#allocation2 + $0x1c9] sm:$0xff] }
  0x6c   : > { %4804 = vmatprep.mubr.msk.f32.mxu1 %vm247_vm1, %v5968_v16  ;;  %5027 = vmatprep.mubr.msk.f32.mxu0 %vm247_vm1, %v5970_v17  ;;  %v6099_v16 = vld [vmem:[#allocation2 + $0xc7] sm:$0xff] }
  0x6d   : > { %7019 = vst [vmem:[#allocation28_spill] sm:$0xff] %v6099_v16 }
  0x6f   : > { %4805 = vmatmul.mubr.msk.f32.gmra.mrb[28].mxu1 %vm247_vm1, %v5980_v18  ;;  %5028 = vmatmul.mubr.msk.f32.gmra.mrb[10].mxu0 %vm247_vm1, %v5982_v19  ;;  %v6097_v18 = vld [vmem:[#allocation2 + $0x1b1] sm:$0xff] }
  0x70   : > { %4807 = vmatprep.mubr.msk.f32.mxu1 %vm247_vm1, %v5984_v20  ;;  %5030 = vmatprep.mubr.msk.f32.mxu0 %vm247_vm1, %v5986_v21  ;;  %v6095_v20 = vld [vmem:[#allocation2 + $0xaf] sm:$0xff] }
  0x71   : > { %7018 = vst [vmem:[#allocation27_spill] sm:$0xff] %v6095_v20 }
  0x73   : > { %4808 = vmatmul.mubr.msk.f32.gmra.mrb[30].mxu1 %vm247_vm1, %v5996_v22  ;;  %5031 = vmatmul.mubr.msk.f32.gmra.mrb[12].mxu0 %vm247_vm1, %v5998_v23  ;;  %v6085_v22 = vld [vmem:[#allocation2 + $0x1a9] sm:$0xff] }
  0x74   : > { %4812 = vmatprep.mubr.msk.f32.mxu1 %vm247_vm1, %v354_v24  ;;  %5033 = vmatprep.mubr.msk.f32.mxu0 %vm247_vm1, %v6000_v25  ;;  %v6081_v24 = vld [vmem:[#allocation2 + $0x191] sm:$0xff] }
  0x77   : > { %4813 = vmatmul.mubr.msk.f32.vlgmr.msra.gmra.mrb[0].mxu1 %vm247_vm1, %v355_v26  ;;  %5034 = vmatmul.mubr.msk.f32.gmra.mrb[14].mxu0 %vm247_vm1, %v6009_v27  ;;  %v6083_v26 = vld [vmem:[#allocation2 + $0xa7] sm:$0xff] }
  0x78   : > { %4815 = vmatprep.mubr.msk.f32.mxu1 %vm247_vm1, %v6011_v28  ;;  %5036 = vmatprep.mubr.msk.f32.mxu0 %vm247_vm1, %v6013_v29  ;;  %7017 = vst [vmem:[#allocation26_spill] sm:$0xff] %v6083_v26  ;;  %v6147_v28 = vld [vmem:[#allocation2 + $0x127] sm:$0xff] }
  0x79   : > { %4861 = vmatpush3.msk.msra.mxu1 %vm517_vm0, %v5724_v11  ;;  %v6047_v11 = vld [vmem:[#allocation2 + $0x4f] sm:$0xff] }
  0x7a   : > { %4910 = vmatprep.subr.msk.mxu1 %vm517_vm0, %v6021_v30  ;;  %7012 = vst [vmem:[#allocation21_spill] sm:$0xff] %v6047_v11 }
  0x7b   : > { %4816 = vmatmul.mubr.msk.f32.gmra.mrb[2].mxu1 %vm247_vm1, %v6027_v31  ;;  %5037 = vmatmul.mubr.msk.f32.gmra.mrb[16].mxu0 %vm247_vm1, %v6029_v33  ;;  %v6143_v31 = vld [vmem:[#allocation2 + $0x10f] sm:$0xff] }
  0x7c   : > { %4818 = vmatprep.mubr.msk.f32.mxu1 %vm247_vm1, %v6033_v38  ;;  %5039 = vmatprep.mubr.msk.f32.mxu0 %vm247_vm1, %v6035_v39 }
  0x7f   : > { %4819 = vmatmul.mubr.msk.f32.gmra.mrb[4].mxu1 %vm247_vm1, %v6047_v11  ;;  %5040 = vmatmul.mubr.msk.f32.gmra.mrb[18].mxu0 %vm247_vm1, %v6049_v40 }
  0x80   : > { %4821 = vmatprep.mubr.msk.f32.mxu1 %vm247_vm1, %v6051_v42  ;;  %5042 = vmatprep.mubr.msk.f32.mxu0 %vm247_vm1, %v6053_v44 }
  0x83   : > { %4822 = vmatmul.mubr.msk.f32.gmra.mrb[6].mxu1 %vm247_vm1, %v6063_v45  ;;  %5043 = vmatmul.mubr.msk.f32.gmra.mrb[20].mxu0 %vm247_vm1, %v6065_v46 }
  0x84   : > { %4824 = vmatprep.mubr.msk.f32.mxu1 %vm247_vm1, %v6067_v47  ;;  %5045 = vmatprep.mubr.msk.f32.mxu0 %vm247_vm1, %v6069_v57 }
  0x87   : > { %4825 = vmatmul.mubr.msk.f32.gmra.mrb[8].mxu1 %vm247_vm1, %v6079_v58  ;;  %5046 = vmatmul.mubr.msk.f32.gmra.mrb[22].mxu0 %vm247_vm1, %v6081_v24 }
  0x88   : > { %4827 = vmatprep.mubr.msk.f32.mxu1 %vm247_vm1, %v6083_v26  ;;  %5048 = vmatprep.mubr.msk.f32.mxu0 %vm247_vm1, %v6085_v22 }
  0x8b   : > { %4828 = vmatmul.mubr.msk.f32.gmra.mrb[10].mxu1 %vm247_vm1, %v6095_v20  ;;  %5049 = vmatmul.mubr.msk.f32.gmra.mrb[24].mxu0 %vm247_vm1, %v6097_v18 }
  0x8c   : > { %4830 = vmatprep.mubr.msk.f32.mxu1 %vm247_vm1, %v6099_v16  ;;  %5051 = vmatprep.mubr.msk.f32.mxu0 %vm247_vm1, %v6101_v14 }
  0x8f   : > { %4831 = vmatmul.mubr.msk.f32.gmra.mrb[12].mxu1 %vm247_vm1, %v6111_v12  ;;  %5052 = vmatmul.mubr.msk.f32.gmra.mrb[26].mxu0 %vm247_vm1, %v6113_v9 }
  0x90   : > { %4833 = vmatprep.mubr.msk.f32.mxu1 %vm247_vm1, %v6115_v7  ;;  %5054 = vmatprep.mubr.msk.f32.mxu0 %vm247_vm1, %v6117_v5 }
  0x93   : > { %4834 = vmatmul.mubr.msk.f32.gmra.mrb[14].mxu1 %vm247_vm1, %v6127_v3  ;;  %5055 = vmatmul.mubr.msk.f32.gmra.mrb[28].mxu0 %vm247_vm1, %v6129_v0  ;;  %v6164_v0 = vld [vmem:[%s6943_s1 + $0x20] sm:$0xf] }
  0x94   : > { %4836 = vmatprep.mubr.msk.f32.mxu1 %vm247_vm1, %v6131_v61  ;;  %5057 = vmatprep.mubr.msk.f32.mxu0 %vm247_vm1, %v6133_v59  ;;  %v6159_v59 = vld [vmem:[#allocation2 + $0x147] sm:$0xff] }
  0x97   : > { %4837 = vmatmul.mubr.msk.f32.gmra.mrb[16].mxu1 %vm247_vm1, %v6143_v31  ;;  %5058 = vmatmul.mubr.msk.f32.gmra.mrb[30].mxu0 %vm247_vm1, %v6145_v56  ;;  %v6174_v56 = vld [vmem:[#allocation2 + $0x14f] sm:$0xff] }
  0x98   : > { %4839 = vmatprep.mubr.msk.f32.mxu1 %vm247_vm1, %v6147_v28  ;;  %5062 = vmatprep.mubr.msk.f32.mxu0 %vm247_vm1, %v6033_v38  ;;  %v6178_v38 = vld [vmem:[#allocation2 + $0x167] sm:$0xff] }
  0x9b   : > { %4840 = vmatmul.mubr.msk.f32.gmra.mrb[18].mxu1 %vm247_vm1, %v6157_v54  ;;  %5063 = vmatmul.mubr.msk.f32.vlgmr.msra.gmra.mrb[0].mxu0 %vm247_vm1, %v6047_v11  ;;  %v6204_v11 = vld [vmem:[#allocation2 + $0x1a7] sm:$0xff] }
  0x9c   : > { %5111 = vmatpush3.msk.msra.mxu0 %vm517_vm0, %v5902_v63  ;;  %4842 = vmatprep.mubr.msk.f32.mxu1 %vm247_vm1, %v6159_v59  ;;  %v6190_v63 = vld [vmem:[#allocation2 + $0x16f] sm:$0xff] }
  0x9d   : > { %5065 = vmatprep.mubr.msk.f32.mxu0 %vm247_vm1, %v6051_v42  ;;  %5160 = vmatprep.subr.msk.mxu0 %vm517_vm0, %v6164_v0  ;;  %v6192_v42 = vld [vmem:[#allocation2 + $0x187] sm:$0xff] }
  0x9f   : > { %4843 = vmatmul.mubr.msk.f32.gmra.mrb[20].mxu1 %vm247_vm1, %v6174_v56  ;;  %5066 = vmatmul.mubr.msk.f32.gmra.mrb[2].mxu0 %vm247_vm1, %v6063_v45  ;;  %v6202_v45 = vld [vmem:[#allocation2 + $0x18f] sm:$0xff] }
  0xa0   : > { %4845 = vmatprep.mubr.msk.f32.mxu1 %vm247_vm1, %v6178_v38  ;;  %5068 = vmatprep.mubr.msk.f32.mxu0 %vm247_vm1, %v6067_v47  ;;  %v6216_v47 = vld [vmem:[#allocation2 + $0x1c7] sm:$0xff] }
  0xa3   : > { %4846 = vmatmul.mubr.msk.f32.gmra.mrb[22].mxu1 %vm247_vm1, %v6190_v63  ;;  %5069 = vmatmul.mubr.msk.f32.gmra.mrb[4].mxu0 %vm247_vm1, %v6079_v58  ;;  %v6214_v58 = vld [vmem:[#allocation2 + $0x1af] sm:$0xff] }
  0xa4   : > { %4848 = vmatprep.mubr.msk.f32.mxu1 %vm247_vm1, %v6192_v42  ;;  %5071 = vmatprep.mubr.msk.f32.mxu0 %vm247_vm1, %v6083_v26  ;;  %v6228_v26 = vld [vmem:[#allocation2 + $0x1e7] sm:$0xff] }
  0xa7   : > { %4849 = vmatmul.mubr.msk.f32.gmra.mrb[24].mxu1 %vm247_vm1, %v6202_v45  ;;  %5072 = vmatmul.mubr.msk.f32.gmra.mrb[6].mxu0 %vm247_vm1, %v6095_v20  ;;  %v6226_v20 = vld [vmem:[#allocation2 + $0x1cf] sm:$0xff] }
  0xa8   : > { %4851 = vmatprep.mubr.msk.f32.mxu1 %vm247_vm1, %v6204_v11  ;;  %5074 = vmatprep.mubr.msk.f32.mxu0 %vm247_vm1, %v6099_v16  ;;  %v1070_v16 = vld [vmem:[#allocation2 + $0x9] sm:$0xff] }
  0xab   : > { %4852 = vmatmul.mubr.msk.f32.gmra.mrb[26].mxu1 %vm247_vm1, %v6214_v58  ;;  %5075 = vmatmul.mubr.msk.f32.gmra.mrb[8].mxu0 %vm247_vm1, %v6111_v12  ;;  %v6238_v12 = vld [vmem:[#allocation2 + $0x1ef] sm:$0xff] }
  0xac   : > { %4854 = vmatprep.mubr.msk.f32.mxu1 %vm247_vm1, %v6216_v47  ;;  %5077 = vmatprep.mubr.msk.f32.mxu0 %vm247_vm1, %v6115_v7 }
  0xaf   : > { %4855 = vmatmul.mubr.msk.f32.gmra.mrb[28].mxu1 %vm247_vm1, %v6226_v20  ;;  %5078 = vmatmul.mubr.msk.f32.gmra.mrb[10].mxu0 %vm247_vm1, %v6127_v3  ;;  %v1071_v3 = vld [vmem:[#allocation2 + $0x11] sm:$0xff] }
  0xb0   : > { %4857 = vmatprep.mubr.msk.f32.mxu1 %vm247_vm1, %v6228_v26  ;;  %5080 = vmatprep.mubr.msk.f32.mxu0 %vm247_vm1, %v6131_v61 }
  0xb3   : > { %4858 = vmatmul.mubr.msk.f32.gmra.mrb[30].mxu1 %vm247_vm1, %v6238_v12  ;;  %5081 = vmatmul.mubr.msk.f32.gmra.mrb[12].mxu0 %vm247_vm1, %v6143_v31 }
  0xb4   : > { %4862 = vmatprep.mubr.msk.f32.mxu1 %vm247_vm1, %v1070_v16  ;;  %5083 = vmatprep.mubr.msk.f32.mxu0 %vm247_vm1, %v6147_v28  ;;  %v2662_v16 = vld [vmem:[#allocation2 + $0x22f] sm:$0xff] }
  0xb7   : > { %4863 = vmatmul.mubr.msk.f32.vlgmr.msra.gmra.mrb[0].mxu1 %vm247_vm1, %v1071_v3  ;;  %5084 = vmatmul.mubr.msk.f32.gmra.mrb[14].mxu0 %vm247_vm1, %v6157_v54  ;;  %v2661_v3 = vld [vmem:[#allocation2 + $0x227] sm:$0xff] }
  0xb8   : > { %4865 = vmatprep.mubr.msk.f32.mxu1 %vm247_vm1, %v5875_v55  ;;  %5086 = vmatprep.mubr.msk.f32.mxu0 %vm247_vm1, %v6159_v59  ;;  %v6298_v55 = vld [vmem:[#allocation2 + $0x207] sm:$0xff] }
  0xb9   : > { %4911 = vmatpush3.msk.msra.mxu1 %vm517_vm0, %v6021_v30  ;;  %v7039_v30 = vld [vmem:[#allocation24_spill] sm:$0xff] }
  0xba   : > { %5210 = vmatprep.subr.msk.mxu1 %vm517_vm0, %v5643_v2 }
  0xbb   : > { %4866 = vmatmul.mubr.msk.f32.gmra.mrb[2].mxu1 %vm247_vm1, %v5893_v60  ;;  %5087 = vmatmul.mubr.msk.f32.gmra.mrb[16].mxu0 %vm247_vm1, %v6174_v56  ;;  %v6308_v60 = vld [vmem:[#allocation2 + $0x20f] sm:$0xff] }
  0xbc   : > { %4868 = vmatprep.mubr.msk.f32.mxu1 %vm247_vm1, %v5897_v62  ;;  %5089 = vmatprep.mubr.msk.f32.mxu0 %vm247_vm1, %v6178_v38 }
  0xbf   : > { %4869 = vmatmul.mubr.msk.f32.gmra.mrb[4].mxu1 %vm247_vm1, %v5914_v1  ;;  %5090 = vmatmul.mubr.msk.f32.gmra.mrb[18].mxu0 %vm247_vm1, %v6190_v63 }
  0xc0   : > { %4871 = vmatprep.mubr.msk.f32.mxu1 %vm247_vm1, %v5920_v4  ;;  %5092 = vmatprep.mubr.msk.f32.mxu0 %vm247_vm1, %v6192_v42 }
  0xc3   : > { %4872 = vmatmul.mubr.msk.f32.gmra.mrb[6].mxu1 %vm247_vm1, %v5934_v6  ;;  %5093 = vmatmul.mubr.msk.f32.gmra.mrb[20].mxu0 %vm247_vm1, %v6202_v45 }
  0xc4   : > { %4874 = vmatprep.mubr.msk.f32.mxu1 %vm247_vm1, %v5938_v8  ;;  %5095 = vmatprep.mubr.msk.f32.mxu0 %vm247_vm1, %v6204_v11 }
  0xc7   : > { %4875 = vmatmul.mubr.msk.f32.gmra.mrb[8].mxu1 %vm247_vm1, %v5950_v10  ;;  %5096 = vmatmul.mubr.msk.f32.gmra.mrb[22].mxu0 %vm247_vm1, %v6214_v58 }
  0xc8   : > { %4877 = vmatprep.mubr.msk.f32.mxu1 %vm247_vm1, %v5954_v13  ;;  %5098 = vmatprep.mubr.msk.f32.mxu0 %vm247_vm1, %v6216_v47 }
  0xcb   : > { %4878 = vmatmul.mubr.msk.f32.gmra.mrb[10].mxu1 %vm247_vm1, %v5966_v15  ;;  %5099 = vmatmul.mubr.msk.f32.gmra.mrb[24].mxu0 %vm247_vm1, %v6226_v20 }
  0xcc   : > { %4880 = vmatprep.mubr.msk.f32.mxu1 %vm247_vm1, %v5970_v17  ;;  %5101 = vmatprep.mubr.msk.f32.mxu0 %vm247_vm1, %v6228_v26 }
  0xcf   : > { %4881 = vmatmul.mubr.msk.f32.gmra.mrb[12].mxu1 %vm247_vm1, %v5982_v19  ;;  %5102 = vmatmul.mubr.msk.f32.gmra.mrb[26].mxu0 %vm247_vm1, %v6238_v12 }
  0xd0   : > { %4883 = vmatprep.mubr.msk.f32.mxu1 %vm247_vm1, %v5986_v21  ;;  %5104 = vmatprep.mubr.msk.f32.mxu0 %vm247_vm1, %v6298_v55 }
  0xd3   : > { %4884 = vmatmul.mubr.msk.f32.gmra.mrb[14].mxu1 %vm247_vm1, %v5998_v23  ;;  %5105 = vmatmul.mubr.msk.f32.gmra.mrb[28].mxu0 %vm247_vm1, %v6308_v60 }
  0xd4   : > { %4886 = vmatprep.mubr.msk.f32.mxu1 %vm247_vm1, %v6000_v25  ;;  %5107 = vmatprep.mubr.msk.f32.mxu0 %vm247_vm1, %v2661_v3  ;;  %v7041_v3 = vld [vmem:[#allocation25_spill] sm:$0xff] }
  0xd7   : > { %4887 = vmatmul.mubr.msk.f32.gmra.mrb[16].mxu1 %vm247_vm1, %v6009_v27  ;;  %5108 = vmatmul.mubr.msk.f32.gmra.mrb[30].mxu0 %vm247_vm1, %v2662_v16  ;;  %v7042_v16 = vld [vmem:[#allocation11_spill] sm:$0xff] }
  0xd8   : > { %4889 = vmatprep.mubr.msk.f32.mxu1 %vm247_vm1, %v6013_v29  ;;  %5112 = vmatprep.mubr.msk.f32.mxu0 %vm247_vm1, %v5763_v32  ;;  %v7025_v32 = vld [vmem:[#allocation31_spill] sm:$0xff] }
  0xdb   : > { %4890 = vmatmul.mubr.msk.f32.gmra.mrb[18].mxu1 %vm247_vm1, %v6029_v33  ;;  %5113 = vmatmul.mubr.msk.f32.vlgmr.msra.gmra.mrb[0].mxu0 %vm247_vm1, %v5781_v34  ;;  %v7026_v34 = vld [vmem:[#allocation3_spill] sm:$0xff] }
  0xdc   : > { %5161 = vmatpush3.msk.msra.mxu0 %vm517_vm0, %v6164_v0  ;;  %4892 = vmatprep.mubr.msk.f32.mxu1 %vm247_vm1, %v6035_v39  ;;  %v7038_v0 = vld [vmem:[#allocation9_spill] sm:$0xff] }
  0xdd   : > { %5115 = vmatprep.mubr.msk.f32.mxu0 %vm247_vm1, %v5785_v35  ;;  %v7027_v35 = vld [vmem:[#allocation18_spill] sm:$0xff] }
  0xdf   : > { %4893 = vmatmul.mubr.msk.f32.gmra.mrb[20].mxu1 %vm247_vm1, %v6049_v40  ;;  %5116 = vmatmul.mubr.msk.f32.gmra.mrb[2].mxu0 %vm247_vm1, %v5797_v36  ;;  %v7028_v36 = vld [vmem:[#allocation4_spill] sm:$0xff] }
  0xe0   : > { %4895 = vmatprep.mubr.msk.f32.mxu1 %vm247_vm1, %v6053_v44  ;;  %5118 = vmatprep.mubr.msk.f32.mxu0 %vm247_vm1, %v5799_v37  ;;  %v7029_v37 = vld [vmem:[#allocation19_spill] sm:$0xff] }
  0xe3   : > { %4896 = vmatmul.mubr.msk.f32.gmra.mrb[22].mxu1 %vm247_vm1, %v6065_v46  ;;  %5119 = vmatmul.mubr.msk.f32.gmra.mrb[4].mxu0 %vm247_vm1, %v5813_v41  ;;  %v7030_v41 = vld [vmem:[#allocation5_spill] sm:$0xff] }
  0xe4   : > { %4898 = vmatprep.mubr.msk.f32.mxu1 %vm247_vm1, %v6069_v57  ;;  %5121 = vmatprep.mubr.msk.f32.mxu0 %vm247_vm1, %v5818_v43  ;;  %v7031_v43 = vld [vmem:[#allocation20_spill] sm:$0xff] }
  0xe7   : > { %4899 = vmatmul.mubr.msk.f32.gmra.mrb[24].mxu1 %vm247_vm1, %v6081_v24  ;;  %5122 = vmatmul.mubr.msk.f32.gmra.mrb[6].mxu0 %vm247_vm1, %v5836_v48  ;;  %v7032_v48 = vld [vmem:[#allocation6_spill] sm:$0xff] }
  0xe8   : > { %4901 = vmatprep.mubr.msk.f32.mxu1 %vm247_vm1, %v6085_v22  ;;  %5124 = vmatprep.mubr.msk.f32.mxu0 %vm247_vm1, %v5839_v49  ;;  %v7033_v49 = vld [vmem:[#allocation21_spill] sm:$0xff] }
  0xeb   : > { %4902 = vmatmul.mubr.msk.f32.gmra.mrb[26].mxu1 %vm247_vm1, %v6097_v18  ;;  %5125 = vmatmul.mubr.msk.f32.gmra.mrb[8].mxu0 %vm247_vm1, %v5849_v50  ;;  %v7034_v50 = vld [vmem:[#allocation7_spill] sm:$0xff] }
  0xec   : > { %4904 = vmatprep.mubr.msk.f32.mxu1 %vm247_vm1, %v6101_v14  ;;  %5127 = vmatprep.mubr.msk.f32.mxu0 %vm247_vm1, %v5851_v51  ;;  %v7035_v51 = vld [vmem:[#allocation22_spill] sm:$0xff] }
  0xef   : > { %4905 = vmatmul.mubr.msk.f32.gmra.mrb[28].mxu1 %vm247_vm1, %v6113_v9  ;;  %5128 = vmatmul.mubr.msk.f32.gmra.mrb[10].mxu0 %vm247_vm1, %v5861_v52  ;;  %v7036_v52 = vld [vmem:[#allocation8_spill] sm:$0xff] }
  0xf0   : > { %4907 = vmatprep.mubr.msk.f32.mxu1 %vm247_vm1, %v6117_v5  ;;  %5130 = vmatprep.mubr.msk.f32.mxu0 %vm247_vm1, %v5863_v53  ;;  %v7037_v53 = vld [vmem:[#allocation23_spill] sm:$0xff] }
  0xf3   : > { %4908 = vmatmul.mubr.msk.f32.gmra.mrb[30].mxu1 %vm247_vm1, %v7025_v32  ;;  %5131 = vmatmul.mubr.msk.f32.gmra.mrb[12].mxu0 %vm247_vm1, %v7026_v34  ;;  %v7043_v34 = vld [vmem:[#allocation26_spill] sm:$0xff] }
  0xf4   : > { %4912 = vmatprep.mubr.msk.f32.mxu1 %vm247_vm1, %v7027_v35  ;;  %5133 = vmatprep.mubr.msk.f32.mxu0 %vm247_vm1, %v7028_v36  ;;  %v7044_v35 = vld [vmem:[#allocation12_spill] sm:$0xff] }
  0xf7   : > { %4913 = vmatmul.mubr.msk.f32.vlgmr.msra.gmra.mrb[0].mxu1 %vm247_vm1, %v7029_v37  ;;  %5134 = vmatmul.mubr.msk.f32.gmra.mrb[14].mxu0 %vm247_vm1, %v7030_v41  ;;  %v7045_v37 = vld [vmem:[#allocation27_spill] sm:$0xff] }
  0xf8   : > { %4915 = vmatprep.mubr.msk.f32.mxu1 %vm247_vm1, %v7031_v43  ;;  %5136 = vmatprep.mubr.msk.f32.mxu0 %vm247_vm1, %v7032_v48  ;;  %v7046_v43 = vld [vmem:[#allocation13_spill] sm:$0xff] }
  0xf9   : > { %5211 = vmatpush3.msk.msra.mxu1 %vm517_vm0, %v5643_v2  ;;  %v7040_v2 = vld [vmem:[#allocation10_spill] sm:$0xff] }
  0xfb   : > { %4916 = vmatmul.mubr.msk.f32.gmra.mrb[2].mxu1 %vm247_vm1, %v7033_v49  ;;  %5137 = vmatmul.mubr.msk.f32.gmra.mrb[16].mxu0 %vm247_vm1, %v7034_v50  ;;  %v7047_v49 = vld [vmem:[#allocation28_spill] sm:$0xff] }
  0xfc   : > { %4918 = vmatprep.mubr.msk.f32.mxu1 %vm247_vm1, %v7035_v51  ;;  %5139 = vmatprep.mubr.msk.f32.mxu0 %vm247_vm1, %v7036_v52  ;;  %v7048_v51 = vld [vmem:[#allocation14_spill] sm:$0xff] }
  0xff   : > { %4919 = vmatmul.mubr.msk.f32.gmra.mrb[4].mxu1 %vm247_vm1, %v7037_v53  ;;  %5140 = vmatmul.mubr.msk.f32.gmra.mrb[18].mxu0 %vm247_vm1, %v7038_v0  ;;  %v7049_v53 = vld [vmem:[#allocation29_spill] sm:$0xff] }
 0x100   : > { %4921 = vmatprep.mubr.msk.f32.mxu1 %vm247_vm1, %v7039_v30  ;;  %5142 = vmatprep.mubr.msk.f32.mxu0 %vm247_vm1, %v7040_v2  ;;  %v7050_v30 = vld [vmem:[#allocation15_spill] sm:$0xff] }
 0x103   : > { %4922 = vmatmul.mubr.msk.f32.gmra.mrb[6].mxu1 %vm247_vm1, %v7041_v3  ;;  %5143 = vmatmul.mubr.msk.f32.gmra.mrb[20].mxu0 %vm247_vm1, %v7042_v16  ;;  %v7051_v3 = vld [vmem:[#allocation16_spill] sm:$0xff] }
 0x104   : > { %4924 = vmatprep.mubr.msk.f32.mxu1 %vm247_vm1, %v7043_v34  ;;  %5145 = vmatprep.mubr.msk.f32.mxu0 %vm247_vm1, %v7044_v35  ;;  %v6432_v34 = vld [vmem:[#allocation2 + $0x208] sm:$0xff] }
 0x107   : > { %4925 = vmatmul.mubr.msk.f32.gmra.mrb[8].mxu1 %vm247_vm1, %v7045_v37  ;;  %5146 = vmatmul.mubr.msk.f32.gmra.mrb[22].mxu0 %vm247_vm1, %v7046_v43  ;;  %v7052_v37 = vld [vmem:[#allocation30_spill] sm:$0xff] }
 0x108   : > { %4927 = vmatprep.mubr.msk.f32.mxu1 %vm247_vm1, %v7047_v49  ;;  %5148 = vmatprep.mubr.msk.f32.mxu0 %vm247_vm1, %v7048_v51  ;;  %v7053_v49 = vld [vmem:[#allocation17_spill] sm:$0xff] }
 0x10b   : > { %4928 = vmatmul.mubr.msk.f32.gmra.mrb[10].mxu1 %vm247_vm1, %v7049_v53  ;;  %5149 = vmatmul.mubr.msk.f32.gmra.mrb[24].mxu0 %vm247_vm1, %v7050_v30  ;;  %v6442_v53 = vld [vmem:[#allocation2 + $0x210] sm:$0xff] }
 0x10c   : > { %4930 = vmatprep.mubr.msk.f32.mxu1 %vm247_vm1, %v6115_v7  ;;  %5151 = vmatprep.mubr.msk.f32.mxu0 %vm247_vm1, %v7051_v3  ;;  %v3051_v7 = vld [vmem:[#allocation2 + $0x228] sm:$0xff] }
 0x10f   : > { %4931 = vmatmul.mubr.msk.f32.gmra.mrb[12].mxu1 %vm247_vm1, %v7052_v37  ;;  %5152 = vmatmul.mubr.msk.f32.gmra.mrb[26].mxu0 %vm247_vm1, %v7053_v49  ;;  %v3052_v37 = vld [vmem:[#allocation2 + $0x230] sm:$0xff] }
 0x110   : > { %4933 = vmatprep.mubr.msk.f32.mxu1 %vm247_vm1, %v6131_v61  ;;  %5154 = vmatprep.mubr.msk.f32.mxu0 %vm247_vm1, %v6432_v34  ;;  %v3442_v61 = vld [vmem:[#allocation2 + $0x231] sm:$0xff] }
 0x113   : > { %4934 = vmatmul.mubr.msk.f32.gmra.mrb[14].mxu1 %vm247_vm1, %v6143_v31  ;;  %5155 = vmatmul.mubr.msk.f32.gmra.mrb[28].mxu0 %vm247_vm1, %v6442_v53 }
 0x114   : > { %4936 = vmatprep.mubr.msk.f32.mxu1 %vm247_vm1, %v6147_v28  ;;  %5157 = vmatprep.mubr.msk.f32.mxu0 %vm247_vm1, %v3051_v7 }
 0x117   : > { %4937 = vmatmul.mubr.msk.f32.gmra.mrb[16].mxu1 %vm247_vm1, %v6157_v54  ;;  %5158 = vmatmul.mubr.msk.f32.gmra.mrb[30].mxu0 %vm247_vm1, %v3052_v37  ;;  %v7054_v54 = vld [vmem:[#allocation32_spill] sm:$0xff] }
 0x118   : > { %4939 = vmatprep.mubr.msk.f32.mxu1 %vm247_vm1, %v6159_v59  ;;  %5162 = vmatprep.mubr.msk.f32.mxu0 %vm247_vm1, %v5897_v62  ;;  %v7055_v59 = vld [vmem:[#allocation33_spill] sm:$0xff] }
 0x11b   : > { %4940 = vmatmul.mubr.msk.f32.gmra.mrb[18].mxu1 %vm247_vm1, %v6174_v56  ;;  %5163 = vmatmul.mubr.msk.f32.vlgmr.msra.gmra.mrb[0].mxu0 %vm247_vm1, %v5914_v1  ;;  %v3441_v56 = vld [vmem:[#allocation2 + $0x229] sm:$0xff] }
 0x11c   : > { %4942 = vmatprep.mubr.msk.f32.mxu1 %vm247_vm1, %v6178_v38  ;;  %5165 = vmatprep.mubr.msk.f32.mxu0 %vm247_vm1, %v5920_v4 }
 0x11f   : > { %4943 = vmatmul.mubr.msk.f32.gmra.mrb[20].mxu1 %vm247_vm1, %v6190_v63  ;;  %5166 = vmatmul.mubr.msk.f32.gmra.mrb[2].mxu0 %vm247_vm1, %v5934_v6 }
 0x120   : > { %4945 = vmatprep.mubr.msk.f32.mxu1 %vm247_vm1, %v6192_v42  ;;  %5168 = vmatprep.mubr.msk.f32.mxu0 %vm247_vm1, %v5938_v8 }
 0x123   : > { %4946 = vmatmul.mubr.msk.f32.gmra.mrb[22].mxu1 %vm247_vm1, %v6202_v45  ;;  %5169 = vmatmul.mubr.msk.f32.gmra.mrb[4].mxu0 %vm247_vm1, %v5950_v10 }
 0x124   : > { %4948 = vmatprep.mubr.msk.f32.mxu1 %vm247_vm1, %v6204_v11  ;;  %5171 = vmatprep.mubr.msk.f32.mxu0 %vm247_vm1, %v5954_v13 }
 0x127   : > { %4949 = vmatmul.mubr.msk.f32.gmra.mrb[24].mxu1 %vm247_vm1, %v6214_v58  ;;  %5172 = vmatmul.mubr.msk.f32.gmra.mrb[6].mxu0 %vm247_vm1, %v5966_v15 }
 0x128   : > { %4951 = vmatprep.mubr.msk.f32.mxu1 %vm247_vm1, %v6216_v47  ;;  %5174 = vmatprep.mubr.msk.f32.mxu0 %vm247_vm1, %v5970_v17 }
 0x12b   : > { %4952 = vmatmul.mubr.msk.f32.gmra.mrb[26].mxu1 %vm247_vm1, %v6226_v20  ;;  %5175 = vmatmul.mubr.msk.f32.gmra.mrb[8].mxu0 %vm247_vm1, %v5982_v19 }
 0x12c   : > { %4954 = vmatprep.mubr.msk.f32.mxu1 %vm247_vm1, %v6228_v26  ;;  %5177 = vmatprep.mubr.msk.f32.mxu0 %vm247_vm1, %v5986_v21 }
 0x12f   : > { %4955 = vmatmul.mubr.msk.f32.gmra.mrb[28].mxu1 %vm247_vm1, %v6238_v12  ;;  %5178 = vmatmul.mubr.msk.f32.gmra.mrb[10].mxu0 %vm247_vm1, %v5998_v23 }
 0x130   : > { %4957 = vmatprep.mubr.msk.f32.mxu1 %vm247_vm1, %v6298_v55  ;;  %5180 = vmatprep.mubr.msk.f32.mxu0 %vm247_vm1, %v6000_v25 }
 0x133   : > { %4958 = vmatmul.mubr.msk.f32.gmra.mrb[30].mxu1 %vm247_vm1, %v6308_v60  ;;  %5181 = vmatmul.mubr.msk.f32.gmra.mrb[12].mxu0 %vm247_vm1, %v6009_v27 }
 0x134   : > { %4986 = vmatprep.mubr.msk.f32.mxu1 %vm247_vm1, %v7028_v36  ;;  %5183 = vmatprep.mubr.msk.f32.mxu0 %vm247_vm1, %v6013_v29 }
 0x137   : > { %4987 = vmatmul.mubr.msk.f32.vlgmr.msra.gmra.mrb[16].mxu1 %vm247_vm1, %v7030_v41  ;;  %5184 = vmatmul.mubr.msk.f32.gmra.mrb[14].mxu0 %vm247_vm1, %v6029_v33 }
 0x138   : > { %4989 = vmatprep.mubr.msk.f32.mxu1 %vm247_vm1, %v7032_v48  ;;  %5186 = vmatprep.mubr.msk.f32.mxu0 %vm247_vm1, %v6035_v39 }
 0x13b   : > { %4990 = vmatmul.mubr.msk.f32.gmra.mrb[18].mxu1 %vm247_vm1, %v7034_v50  ;;  %5187 = vmatmul.mubr.msk.f32.gmra.mrb[16].mxu0 %vm247_vm1, %v6049_v40 }
 0x13c   : > { %4992 = vmatprep.mubr.msk.f32.mxu1 %vm247_vm1, %v7036_v52  ;;  %5189 = vmatprep.mubr.msk.f32.mxu0 %vm247_vm1, %v6053_v44 }
 0x13f   : > { %4993 = vmatmul.mubr.msk.f32.gmra.mrb[20].mxu1 %vm247_vm1, %v7038_v0  ;;  %5190 = vmatmul.mubr.msk.f32.gmra.mrb[18].mxu0 %vm247_vm1, %v6065_v46 }
 0x140   : > { %4995 = vmatprep.mubr.msk.f32.mxu1 %vm247_vm1, %v7040_v2  ;;  %5192 = vmatprep.mubr.msk.f32.mxu0 %vm247_vm1, %v6069_v57 }
 0x143   : > { %4996 = vmatmul.mubr.msk.f32.gmra.mrb[22].mxu1 %vm247_vm1, %v7042_v16  ;;  %5193 = vmatmul.mubr.msk.f32.gmra.mrb[20].mxu0 %vm247_vm1, %v6081_v24 }
 0x144   : > { %4998 = vmatprep.mubr.msk.f32.mxu1 %vm247_vm1, %v7044_v35  ;;  %5195 = vmatprep.mubr.msk.f32.mxu0 %vm247_vm1, %v6085_v22 }
 0x147   : > { %4999 = vmatmul.mubr.msk.f32.gmra.mrb[24].mxu1 %vm247_vm1, %v7046_v43  ;;  %5196 = vmatmul.mubr.msk.f32.gmra.mrb[22].mxu0 %vm247_vm1, %v6097_v18 }
 0x148   : > { %5001 = vmatprep.mubr.msk.f32.mxu1 %vm247_vm1, %v7048_v51  ;;  %5198 = vmatprep.mubr.msk.f32.mxu0 %vm247_vm1, %v6101_v14 }
 0x14b   : > { %5002 = vmatmul.mubr.msk.f32.gmra.mrb[26].mxu1 %vm247_vm1, %v7050_v30  ;;  %5199 = vmatmul.mubr.msk.f32.gmra.mrb[24].mxu0 %vm247_vm1, %v6113_v9 }
 0x14c   : > { %5004 = vmatprep.mubr.msk.f32.mxu1 %vm247_vm1, %v7051_v3  ;;  %5201 = vmatprep.mubr.msk.f32.mxu0 %vm247_vm1, %v6117_v5 }
 0x14f   : > { %5005 = vmatmul.mubr.msk.f32.gmra.mrb[28].mxu1 %vm247_vm1, %v7053_v49  ;;  %5202 = vmatmul.mubr.msk.f32.gmra.mrb[26].mxu0 %vm247_vm1, %v7025_v32 }
 0x150   : > { %5007 = vmatprep.mubr.msk.f32.mxu1 %vm247_vm1, %v6432_v34  ;;  %5204 = vmatprep.mubr.msk.f32.mxu0 %vm247_vm1, %v7054_v54 }
 0x153   : > { %5008 = vmatmul.mubr.msk.f32.gmra.mrb[30].mxu1 %vm247_vm1, %v6442_v53  ;;  %5205 = vmatmul.mubr.msk.f32.gmra.mrb[28].mxu0 %vm247_vm1, %v7055_v59 }
 0x154   : > { %5207 = vmatprep.mubr.msk.f32.mxu0 %vm247_vm1, %v3441_v56 }
 0x157   : > { %5208 = vmatmul.mubr.msk.f32.gmra.mrb[30].mxu0 %vm247_vm1, %v3442_v61 }
 0x1ca   : > { %v4914_v62 = vpop.f32.mrb[0].mxu1 }
 0x1cb   : > { %v1659_v1 = vpop.f32.mrb[1].mxu1 }
 0x1ce   : > { %v4917_v4 = vpop.f32.mrb[2].mxu1 }
 0x1cf   : > { %v1669_v5 = vpop.f32.mrb[3].mxu1 }
 0x1d2   : > { %v4920_v6 = vpop.f32.mrb[4].mxu1 }
 0x1d3   : > { %v1679_v8 = vpop.f32.mrb[5].mxu1 }
 0x1d6   : > { %v4923_v9 = vpop.f32.mrb[6].mxu1 }
 0x1d7   : > { %v1689_v10 = vpop.f32.mrb[7].mxu1 }
 0x1da   : > { %v4926_v12 = vpop.f32.mrb[8].mxu1 }
 0x1db   : > { %v1699_v13 = vpop.f32.mrb[9].mxu1 }
 0x1de   : > { %v4929_v14 = vpop.f32.mrb[10].mxu1 }
 0x1df   : > { %v1709_v15 = vpop.f32.mrb[11].mxu1 }
 0x1e2   : > { %v6576_v17 = vpop.f32.mrb[12].mxu1 }
 0x1e3   : > { %v6578_v18 = vpop.f32.mrb[13].mxu1 }
 0x1e6   : > { %v6580_v19 = vpop.f32.mrb[14].mxu1 }
 0x1e7   : > { %v6582_v20 = vpop.f32.mrb[15].mxu1 }
 0x1ee   : > { %v5164_v21 = vpop.f32.mrb[0].mxu0 }
 0x1ef   : > { %v6591_v22 = vadd.f32 %v5164_v21, %v4914_v62  ;;  %v3610_v23 = vpop.f32.mrb[1].mxu0 }
 0x1f0   : > { %v6593_v25 = vadd.f32 %v3610_v23, %v1659_v1 }
 0x1f1   : > { %3803 = vst.msk [vmem:[%s6589_s18 + $0x8] sm:$0xff] %vm3801_vm3, %v6591_v22  ;;  %v3835_v27 = vsel %vm3801_vm3, %v6591_v22, 0.0 }
 0x1f2   : > { %3802 = vst.msk [vmem:[%s6589_s18] sm:$0xff] %vm3801_vm3, %v6593_v25  ;;  %v3834_v28 = vsel %vm3801_vm3, %v6593_v25, 0.0  ;;  %v5167_v29 = vpop.f32.mrb[2].mxu0 }
 0x1f3   : > { %v6605_v31 = vadd.f32 %v5167_v29, %v4917_v4  ;;  %v3620_v33 = vpop.f32.mrb[3].mxu0  ;;  %v3836_v39 = vadd.f32 %v3835_v27, %v3834_v28 }
 0x1f4   : > { %v6607_v38 = vadd.f32 %v3620_v33, %v1669_v5 }
 0x1f5   : > { %3805 = vst.msk [vmem:[%s6589_s18 + $0x18] sm:$0xff] %vm3801_vm3, %v6605_v31  ;;  %v3839_v46 = vsel %vm3801_vm3, %v6605_v31, 0.0 }
 0x1f6   : > { %3804 = vst.msk [vmem:[%s6589_s18 + $0x10] sm:$0xff] %vm3801_vm3, %v6607_v38  ;;  %v3837_v11 = vsel %vm3801_vm3, %v6607_v38, 0.0  ;;  %v5170_v40 = vpop.f32.mrb[4].mxu0 }
 0x1f7   : > { %v3838_v42 = vadd.f32 %v3837_v11, %v3836_v39  ;;  %v6617_v44 = vadd.f32 %v5170_v40, %v4920_v6  ;;  %v3630_v45 = vpop.f32.mrb[5].mxu0 }
 0x1f8   : > { %v6621_v47 = vadd.f32 %v3630_v45, %v1679_v8 }
 0x1f9   : > { %3807 = vst.msk [vmem:[%s6589_s18 + $0x28] sm:$0xff] %vm3801_vm3, %v6617_v44  ;;  %v3840_v57 = vadd.f32 %v3839_v46, %v3838_v42  ;;  %v3843_v60 = vsel %vm3801_vm3, %v6617_v44, 0.0 }
 0x1fa   : > { %3806 = vst.msk [vmem:[%s6589_s18 + $0x20] sm:$0xff] %vm3801_vm3, %v6621_v47  ;;  %v3841_v58 = vsel %vm3801_vm3, %v6621_v47, 0.0  ;;  %v5173_v24 = vpop.f32.mrb[6].mxu0 }
 0x1fb   : > { %v3842_v26 = vadd.f32 %v3841_v58, %v3840_v57  ;;  %v6631_v63 = vadd.f32 %v5173_v24, %v4923_v9  ;;  %v3640_v55 = vpop.f32.mrb[7].mxu0 }
 0x1fc   : > { %v6635_v32 = vadd.f32 %v3640_v55, %v1689_v10 }
 0x1fd   : > { %3809 = vst.msk [vmem:[%s6589_s18 + $0x38] sm:$0xff] %vm3801_vm3, %v6631_v63  ;;  %v3844_v36 = vadd.f32 %v3843_v60, %v3842_v26  ;;  %v3847_v2 = vsel %vm3801_vm3, %v6631_v63, 0.0 }
 0x1fe   : > { %3808 = vst.msk [vmem:[%s6589_s18 + $0x30] sm:$0xff] %vm3801_vm3, %v6635_v32  ;;  %v3845_v41 = vsel %vm3801_vm3, %v6635_v32, 0.0  ;;  %v5176_v48 = vpop.f32.mrb[8].mxu0 }
 0x1ff   : > { %v3846_v50 = vadd.f32 %v3845_v41, %v3844_v36  ;;  %v6645_v52 = vadd.f32 %v5176_v48, %v4926_v12  ;;  %v3650_v0 = vpop.f32.mrb[9].mxu0 }
 0x200   : > { %v6649_v16 = vadd.f32 %v3650_v0, %v1699_v13 }
 0x201   : > { %3811 = vst.msk [vmem:[%s6589_s18 + $0x48] sm:$0xff] %vm3801_vm3, %v6645_v52  ;;  %v3848_v35 = vadd.f32 %v3847_v2, %v3846_v50  ;;  %v3851_v49 = vsel %vm3801_vm3, %v6645_v52, 0.0 }
 0x202   : > { %3810 = vst.msk [vmem:[%s6589_s18 + $0x40] sm:$0xff] %vm3801_vm3, %v6649_v16  ;;  %v3849_v43 = vsel %vm3801_vm3, %v6649_v16, 0.0  ;;  %v5179_v51 = vpop.f32.mrb[10].mxu0 }
 0x203   : > { %v3850_v30 = vadd.f32 %v3849_v43, %v3848_v35  ;;  %v6659_v3 = vadd.f32 %v5179_v51, %v4929_v14  ;;  %v3660_v34 = vpop.f32.mrb[11].mxu0 }
 0x204   : > { %v6663_v53 = vadd.f32 %v3660_v34, %v1709_v15 }
 0x205   : > { %3813 = vst.msk [vmem:[%s6589_s18 + $0x58] sm:$0xff] %vm3801_vm3, %v6659_v3  ;;  %v3852_v7 = vadd.f32 %v3851_v49, %v3850_v30  ;;  %v3855_v62 = vsel %vm3801_vm3, %v6659_v3, 0.0 }
 0x206   : > { %3812 = vst.msk [vmem:[%s6589_s18 + $0x50] sm:$0xff] %vm3801_vm3, %v6663_v53  ;;  %v3853_v37 = vsel %vm3801_vm3, %v6663_v53, 0.0  ;;  %v5182_v54 = vpop.f32.mrb[12].mxu0 }
 0x207   : > { %v3854_v56 = vadd.f32 %v3853_v37, %v3852_v7  ;;  %v6674_v59 = vadd.f32 %v5182_v54, %v6576_v17  ;;  %v3670_v61 = vpop.f32.mrb[13].mxu0 }
 0x208   : > { %v6679_v1 = vadd.f32 %v3670_v61, %v6578_v18 }
 0x209   : > { %3815 = vst.msk [vmem:[%s6589_s18 + $0x68] sm:$0xff] %vm3801_vm3, %v6674_v59  ;;  %v3856_v4 = vadd.f32 %v3855_v62, %v3854_v56  ;;  %v3859_v14 = vsel %vm3801_vm3, %v6674_v59, 0.0 }
 0x20a   : > { %3814 = vst.msk [vmem:[%s6589_s18 + $0x60] sm:$0xff] %vm3801_vm3, %v6679_v1  ;;  %v3857_v5 = vsel %vm3801_vm3, %v6679_v1, 0.0  ;;  %v4988_v6 = vpop.f32.mrb[16].mxu1  ;;  %v5185_v8 = vpop.f32.mrb[14].mxu0 }
 0x20b   : > { %v3858_v9 = vadd.f32 %v3857_v5, %v3856_v4  ;;  %v6690_v10 = vadd.f32 %v5185_v8, %v6580_v19  ;;  %v2129_v12 = vpop.f32.mrb[17].mxu1  ;;  %v3680_v13 = vpop.f32.mrb[15].mxu0 }
 0x20c   : > { %v6695_v15 = vadd.f32 %v3680_v13, %v6582_v20 }
 0x20d   : > { %3817 = vst.msk [vmem:[%s6589_s18 + $0x78] sm:$0xff] %vm3801_vm3, %v6690_v10  ;;  %v3860_v17 = vadd.f32 %v3859_v14, %v3858_v9  ;;  %v3863_v20 = vsel %vm3801_vm3, %v6690_v10, 0.0 }
 0x20e   : > { %3816 = vst.msk [vmem:[%s6589_s18 + $0x70] sm:$0xff] %vm3801_vm3, %v6695_v15  ;;  %v3861_v18 = vsel %vm3801_vm3, %v6695_v15, 0.0  ;;  %v4991_v19 = vpop.f32.mrb[18].mxu1  ;;  %v5188_v21 = vpop.f32.mrb[16].mxu0 }
 0x20f   : > { %v3862_v23 = vadd.f32 %v3861_v18, %v3860_v17  ;;  %v6705_v27 = vadd.f32 %v5188_v21, %v4988_v6  ;;  %v2139_v28 = vpop.f32.mrb[19].mxu1  ;;  %v3690_v29 = vpop.f32.mrb[17].mxu0 }
 0x210   : > { %v6709_v33 = vadd.f32 %v3690_v29, %v2129_v12 }
 0x211   : > { %3819 = vst.msk [vmem:[%s6589_s18 + $0x88] sm:$0xff] %vm3801_vm3, %v6705_v27  ;;  %v3864_v39 = vadd.f32 %v3863_v20, %v3862_v23  ;;  %v3867_v24 = vsel %vm3801_vm3, %v6705_v27, 0.0 }
 0x212   : > { %3818 = vst.msk [vmem:[%s6589_s18 + $0x80] sm:$0xff] %vm3801_vm3, %v6709_v33  ;;  %v3865_v11 = vsel %vm3801_vm3, %v6709_v33, 0.0  ;;  %v4994_v40 = vpop.f32.mrb[20].mxu1  ;;  %v5191_v42 = vpop.f32.mrb[18].mxu0 }
 0x213   : > { %v3866_v45 = vadd.f32 %v3865_v11, %v3864_v39  ;;  %v6719_v46 = vadd.f32 %v5191_v42, %v4991_v19  ;;  %v2149_v57 = vpop.f32.mrb[21].mxu1  ;;  %v3700_v58 = vpop.f32.mrb[19].mxu0 }
 0x214   : > { %v6723_v26 = vadd.f32 %v3700_v58, %v2139_v28 }
 0x215   : > { %3821 = vst.msk [vmem:[%s6589_s18 + $0x98] sm:$0xff] %vm3801_vm3, %v6719_v46  ;;  %v3868_v55 = vadd.f32 %v3867_v24, %v3866_v45  ;;  %v3871_v35 = vsel %vm3801_vm3, %v6719_v46, 0.0 }
 0x216   : > { %3820 = vst.msk [vmem:[%s6589_s18 + $0x90] sm:$0xff] %vm3801_vm3, %v6723_v26  ;;  %v3869_v60 = vsel %vm3801_vm3, %v6723_v26, 0.0  ;;  %v4997_v36 = vpop.f32.mrb[22].mxu1  ;;  %v5194_v41 = vpop.f32.mrb[20].mxu0 }
 0x217   : > { %v3870_v48 = vadd.f32 %v3869_v60, %v3868_v55  ;;  %v6733_v50 = vadd.f32 %v5194_v41, %v4994_v40  ;;  %v2159_v0 = vpop.f32.mrb[23].mxu1  ;;  %v3710_v2 = vpop.f32.mrb[21].mxu0 }
 0x218   : > { %v6737_v43 = vadd.f32 %v3710_v2, %v2149_v57 }
 0x219   : > { %3823 = vst.msk [vmem:[%s6589_s18 + $0xa8] sm:$0xff] %vm3801_vm3, %v6733_v50  ;;  %v3872_v51 = vadd.f32 %v3871_v35, %v3870_v48  ;;  %v3875_v61 = vsel %vm3801_vm3, %v6733_v50, 0.0 }
 0x21a   : > { %3822 = vst.msk [vmem:[%s6589_s18 + $0xa0] sm:$0xff] %vm3801_vm3, %v6737_v43  ;;  %v3873_v30 = vsel %vm3801_vm3, %v6737_v43, 0.0  ;;  %v5000_v34 = vpop.f32.mrb[24].mxu1  ;;  %v5197_v49 = vpop.f32.mrb[22].mxu0 }
 0x21b   : > { %v3874_v7 = vadd.f32 %v3873_v30, %v3872_v51  ;;  %v6747_v37 = vadd.f32 %v5197_v49, %v4997_v36  ;;  %v2169_v54 = vpop.f32.mrb[25].mxu1  ;;  %v3720_v56 = vpop.f32.mrb[23].mxu0 }
 0x21c   : > { %v6751_v62 = vadd.f32 %v3720_v56, %v2159_v0 }
 0x21d   : > { %3825 = vst.msk [vmem:[%s6589_s18 + $0xb8] sm:$0xff] %vm3801_vm3, %v6747_v37  ;;  %v3876_v4 = vadd.f32 %v3875_v61, %v3874_v7  ;;  %v3879_v17 = vsel %vm3801_vm3, %v6747_v37, 0.0 }
 0x21e   : > { %3824 = vst.msk [vmem:[%s6589_s18 + $0xb0] sm:$0xff] %vm3801_vm3, %v6751_v62  ;;  %v3877_v5 = vsel %vm3801_vm3, %v6751_v62, 0.0  ;;  %v5003_v6 = vpop.f32.mrb[26].mxu1  ;;  %v5200_v8 = vpop.f32.mrb[24].mxu0 }
 0x21f   : > { %v3878_v9 = vadd.f32 %v3877_v5, %v3876_v4  ;;  %v6761_v12 = vadd.f32 %v5200_v8, %v5000_v34  ;;  %v2179_v13 = vpop.f32.mrb[27].mxu1  ;;  %v3730_v14 = vpop.f32.mrb[25].mxu0 }
 0x220   : > { %v6765_v18 = vadd.f32 %v3730_v14, %v2169_v54 }
 0x221   : > { %3827 = vst.msk [vmem:[%s6589_s18 + $0xc8] sm:$0xff] %vm3801_vm3, %v6761_v12  ;;  %v3880_v19 = vadd.f32 %v3879_v17, %v3878_v9  ;;  %v3883_v40 = vsel %vm3801_vm3, %v6761_v12, 0.0 }
 0x222   : > { %3826 = vst.msk [vmem:[%s6589_s18 + $0xc0] sm:$0xff] %vm3801_vm3, %v6765_v18  ;;  %v3881_v21 = vsel %vm3801_vm3, %v6765_v18, 0.0  ;;  %v5006_v23 = vpop.f32.mrb[28].mxu1  ;;  %v5203_v28 = vpop.f32.mrb[26].mxu0 }
 0x223   : > { %v3882_v29 = vadd.f32 %v3881_v21, %v3880_v19  ;;  %v5238_v20 = vadd.f32 %v5203_v28, %v5003_v6  ;;  %v2189_v39 = vpop.f32.mrb[29].mxu1  ;;  %v3740_v11 = vpop.f32.mrb[27].mxu0 }
 0x224   : > { %v5239_v42 = vadd.f32 %v3740_v11, %v2179_v13 }
 0x225   : > { %3829 = vst.msk [vmem:[%s6589_s18 + $0xd8] sm:$0xff] %vm3801_vm3, %v5238_v20  ;;  %v3884_v45 = vadd.f32 %v3883_v40, %v3882_v29  ;;  %v3887_v48 = vsel %vm3801_vm3, %v5238_v20, 0.0 }
 0x226   : > { %3828 = vst.msk [vmem:[%s6589_s18 + $0xd0] sm:$0xff] %vm3801_vm3, %v5239_v42  ;;  %v3885_v57 = vsel %vm3801_vm3, %v5239_v42, 0.0  ;;  %v5009_v58 = vpop.f32.mrb[30].mxu1  ;;  %v5206_v24 = vpop.f32.mrb[28].mxu0 }
 0x227   : > { %v3886_v55 = vadd.f32 %v3885_v57, %v3884_v45  ;;  %v5240_v60 = vadd.f32 %v5206_v24, %v5006_v23  ;;  %v2199_v36 = vpop.f32.mrb[31].mxu1  ;;  %v3750_v41 = vpop.f32.mrb[29].mxu0 }
 0x228   : > { %v5241_v0 = vadd.f32 %v3750_v41, %v2189_v39 }
 0x229   : > { %3831 = vst.msk [vmem:[%s6589_s18 + $0xe8] sm:$0xff] %vm3801_vm3, %v5240_v60  ;;  %v3888_v2 = vadd.f32 %v3887_v48, %v3886_v55  ;;  %v3891_v7 = vsel %vm3801_vm3, %v5240_v60, 0.0 }
 0x22a   : > { %3830 = vst.msk [vmem:[%s6589_s18 + $0xe0] sm:$0xff] %vm3801_vm3, %v5241_v0  ;;  %v3889_v35 = vsel %vm3801_vm3, %v5241_v0, 0.0  ;;  %v5209_v51 = vpop.f32.mrb[30].mxu0 }
 0x22b   : > { %v3890_v30 = vadd.f32 %v3889_v35, %v3888_v2  ;;  %v5242_v34 = vadd.f32 %v5209_v51, %v5009_v58  ;;  %v3760_v49 = vpop.f32.mrb[31].mxu0 }
 0x22c   : > { %v5243_v54 = vadd.f32 %v3760_v49, %v2199_v36 }
 0x22d   : > { %3833 = vst.msk [vmem:[%s6589_s18 + $0xf8] sm:$0xff] %vm3801_vm3, %v5242_v34  ;;  %v3892_v56 = vadd.f32 %v3891_v7, %v3890_v30  ;;  %v3895_v5 = vsel %vm3801_vm3, %v5242_v34, 0.0 }
 0x22e   : > { %3832 = vst.msk [vmem:[%s6589_s18 + $0xf0] sm:$0xff] %vm3801_vm3, %v5243_v54  ;;  %v3893_v61 = vsel %vm3801_vm3, %v5243_v54, 0.0 }
 0x22f   : > { %v3894_v4 = vadd.f32 %v3893_v61, %v3892_v56 }
 0x231   : > { %v3896_v6 = vadd.f32 %v3895_v5, %v3894_v4 }
 0x233   : > { %v3897_v8 = vrot.slane %v3896_v6, 4 }
 0x235   : > { %v3898_v9 = vadd.f32 %v3897_v8, %v3896_v6 }
 0x237   : > { %v3899_v13 = vrot.slane %v3898_v9, 2 }
 0x239   : > { %v3900_v14 = vadd.f32 %v3899_v13, %v3898_v9 }
 0x23b   : > { %v3901_v17 = vrot.slane %v3900_v14, 1 }
 0x23d   : > { %v3902_v19 = vadd.f32 %v3901_v17, %v3900_v14 }
 0x23f   : > { %v3903_v21 = vmul.f32 0.00390625, %v3902_v19  ;;  %4038 = vst.msk [vmem:[%s211_s21] sm:$0x1] %vm4037_vm4, %v3902_v19 }
 0x241   : > { %v3914_v23 = vsub.f32 %v6663_v53, %v3903_v21  ;;  %v3915_v28 = vsub.f32 %v6659_v3, %v3903_v21  ;;  %v3916_v29 = vsub.f32 %v6679_v1, %v3903_v21  ;;  %v6804_v39 = vsub.f32 %v6674_v59, %v3903_v21 }
 0x242   : > { %v6807_v11 = vsub.f32 %v6695_v15, %v3903_v21  ;;  %v6810_v40 = vsub.f32 %v6690_v10, %v3903_v21  ;;  %v6813_v45 = vsub.f32 %v6709_v33, %v3903_v21  ;;  %v6816_v57 = vsub.f32 %v6705_v27, %v3903_v21 }
 0x243   : > { %v6819_v53 = vsub.f32 %v6723_v26, %v3903_v21  ;;  %v6822_v3 = vsub.f32 %v6719_v46, %v3903_v21  ;;  %v6825_v59 = vsub.f32 %v6737_v43, %v3903_v21  ;;  %v6828_v1 = vsub.f32 %v6733_v50, %v3903_v21 }
 0x244   : > { %v6831_v10 = vsub.f32 %v6751_v62, %v3903_v21  ;;  %v6834_v15 = vsub.f32 %v6747_v37, %v3903_v21  ;;  %v6837_v27 = vsub.f32 %v6765_v18, %v3903_v21  ;;  %v6840_v33 = vsub.f32 %v6761_v12, %v3903_v21 }
 0x245   : > { %v6842_v46 = vsub.f32 %v5239_v42, %v3903_v21  ;;  %v6844_v26 = vsub.f32 %v5238_v20, %v3903_v21  ;;  %v6846_v43 = vsub.f32 %v5241_v0, %v3903_v21  ;;  %v6848_v50 = vsub.f32 %v5240_v60, %v3903_v21 }
 0x246   : > { %v6850_v58 = vsub.f32 %v5243_v54, %v3903_v21  ;;  %v6852_v62 = vsub.f32 %v5242_v34, %v3903_v21  ;;  %v3904_v37 = vsub.f32 %v6593_v25, %v3903_v21  ;;  %v3905_v18 = vsub.f32 %v6591_v22, %v3903_v21 }
 0x247   : > { %v3906_v24 = vsub.f32 %v6607_v38, %v3903_v21  ;;  %v3907_v12 = vsub.f32 %v6605_v31, %v3903_v21  ;;  %v3908_v20 = vsub.f32 %v6621_v47, %v3903_v21  ;;  %v3909_v60 = vsub.f32 %v6617_v44, %v3903_v21 }
 0x248   : > { %v3936_v42 = vmul.f32 %v3904_v37, %v3904_v37  ;;  %v3937_v55 = vmul.f32 %v3905_v18, %v3905_v18  ;;  %v3910_v25 = vsub.f32 %v6635_v32, %v3903_v21  ;;  %v3911_v31 = vsub.f32 %v6631_v63, %v3903_v21 }
 0x249   : > { %v3938_v36 = vmul.f32 %v3906_v24, %v3906_v24  ;;  %v3939_v41 = vmul.f32 %v3907_v12, %v3907_v12  ;;  %v3940_v22 = vmul.f32 %v3908_v20, %v3908_v20  ;;  %v3941_v51 = vmul.f32 %v3909_v60, %v3909_v60 }
 0x24a   : > { %v3968_v48 = vsel %vm3801_vm3, %v3936_v42, 0.0  ;;  %v3969_v0 = vsel %vm3801_vm3, %v3937_v55, 0.0  ;;  %v3912_v44 = vsub.f32 %v6649_v16, %v3903_v21  ;;  %v3942_v34 = vmul.f32 %v3910_v25, %v3910_v25 }
 0x24b   : > { %v3970_v2 = vadd.f32 %v3969_v0, %v3968_v48  ;;  %v3971_v38 = vsel %vm3801_vm3, %v3938_v36, 0.0  ;;  %v3973_v47 = vsel %vm3801_vm3, %v3939_v41, 0.0  ;;  %v3975_v49 = vsel %vm3801_vm3, %v3940_v22, 0.0 }
 0x24c   : > { %v3913_v54 = vsub.f32 %v6645_v52, %v3903_v21  ;;  %v3943_v56 = vmul.f32 %v3911_v31, %v3911_v31  ;;  %v3977_v32 = vsel %vm3801_vm3, %v3941_v51, 0.0  ;;  %v3944_v4 = vmul.f32 %v3912_v44, %v3912_v44 }
 0x24d   : > { %v3972_v35 = vadd.f32 %v3971_v38, %v3970_v2  ;;  %v3979_v5 = vsel %vm3801_vm3, %v3942_v34, 0.0  ;;  %v3946_v13 = vmul.f32 %v3914_v23, %v3914_v23  ;;  %v3947_v17 = vmul.f32 %v3915_v28, %v3915_v28 }
 0x24e   : > { %v3945_v6 = vmul.f32 %v3913_v54, %v3913_v54  ;;  %v3981_v8 = vsel %vm3801_vm3, %v3943_v56, 0.0  ;;  %v3983_v16 = vsel %vm3801_vm3, %v3944_v4, 0.0  ;;  %v3948_v21 = vmul.f32 %v3916_v29, %v3916_v29 }
 0x24f   : > { %v3974_v30 = vadd.f32 %v3973_v47, %v3972_v35  ;;  %v3987_v37 = vsel %vm3801_vm3, %v3946_v13, 0.0  ;;  %v3949_v24 = vmul.f32 %v6804_v39, %v6804_v39  ;;  %v3989_v12 = vsel %vm3801_vm3, %v3947_v17, 0.0 }
 0x250   : > { %v3985_v19 = vsel %vm3801_vm3, %v3945_v6, 0.0  ;;  %v3950_v23 = vmul.f32 %v6807_v11, %v6807_v11  ;;  %v3991_v55 = vsel %vm3801_vm3, %v3948_v21, 0.0  ;;  %v3951_v28 = vmul.f32 %v6810_v40, %v6810_v40 }
 0x251   : > { %v3976_v7 = vadd.f32 %v3975_v49, %v3974_v30  ;;  %v3993_v29 = vsel %vm3801_vm3, %v3949_v24, 0.0  ;;  %v3952_v60 = vmul.f32 %v6813_v45, %v6813_v45  ;;  %v3953_v48 = vmul.f32 %v6816_v57, %v6816_v57 }
 0x252   : > { %v3995_v39 = vsel %vm3801_vm3, %v3950_v23, 0.0  ;;  %v3997_v11 = vsel %vm3801_vm3, %v3951_v28, 0.0  ;;  %v3954_v2 = vmul.f32 %v6819_v53, %v6819_v53  ;;  %v3955_v22 = vmul.f32 %v6822_v3, %v6822_v3 }
 0x253   : > { %v3978_v61 = vadd.f32 %v3977_v32, %v3976_v7  ;;  %v3999_v40 = vsel %vm3801_vm3, %v3952_v60, 0.0  ;;  %v4001_v45 = vsel %vm3801_vm3, %v3953_v48, 0.0  ;;  %v3956_v35 = vmul.f32 %v6825_v59, %v6825_v59 }
 0x254   : > { %v4003_v57 = vsel %vm3801_vm3, %v3954_v2, 0.0  ;;  %v3957_v51 = vmul.f32 %v6828_v1, %v6828_v1  ;;  %v4005_v53 = vsel %vm3801_vm3, %v3955_v22, 0.0  ;;  %v3958_v30 = vmul.f32 %v6831_v10, %v6831_v10 }
 0x255   : > { %v3980_v63 = vadd.f32 %v3979_v5, %v3978_v61  ;;  %v4007_v3 = vsel %vm3801_vm3, %v3956_v35, 0.0  ;;  %v3959_v34 = vmul.f32 %v6834_v15, %v6834_v15  ;;  %v3960_v7 = vmul.f32 %v6837_v27, %v6837_v27 }
 0x256   : > { %v4009_v59 = vsel %vm3801_vm3, %v3957_v51, 0.0  ;;  %v4011_v1 = vsel %vm3801_vm3, %v3958_v30, 0.0  ;;  %v3961_v56 = vmul.f32 %v6840_v33, %v6840_v33  ;;  %v3962_v61 = vmul.f32 %v6842_v46, %v6842_v46 }
 0x257   : > { %v3982_v9 = vadd.f32 %v3981_v8, %v3980_v63  ;;  %v4013_v10 = vsel %vm3801_vm3, %v3959_v34, 0.0  ;;  %v4015_v15 = vsel %vm3801_vm3, %v3960_v7, 0.0  ;;  %v3963_v5 = vmul.f32 %v6844_v26, %v6844_v26 }
 0x258   : > { %v4017_v27 = vsel %vm3801_vm3, %v3961_v56, 0.0  ;;  %v3964_v6 = vmul.f32 %v6846_v43, %v6846_v43  ;;  %v4019_v33 = vsel %vm3801_vm3, %v3962_v61, 0.0  ;;  %v3967_v17 = vmul.f32 %v6852_v62, %v6852_v62 }
 0x259   : > { %v3984_v14 = vadd.f32 %v3983_v16, %v3982_v9  ;;  %v3965_v9 = vmul.f32 %v6848_v50, %v6848_v50  ;;  %v4021_v46 = vsel %vm3801_vm3, %v3963_v5, 0.0  ;;  %v3966_v16 = vmul.f32 %v6850_v58, %v6850_v58 }
 0x25a   : > { %v4023_v26 = vsel %vm3801_vm3, %v3964_v6, 0.0  ;;  %v4029_v50 = vsel %vm3801_vm3, %v3967_v17, 0.0 }
 0x25b   : > { %v3986_v52 = vadd.f32 %v3985_v19, %v3984_v14  ;;  %v4025_v43 = vsel %vm3801_vm3, %v3965_v9, 0.0 }
 0x25d   : > { %v3988_v18 = vadd.f32 %v3987_v37, %v3986_v52  ;;  %v4027_v52 = vsel %vm3801_vm3, %v3966_v16, 0.0 }
 0x25f   : > { %v3990_v42 = vadd.f32 %v3989_v12, %v3988_v18 }
 0x261   : > { %v3992_v20 = vadd.f32 %v3991_v55, %v3990_v42 }
 0x263   : > { %v3994_v36 = vadd.f32 %v3993_v29, %v3992_v20 }
 0x265   : > { %v3996_v41 = vadd.f32 %v3995_v39, %v3994_v36 }
 0x267   : > { %v3998_v0 = vadd.f32 %v3997_v11, %v3996_v41 }
 0x269   : > { %v4000_v25 = vadd.f32 %v3999_v40, %v3998_v0 }
 0x26b   : > { %v4002_v38 = vadd.f32 %v4001_v45, %v4000_v25 }
 0x26d   : > { %v4004_v31 = vadd.f32 %v4003_v57, %v4002_v38 }
 0x26f   : > { %v4006_v47 = vadd.f32 %v4005_v53, %v4004_v31 }
 0x271   : > { %v4008_v44 = vadd.f32 %v4007_v3, %v4006_v47 }
 0x273   : > { %v4010_v49 = vadd.f32 %v4009_v59, %v4008_v44 }
 0x275   : > { %v4012_v54 = vadd.f32 %v4011_v1, %v4010_v49 }
 0x277   : > { %v4014_v32 = vadd.f32 %v4013_v10, %v4012_v54 }
 0x279   : > { %v4016_v4 = vadd.f32 %v4015_v15, %v4014_v32 }
 0x27b   : > { %v4018_v63 = vadd.f32 %v4017_v27, %v4016_v4 }
 0x27d   : > { %v4020_v8 = vadd.f32 %v4019_v33, %v4018_v63 }
 0x27f   : > { %v4022_v13 = vadd.f32 %v4021_v46, %v4020_v8 }
 0x281   : > { %v4024_v14 = vadd.f32 %v4023_v26, %v4022_v13 }
 0x283   : > { %v4026_v19 = vadd.f32 %v4025_v43, %v4024_v14 }
 0x285   : > { %v4028_v21 = vadd.f32 %v4027_v52, %v4026_v19 }
 0x287   : > { %v4030_v37 = vadd.f32 %v4029_v50, %v4028_v21 }
 0x289   : > { %v4031_v18 = vrot.slane %v4030_v37, 4 }
 0x28b   : > { %v4032_v24 = vadd.f32 %v4031_v18, %v4030_v37 }
 0x28d   : > { %v4033_v12 = vrot.slane %v4032_v24, 2 }
 0x28f   : > { %v4034_v42 = vadd.f32 %v4033_v12, %v4032_v24 }
 0x291   : > { %v4035_v58 = vrot.slane %v4034_v42, 1 }
 0x293   : > { %v4036_v23 = vadd.f32 %v4035_v58, %v4034_v42 }
 0x295   : > { %4039 = vst.msk [vmem:[%s214_s24] sm:$0x1] %vm4037_vm4, %v4036_v23 }
 0x296 PF: > { %s15_s15 = sadd.s32 1, %s5483_s15  }
 0x297   : > { %p12_p4 = scmp.ge.s32.totalorder %s15_s15, 4  }
 0x299   :  { %14 = sbr.rel (!%p12_p4) target bundleno = 1 (0x1), region = 92 }

</bundles_post_ra>
